<compile_context>
chip_gen: v5e
topology: v5e:2x2
jax: 0.10.0
libtpu: 0.0.40
codegen_flags: <defaults>
</compile_context>

<pallas_src>
import functools

import jax
import jax.numpy as jnp
from jax import lax
from jax.experimental import pallas as pl
from jax.experimental.pallas import tpu as pltpu


# ----------------------------------------------------------------------------
# In-kernel im2col: scatter the 9 zero-padded 3x3 taps of y (N, H, W, C) into
# a (N, H, W, 9*C) VMEM scratch (border strips zeroed, interior written from
# shifted slices) and return the (N*H*W, 9*C) patch matrix.
# ----------------------------------------------------------------------------
def _im2col_3x3(y, col_ref):
    N, H, W, C = y.shape
    for dy in range(3):
        for dx in range(3):
            t = dy * 3 + dx
            oy, ox = dy - 1, dx - 1
            c0, c1 = t * C, (t + 1) * C
            # zero only the out-of-range 1-pixel border strips of this tap
            if oy < 0:
                col_ref[:, 0:1, :, c0:c1] = jnp.zeros((N, 1, W, C), y.dtype)
            if oy > 0:
                col_ref[:, H - 1:H, :, c0:c1] = jnp.zeros((N, 1, W, C), y.dtype)
            if ox < 0:
                col_ref[:, :, 0:1, c0:c1] = jnp.zeros((N, H, 1, C), y.dtype)
            if ox > 0:
                col_ref[:, :, W - 1:W, c0:c1] = jnp.zeros((N, H, 1, C), y.dtype)
            # valid (in-range) region of the shifted view
            di0, di1 = max(0, -oy), H - max(0, oy)
            dj0, dj1 = max(0, -ox), W - max(0, ox)
            col_ref[:, di0:di1, dj0:dj1, c0:c1] = (
                y[:, di0 + oy:di1 + oy, dj0 + ox:dj1 + ox, :])
    return col_ref[...].reshape(N * H * W, 9 * C)


# ----------------------------------------------------------------------------
# Fused per-level kernel:
#   conv3x3 (im2col matmul) + bias + ReLU
#   -> BatchNorm2d (training-mode batch statistics over N, H, W)
#   -> conv3x3 (im2col matmul) + bias
#   -> bilinear x2^k upsample as one matmul with the precomputed operator U
# Output is stored lane-dense as (Cout, N*Hs*Ws).
# ----------------------------------------------------------------------------
def _fpn_level_kernel(x_ref, w1_ref, b1_ref, gamma_ref, beta_ref,
                      w2_ref, b2_ref, u_ref, out_ref, col1_ref, col2_ref,
                      *, N, H, W):
    Cmid = w1_ref.shape[-1]

    # ---- conv1: single (N*H*W, 9*Cin) @ (9*Cin, Cmid) matmul ----
    p1 = _im2col_3x3(x_ref[...], col1_ref)
    y1 = jnp.dot(p1, w1_ref[...], preferred_element_type=jnp.float32)
    y1 = jnp.maximum(y1 + b1_ref[...], 0.0)                  # bias + ReLU

    # ---- BatchNorm2d, training-mode statistics over (N, H, W) ----
    mean = jnp.mean(y1, axis=0, keepdims=True)               # (1, Cmid)
    var = jnp.mean((y1 - mean) ** 2, axis=0, keepdims=True)  # biased variance
    y1 = (y1 - mean) * lax.rsqrt(var + 1e-5)
    y1 = y1 * gamma_ref[...] + beta_ref[...]

    # ---- conv2: single (N*H*W, 9*Cmid) @ (9*Cmid, Cout) matmul ----
    p2 = _im2col_3x3(y1.reshape(N, H, W, Cmid), col2_ref)
    y2 = jnp.dot(p2, w2_ref[...], preferred_element_type=jnp.float32)
    y2 = y2 + b2_ref[...]                                    # (N*H*W, Cout)

    # ---- fused bilinear upsample, lane-dense store ----
    # out^T[c, (n,Y,X)] = sum_{h,w} y2[(n,h,w), c] * Ah[Y,h] * Aw[X,w]
    out_ref[...] = jnp.dot(y2.T, u_ref[...],
                           preferred_element_type=jnp.float32)


def _bilinear_matrix(in_size, out_size):
    """PyTorch F.interpolate(mode='bilinear', align_corners=False) weights."""
    scale = in_size / out_size
    j = jnp.arange(out_size, dtype=jnp.float32)
    src = jnp.maximum(scale * (j + 0.5) - 0.5, 0.0)
    i0 = jnp.minimum(jnp.floor(src).astype(jnp.int32), in_size - 1)
    i1 = jnp.minimum(i0 + 1, in_size - 1)
    frac = src - i0.astype(jnp.float32)
    rows = jnp.arange(out_size)
    m = jnp.zeros((out_size, in_size), jnp.float32)
    m = m.at[rows, i0].add(1.0 - frac)
    m = m.at[rows, i1].add(frac)
    return m


# ----------------------------------------------------------------------------
# FPN forward (Pallas)
# ----------------------------------------------------------------------------
def fpn_forward(xs, last_layer, params):
    num_levels = len(xs)
    outs = []
    for i, (x, p) in enumerate(zip(xs, params)):
        scale = 2 ** (num_levels - i)
        N, Cin, H, W = x.shape
        Cmid = p["w1"].shape[-1]
        Cout = p["w2"].shape[-1]
        Hs, Ws = H * scale, W * scale

        # NCHW -> NHWC (channels on lanes inside the kernel)
        x_nhwc = jnp.transpose(x, (0, 2, 3, 1))

        # weights flattened for the wide-K im2col matmuls
        w1r = p["w1"].reshape(9 * Cin, Cmid)     # (3,3,Cin,Cmid) -> (9*Cin, Cmid)
        w2r = p["w2"].reshape(9 * Cmid, Cout)    # (3,3,Cmid,Cout) -> (9*Cmid, Cout)

        # combined bilinear-upsample operator, pre-transposed:
        #   U[(n,h,w), (n,Y,X)] = Ah[Y,h] * Aw[X,w]
        ah = _bilinear_matrix(H, Hs)             # (Hs, H)
        aw = _bilinear_matrix(W, Ws)             # (Ws, W)
        u = jnp.kron(jnp.eye(N, dtype=jnp.float32), jnp.kron(ah, aw)).T

        # explicit VMEM budget (actual footprint + headroom, <= v7x physical)
        vmem_need = 4 * (x_nhwc.size + w1r.size + w2r.size + 4 * Cmid
                         + u.size + Cout * N * Hs * Ws
                         + N * H * W * 9 * (Cin + Cmid))
        vmem_limit = min(48 * 1024 * 1024,
                         max(16 * 1024 * 1024, 2 * int(vmem_need)))

        out_t = pl.pallas_call(
            functools.partial(_fpn_level_kernel, N=N, H=H, W=W),
            out_shape=jax.ShapeDtypeStruct((Cout, N * Hs * Ws), jnp.float32),
            in_specs=[pl.BlockSpec(memory_space=pltpu.MemorySpace.VMEM)] * 8,
            out_specs=pl.BlockSpec(memory_space=pltpu.MemorySpace.VMEM),
            scratch_shapes=[
                pltpu.VMEM((N, H, W, 9 * Cin), jnp.float32),
                pltpu.VMEM((N, H, W, 9 * Cmid), jnp.float32),
            ],
            compiler_params=pltpu.CompilerParams(vmem_limit_bytes=vmem_limit),
        )(x_nhwc, w1r, p["b1"], p["gamma"], p["beta"], w2r, p["b2"], u)

        # (Cout, N, Hs, Ws) -> (N, Cout, Hs, Ws); only the final tensor is
        # permuted (cheap, outside the kernel) before the channel concat.
        up = out_t.reshape(Cout, N, Hs, Ws).transpose(1, 0, 2, 3)
        outs.append(up)

    outs.append(last_layer)
    return jnp.concatenate(outs, axis=1)         # cat along channel dim (NCHW)


# ----------------------------------------------------------------------------
# Pure-JAX reference (for verification)
# ----------------------------------------------------------------------------
def _conv3x3_ref(x_nhwc, w_hwio, b):
    y = lax.conv_general_dilated(
        x_nhwc, w_hwio, window_strides=(1, 1), padding="SAME",
        dimension_numbers=("NHWC", "HWIO", "NHWC"),
        precision=lax.Precision.HIGHEST)
    return y + b.reshape(1, 1, 1, -1)


def fpn_reference(xs, last_layer, params):
    num_levels = len(xs)
    outs = []
    for i, (x, p) in enumerate(zip(xs, params)):
        s = 2 ** (num_levels - i)
        xh = jnp.transpose(x, (0, 2, 3, 1))
        y1 = jnp.maximum(_conv3x3_ref(xh, p["w1"], p["b1"]), 0.0)
        mean = jnp.mean(y1, axis=(0, 1, 2), keepdims=True)
        var = jnp.mean((y1 - mean) ** 2, axis=(0, 1, 2), keepdims=True)
        y1 = ((y1 - mean) * lax.rsqrt(var + 1e-5)
              * p["gamma"].reshape(1, 1, 1, -1) + p["beta"].reshape(1, 1, 1, -1))
        y2 = _conv3x3_ref(y1, p["w2"], p["b2"])
        N, H, W, C = y2.shape
        ah = _bilinear_matrix(H, H * s)
        aw = _bilinear_matrix(W, W * s)
        up = jnp.einsum("Yh,nhwc,Xw->ncYX", ah, y2, aw,
                        precision=lax.Precision.HIGHEST)
        outs.append(up)
    outs.append(last_layer)
    return jnp.concatenate(outs, axis=1)


# ----------------------------------------------------------------------------
if __name__ == "__main__":
    key = jax.random.PRNGKey(0)
    keys = jax.random.split(key, 8)

    input_channels = [4, 8]
    output_channels = [8, 8]
    N = 2

    # xs spatial sizes chosen so 2^(L-i) upsampling lands on the last_layer
    # resolution (32x32), as required for channel concatenation.
    xs = [
        jax.random.normal(keys[0], (N, 4, 8, 8), jnp.float32),    # scale 4
        jax.random.normal(keys[1], (N, 8, 16, 16), jnp.float32),  # scale 2
    ]
    last_layer = jax.random.normal(keys[2], (N, 4, 32, 32), jnp.float32)

    # Deterministic synthetic parameters (shapes from the module's __init__).
    params = []
    for lvl, (cin, cout) in enumerate(zip(input_channels, output_channels)):
        cmid = cout * 2
        k = jax.random.split(keys[3 + lvl], 6)
        params.append(dict(
            w1=0.1 * jax.random.normal(k[0], (3, 3, cin, cmid), jnp.float32),
            b1=0.1 * jax.random.normal(k[1], (1, cmid), jnp.float32),
            gamma=1.0 + 0.1 * jax.random.normal(k[2], (1, cmid), jnp.float32),
            beta=0.1 * jax.random.normal(k[3], (1, cmid), jnp.float32),
            w2=0.1 * jax.random.normal(k[4], (3, 3, cmid, cout), jnp.float32),
            b2=0.1 * jax.random.normal(k[5], (1, cout), jnp.float32),
        ))

    out = jax.block_until_ready(fpn_forward(xs, last_layer, params))
    ref = jax.block_until_ready(fpn_reference(xs, last_layer, params))

    expected_shape = (N, sum(output_channels) + last_layer.shape[1], 32, 32)
    assert out.shape == expected_shape, (out.shape, expected_shape)
    if not jnp.allclose(out, ref, atol=2e-3, rtol=2e-3):
        raise AssertionError(
            f"mismatch vs reference, max abs err = {jnp.max(jnp.abs(out - ref))}")

    print("KERNEL_OK")
</pallas_src>

<mosaic_0001>
module attributes {stable_mosaic.version = 11 : i64} {
  func.func @_fpn_level_kernel(%arg0: memref<2x8x8x4xf32, #tpu.memory_space<vmem>>, %arg1: memref<36x16xf32, #tpu.memory_space<vmem>>, %arg2: memref<1x16xf32, #tpu.memory_space<vmem>>, %arg3: memref<1x16xf32, #tpu.memory_space<vmem>>, %arg4: memref<1x16xf32, #tpu.memory_space<vmem>>, %arg5: memref<144x8xf32, #tpu.memory_space<vmem>>, %arg6: memref<1x8xf32, #tpu.memory_space<vmem>>, %arg7: memref<128x2048xf32, #tpu.memory_space<vmem>>, %arg8: memref<8x2048xf32, #tpu.memory_space<vmem>>, %arg9: memref<2x8x8x36xf32, #tpu.memory_space<vmem>>, %arg10: memref<2x8x8x144xf32, #tpu.memory_space<vmem>>) attributes {dimension_semantics = [], scalar_prefetch = 0 : i64, scratch_operands = 2 : i64, tpu.core_type = #tpu.core_type<tc>} {
    %c0 = arith.constant 0 : index
    %c0_0 = arith.constant 0 : index
    %c0_1 = arith.constant 0 : index
    %c0_2 = arith.constant 0 : index
    %0 = vector.load %arg0[%c0, %c0_0, %c0_1, %c0_2] : memref<2x8x8x4xf32, #tpu.memory_space<vmem>>, vector<2x8x8x4xf32>
    %cst = arith.constant 0.000000e+00 : f32
    %1 = vector.broadcast %cst : f32 to vector<2x1x8x4xf32>
    %c0_3 = arith.constant 0 : index
    %c0_4 = arith.constant 0 : index
    %c0_5 = arith.constant 0 : index
    %c0_6 = arith.constant 0 : index
    %2 = vector.load %arg9[%c0_3, %c0_4, %c0_5, %c0_6] : memref<2x8x8x36xf32, #tpu.memory_space<vmem>>, vector<2x1x8x4xf32>
    tpu.vector_store %arg9[%c0_3, %c0_4, %c0_5, %c0_6], %1 {strides = array<i32>} : memref<2x8x8x36xf32, #tpu.memory_space<vmem>>, vector<2x1x8x4xf32>,
    %cst_7 = arith.constant 0.000000e+00 : f32
    %3 = vector.broadcast %cst_7 : f32 to vector<2x8x1x4xf32>
    %c0_8 = arith.constant 0 : index
    %c0_9 = arith.constant 0 : index
    %c0_10 = arith.constant 0 : index
    %c0_11 = arith.constant 0 : index
    %4 = vector.load %arg9[%c0_8, %c0_9, %c0_10, %c0_11] : memref<2x8x8x36xf32, #tpu.memory_space<vmem>>, vector<2x8x1x4xf32>
    tpu.vector_store %arg9[%c0_8, %c0_9, %c0_10, %c0_11], %3 {strides = array<i32>} : memref<2x8x8x36xf32, #tpu.memory_space<vmem>>, vector<2x8x1x4xf32>,
    %5 = vector.extract_strided_slice %0 {offsets = [0, 0, 0, 0], sizes = [2, 7, 7, 4], strides = [1, 1, 1, 1]} : vector<2x8x8x4xf32> to vector<2x7x7x4xf32>
    %c0_12 = arith.constant 0 : index
    %c1 = arith.constant 1 : index
    %c1_13 = arith.constant 1 : index
    %c0_14 = arith.constant 0 : index
    %6 = vector.load %arg9[%c0_12, %c1, %c1_13, %c0_14] : memref<2x8x8x36xf32, #tpu.memory_space<vmem>>, vector<2x7x7x4xf32>
    tpu.vector_store %arg9[%c0_12, %c1, %c1_13, %c0_14], %5 {strides = array<i32>} : memref<2x8x8x36xf32, #tpu.memory_space<vmem>>, vector<2x7x7x4xf32>,
    %cst_15 = arith.constant 0.000000e+00 : f32
    %7 = vector.broadcast %cst_15 : f32 to vector<2x1x8x4xf32>
    %c0_16 = arith.constant 0 : index
    %c0_17 = arith.constant 0 : index
    %c0_18 = arith.constant 0 : index
    %c4 = arith.constant 4 : index
    %8 = vector.load %arg9[%c0_16, %c0_17, %c0_18, %c4] : memref<2x8x8x36xf32, #tpu.memory_space<vmem>>, vector<2x1x8x4xf32>
    tpu.vector_store %arg9[%c0_16, %c0_17, %c0_18, %c4], %7 {strides = array<i32>} : memref<2x8x8x36xf32, #tpu.memory_space<vmem>>, vector<2x1x8x4xf32>,
    %9 = vector.extract_strided_slice %0 {offsets = [0, 0, 0, 0], sizes = [2, 7, 8, 4], strides = [1, 1, 1, 1]} : vector<2x8x8x4xf32> to vector<2x7x8x4xf32>
    %c0_19 = arith.constant 0 : index
    %c1_20 = arith.constant 1 : index
    %c0_21 = arith.constant 0 : index
    %c4_22 = arith.constant 4 : index
    %10 = vector.load %arg9[%c0_19, %c1_20, %c0_21, %c4_22] : memref<2x8x8x36xf32, #tpu.memory_space<vmem>>, vector<2x7x8x4xf32>
    tpu.vector_store %arg9[%c0_19, %c1_20, %c0_21, %c4_22], %9 {strides = array<i32>} : memref<2x8x8x36xf32, #tpu.memory_space<vmem>>, vector<2x7x8x4xf32>,
    %cst_23 = arith.constant 0.000000e+00 : f32
    %11 = vector.broadcast %cst_23 : f32 to vector<2x1x8x4xf32>
    %c0_24 = arith.constant 0 : index
    %c0_25 = arith.constant 0 : index
    %c0_26 = arith.constant 0 : index
    %c8 = arith.constant 8 : index
    %12 = vector.load %arg9[%c0_24, %c0_25, %c0_26, %c8] : memref<2x8x8x36xf32, #tpu.memory_space<vmem>>, vector<2x1x8x4xf32>
    tpu.vector_store %arg9[%c0_24, %c0_25, %c0_26, %c8], %11 {strides = array<i32>} : memref<2x8x8x36xf32, #tpu.memory_space<vmem>>, vector<2x1x8x4xf32>,
    %cst_27 = arith.constant 0.000000e+00 : f32
    %13 = vector.broadcast %cst_27 : f32 to vector<2x8x1x4xf32>
    %c0_28 = arith.constant 0 : index
    %c0_29 = arith.constant 0 : index
    %c7 = arith.constant 7 : index
    %c8_30 = arith.constant 8 : index
    %14 = vector.load %arg9[%c0_28, %c0_29, %c7, %c8_30] : memref<2x8x8x36xf32, #tpu.memory_space<vmem>>, vector<2x8x1x4xf32>
    tpu.vector_store %arg9[%c0_28, %c0_29, %c7, %c8_30], %13 {strides = array<i32>} : memref<2x8x8x36xf32, #tpu.memory_space<vmem>>, vector<2x8x1x4xf32>,
    %15 = vector.extract_strided_slice %0 {offsets = [0, 0, 1, 0], sizes = [2, 7, 7, 4], strides = [1, 1, 1, 1]} : vector<2x8x8x4xf32> to vector<2x7x7x4xf32>
    %c0_31 = arith.constant 0 : index
    %c1_32 = arith.constant 1 : index
    %c0_33 = arith.constant 0 : index
    %c8_34 = arith.constant 8 : index
    %16 = vector.load %arg9[%c0_31, %c1_32, %c0_33, %c8_34] : memref<2x8x8x36xf32, #tpu.memory_space<vmem>>, vector<2x7x7x4xf32>
    tpu.vector_store %arg9[%c0_31, %c1_32, %c0_33, %c8_34], %15 {strides = array<i32>} : memref<2x8x8x36xf32, #tpu.memory_space<vmem>>, vector<2x7x7x4xf32>,
    %cst_35 = arith.constant 0.000000e+00 : f32
    %17 = vector.broadcast %cst_35 : f32 to vector<2x8x1x4xf32>
    %c0_36 = arith.constant 0 : index
    %c0_37 = arith.constant 0 : index
    %c0_38 = arith.constant 0 : index
    %c12 = arith.constant 12 : index
    %18 = vector.load %arg9[%c0_36, %c0_37, %c0_38, %c12] : memref<2x8x8x36xf32, #tpu.memory_space<vmem>>, vector<2x8x1x4xf32>
    tpu.vector_store %arg9[%c0_36, %c0_37, %c0_38, %c12], %17 {strides = array<i32>} : memref<2x8x8x36xf32, #tpu.memory_space<vmem>>, vector<2x8x1x4xf32>,
    %19 = vector.extract_strided_slice %0 {offsets = [0, 0, 0, 0], sizes = [2, 8, 7, 4], strides = [1, 1, 1, 1]} : vector<2x8x8x4xf32> to vector<2x8x7x4xf32>
    %c0_39 = arith.constant 0 : index
    %c0_40 = arith.constant 0 : index
    %c1_41 = arith.constant 1 : index
    %c12_42 = arith.constant 12 : index
    %20 = vector.load %arg9[%c0_39, %c0_40, %c1_41, %c12_42] : memref<2x8x8x36xf32, #tpu.memory_space<vmem>>, vector<2x8x7x4xf32>
    tpu.vector_store %arg9[%c0_39, %c0_40, %c1_41, %c12_42], %19 {strides = array<i32>} : memref<2x8x8x36xf32, #tpu.memory_space<vmem>>, vector<2x8x7x4xf32>,
    %c0_43 = arith.constant 0 : index
    %c0_44 = arith.constant 0 : index
    %c0_45 = arith.constant 0 : index
    %c16 = arith.constant 16 : index
    %21 = vector.load %arg9[%c0_43, %c0_44, %c0_45, %c16] : memref<2x8x8x36xf32, #tpu.memory_space<vmem>>, vector<2x8x8x4xf32>
    tpu.vector_store %arg9[%c0_43, %c0_44, %c0_45, %c16], %0 {strides = array<i32>} : memref<2x8x8x36xf32, #tpu.memory_space<vmem>>, vector<2x8x8x4xf32>,
    %cst_46 = arith.constant 0.000000e+00 : f32
    %22 = vector.broadcast %cst_46 : f32 to vector<2x8x1x4xf32>
    %c0_47 = arith.constant 0 : index
    %c0_48 = arith.constant 0 : index
    %c7_49 = arith.constant 7 : index
    %c20 = arith.constant 20 : index
    %23 = vector.load %arg9[%c0_47, %c0_48, %c7_49, %c20] : memref<2x8x8x36xf32, #tpu.memory_space<vmem>>, vector<2x8x1x4xf32>
    tpu.vector_store %arg9[%c0_47, %c0_48, %c7_49, %c20], %22 {strides = array<i32>} : memref<2x8x8x36xf32, #tpu.memory_space<vmem>>, vector<2x8x1x4xf32>,
    %24 = vector.extract_strided_slice %0 {offsets = [0, 0, 1, 0], sizes = [2, 8, 7, 4], strides = [1, 1, 1, 1]} : vector<2x8x8x4xf32> to vector<2x8x7x4xf32>
    %c0_50 = arith.constant 0 : index
    %c0_51 = arith.constant 0 : index
    %c0_52 = arith.constant 0 : index
    %c20_53 = arith.constant 20 : index
    %25 = vector.load %arg9[%c0_50, %c0_51, %c0_52, %c20_53] : memref<2x8x8x36xf32, #tpu.memory_space<vmem>>, vector<2x8x7x4xf32>
    tpu.vector_store %arg9[%c0_50, %c0_51, %c0_52, %c20_53], %24 {strides = array<i32>} : memref<2x8x8x36xf32, #tpu.memory_space<vmem>>, vector<2x8x7x4xf32>,
    %cst_54 = arith.constant 0.000000e+00 : f32
    %26 = vector.broadcast %cst_54 : f32 to vector<2x1x8x4xf32>
    %c0_55 = arith.constant 0 : index
    %c7_56 = arith.constant 7 : index
    %c0_57 = arith.constant 0 : index
    %c24 = arith.constant 24 : index
    %27 = vector.load %arg9[%c0_55, %c7_56, %c0_57, %c24] : memref<2x8x8x36xf32, #tpu.memory_space<vmem>>, vector<2x1x8x4xf32>
    tpu.vector_store %arg9[%c0_55, %c7_56, %c0_57, %c24], %26 {strides = array<i32>} : memref<2x8x8x36xf32, #tpu.memory_space<vmem>>, vector<2x1x8x4xf32>,
    %cst_58 = arith.constant 0.000000e+00 : f32
    %28 = vector.broadcast %cst_58 : f32 to vector<2x8x1x4xf32>
    %c0_59 = arith.constant 0 : index
    %c0_60 = arith.constant 0 : index
    %c0_61 = arith.constant 0 : index
    %c24_62 = arith.constant 24 : index
    %29 = vector.load %arg9[%c0_59, %c0_60, %c0_61, %c24_62] : memref<2x8x8x36xf32, #tpu.memory_space<vmem>>, vector<2x8x1x4xf32>
    tpu.vector_store %arg9[%c0_59, %c0_60, %c0_61, %c24_62], %28 {strides = array<i32>} : memref<2x8x8x36xf32, #tpu.memory_space<vmem>>, vector<2x8x1x4xf32>,
    %30 = vector.extract_strided_slice %0 {offsets = [0, 1, 0, 0], sizes = [2, 7, 7, 4], strides = [1, 1, 1, 1]} : vector<2x8x8x4xf32> to vector<2x7x7x4xf32>
    %c0_63 = arith.constant 0 : index
    %c0_64 = arith.constant 0 : index
    %c1_65 = arith.constant 1 : index
    %c24_66 = arith.constant 24 : index
    %31 = vector.load %arg9[%c0_63, %c0_64, %c1_65, %c24_66] : memref<2x8x8x36xf32, #tpu.memory_space<vmem>>, vector<2x7x7x4xf32>
    tpu.vector_store %arg9[%c0_63, %c0_64, %c1_65, %c24_66], %30 {strides = array<i32>} : memref<2x8x8x36xf32, #tpu.memory_space<vmem>>, vector<2x7x7x4xf32>,
    %cst_67 = arith.constant 0.000000e+00 : f32
    %32 = vector.broadcast %cst_67 : f32 to vector<2x1x8x4xf32>
    %c0_68 = arith.constant 0 : index
    %c7_69 = arith.constant 7 : index
    %c0_70 = arith.constant 0 : index
    %c28 = arith.constant 28 : index
    %33 = vector.load %arg9[%c0_68, %c7_69, %c0_70, %c28] : memref<2x8x8x36xf32, #tpu.memory_space<vmem>>, vector<2x1x8x4xf32>
    tpu.vector_store %arg9[%c0_68, %c7_69, %c0_70, %c28], %32 {strides = array<i32>} : memref<2x8x8x36xf32, #tpu.memory_space<vmem>>, vector<2x1x8x4xf32>,
    %34 = vector.extract_strided_slice %0 {offsets = [0, 1, 0, 0], sizes = [2, 7, 8, 4], strides = [1, 1, 1, 1]} : vector<2x8x8x4xf32> to vector<2x7x8x4xf32>
    %c0_71 = arith.constant 0 : index
    %c0_72 = arith.constant 0 : index
    %c0_73 = arith.constant 0 : index
    %c28_74 = arith.constant 28 : index
    %35 = vector.load %arg9[%c0_71, %c0_72, %c0_73, %c28_74] : memref<2x8x8x36xf32, #tpu.memory_space<vmem>>, vector<2x7x8x4xf32>
    tpu.vector_store %arg9[%c0_71, %c0_72, %c0_73, %c28_74], %34 {strides = array<i32>} : memref<2x8x8x36xf32, #tpu.memory_space<vmem>>, vector<2x7x8x4xf32>,
    %cst_75 = arith.constant 0.000000e+00 : f32
    %36 = vector.broadcast %cst_75 : f32 to vector<2x1x8x4xf32>
    %c0_76 = arith.constant 0 : index
    %c7_77 = arith.constant 7 : index
    %c0_78 = arith.constant 0 : index
    %c32 = arith.constant 32 : index
    %37 = vector.load %arg9[%c0_76, %c7_77, %c0_78, %c32] : memref<2x8x8x36xf32, #tpu.memory_space<vmem>>, vector<2x1x8x4xf32>
    tpu.vector_store %arg9[%c0_76, %c7_77, %c0_78, %c32], %36 {strides = array<i32>} : memref<2x8x8x36xf32, #tpu.memory_space<vmem>>, vector<2x1x8x4xf32>,
    %cst_79 = arith.constant 0.000000e+00 : f32
    %38 = vector.broadcast %cst_79 : f32 to vector<2x8x1x4xf32>
    %c0_80 = arith.constant 0 : index
    %c0_81 = arith.constant 0 : index
    %c7_82 = arith.constant 7 : index
    %c32_83 = arith.constant 32 : index
    %39 = vector.load %arg9[%c0_80, %c0_81, %c7_82, %c32_83] : memref<2x8x8x36xf32, #tpu.memory_space<vmem>>, vector<2x8x1x4xf32>
    tpu.vector_store %arg9[%c0_80, %c0_81, %c7_82, %c32_83], %38 {strides = array<i32>} : memref<2x8x8x36xf32, #tpu.memory_space<vmem>>, vector<2x8x1x4xf32>,
    %40 = vector.extract_strided_slice %0 {offsets = [0, 1, 1, 0], sizes = [2, 7, 7, 4], strides = [1, 1, 1, 1]} : vector<2x8x8x4xf32> to vector<2x7x7x4xf32>
    %c0_84 = arith.constant 0 : index
    %c0_85 = arith.constant 0 : index
    %c0_86 = arith.constant 0 : index
    %c32_87 = arith.constant 32 : index
    %41 = vector.load %arg9[%c0_84, %c0_85, %c0_86, %c32_87] : memref<2x8x8x36xf32, #tpu.memory_space<vmem>>, vector<2x7x7x4xf32>
    tpu.vector_store %arg9[%c0_84, %c0_85, %c0_86, %c32_87], %40 {strides = array<i32>} : memref<2x8x8x36xf32, #tpu.memory_space<vmem>>, vector<2x7x7x4xf32>,
    %c0_88 = arith.constant 0 : index
    %c0_89 = arith.constant 0 : index
    %c0_90 = arith.constant 0 : index
    %c0_91 = arith.constant 0 : index
    %42 = vector.load %arg9[%c0_88, %c0_89, %c0_90, %c0_91] : memref<2x8x8x36xf32, #tpu.memory_space<vmem>>, vector<2x8x8x36xf32>
    %43 = vector.shape_cast %42 : vector<2x8x8x36xf32> to vector<128x36xf32>
    %c0_92 = arith.constant 0 : index
    %c0_93 = arith.constant 0 : index
    %44 = vector.load %arg1[%c0_92, %c0_93] : memref<36x16xf32, #tpu.memory_space<vmem>>, vector<36x16xf32>
    %cst_94 = arith.constant dense<0.000000e+00> : vector<128x16xf32>
    %45 = tpu.matmul %43, %44, %cst_94 {dimension_numbers = #tpu.dot_dimension_numbers<[1], [0], [0], [1], [0, 0, 1, 1], [], []>} : vector<128x36xf32>, vector<36x16xf32>, vector<128x16xf32> -> vector<128x16xf32>
    %c0_95 = arith.constant 0 : index
    %c0_96 = arith.constant 0 : index
    %46 = vector.load %arg2[%c0_95, %c0_96] : memref<1x16xf32, #tpu.memory_space<vmem>>, vector<1x16xf32>
    %47 = vector.broadcast %46 : vector<1x16xf32> to vector<128x16xf32>
    %48 = arith.addf %45, %47 : vector<128x16xf32>
    %cst_97 = arith.constant 0.000000e+00 : f32
    %49 = vector.broadcast %cst_97 : f32 to vector<128x16xf32>
    %50 = arith.maximumf %48, %49 : vector<128x16xf32>
    %cst_98 = arith.constant dense<0.000000e+00> : vector<16xf32>
    %51 = vector.multi_reduction <add>, %50, %cst_98 [0] : vector<128x16xf32> to vector<16xf32>
    %52 = vector.shape_cast %51 : vector<16xf32> to vector<1x16xf32>
    %cst_99 = arith.constant 1.280000e+02 : f32
    %53 = vector.broadcast %cst_99 : f32 to vector<1x16xf32>
    %54 = arith.divf %52, %53 : vector<1x16xf32>
    %55 = vector.broadcast %54 : vector<1x16xf32> to vector<128x16xf32>
    %56 = arith.subf %50, %55 : vector<128x16xf32>
    %57 = arith.mulf %56, %56 : vector<128x16xf32>
    %cst_100 = arith.constant dense<0.000000e+00> : vector<16xf32>
    %58 = vector.multi_reduction <add>, %57, %cst_100 [0] : vector<128x16xf32> to vector<16xf32>
    %59 = vector.shape_cast %58 : vector<16xf32> to vector<1x16xf32>
    %cst_101 = arith.constant 1.280000e+02 : f32
    %60 = vector.broadcast %cst_101 : f32 to vector<1x16xf32>
    %61 = arith.divf %59, %60 : vector<1x16xf32>
    %62 = vector.broadcast %54 : vector<1x16xf32> to vector<128x16xf32>
    %63 = arith.subf %50, %62 : vector<128x16xf32>
    %cst_102 = arith.constant 9.99999974E-6 : f32
    %64 = vector.broadcast %cst_102 : f32 to vector<1x16xf32>
    %65 = arith.addf %61, %64 : vector<1x16xf32>
    %66 = math.rsqrt %65 : vector<1x16xf32>
    %67 = vector.broadcast %66 : vector<1x16xf32> to vector<128x16xf32>
    %68 = arith.mulf %63, %67 : vector<128x16xf32>
    %c0_103 = arith.constant 0 : index
    %c0_104 = arith.constant 0 : index
    %69 = vector.load %arg3[%c0_103, %c0_104] : memref<1x16xf32, #tpu.memory_space<vmem>>, vector<1x16xf32>
    %70 = vector.broadcast %69 : vector<1x16xf32> to vector<128x16xf32>
    %71 = arith.mulf %68, %70 : vector<128x16xf32>
    %c0_105 = arith.constant 0 : index
    %c0_106 = arith.constant 0 : index
    %72 = vector.load %arg4[%c0_105, %c0_106] : memref<1x16xf32, #tpu.memory_space<vmem>>, vector<1x16xf32>
    %73 = vector.broadcast %72 : vector<1x16xf32> to vector<128x16xf32>
    %74 = arith.addf %71, %73 : vector<128x16xf32>
    %75 = vector.shape_cast %74 : vector<128x16xf32> to vector<2x8x8x16xf32>
    %cst_107 = arith.constant 0.000000e+00 : f32
    %76 = vector.broadcast %cst_107 : f32 to vector<2x1x8x16xf32>
    %c0_108 = arith.constant 0 : index
    %c0_109 = arith.constant 0 : index
    %c0_110 = arith.constant 0 : index
    %c0_111 = arith.constant 0 : index
    %77 = vector.load %arg10[%c0_108, %c0_109, %c0_110, %c0_111] : memref<2x8x8x144xf32, #tpu.memory_space<vmem>>, vector<2x1x8x16xf32>
    tpu.vector_store %arg10[%c0_108, %c0_109, %c0_110, %c0_111], %76 {strides = array<i32>} : memref<2x8x8x144xf32, #tpu.memory_space<vmem>>, vector<2x1x8x16xf32>,
    %cst_112 = arith.constant 0.000000e+00 : f32
    %78 = vector.broadcast %cst_112 : f32 to vector<2x8x1x16xf32>
    %c0_113 = arith.constant 0 : index
    %c0_114 = arith.constant 0 : index
    %c0_115 = arith.constant 0 : index
    %c0_116 = arith.constant 0 : index
    %79 = vector.load %arg10[%c0_113, %c0_114, %c0_115, %c0_116] : memref<2x8x8x144xf32, #tpu.memory_space<vmem>>, vector<2x8x1x16xf32>
    tpu.vector_store %arg10[%c0_113, %c0_114, %c0_115, %c0_116], %78 {strides = array<i32>} : memref<2x8x8x144xf32, #tpu.memory_space<vmem>>, vector<2x8x1x16xf32>,
    %80 = vector.extract_strided_slice %75 {offsets = [0, 0, 0, 0], sizes = [2, 7, 7, 16], strides = [1, 1, 1, 1]} : vector<2x8x8x16xf32> to vector<2x7x7x16xf32>
    %c0_117 = arith.constant 0 : index
    %c1_118 = arith.constant 1 : index
    %c1_119 = arith.constant 1 : index
    %c0_120 = arith.constant 0 : index
    %81 = vector.load %arg10[%c0_117, %c1_118, %c1_119, %c0_120] : memref<2x8x8x144xf32, #tpu.memory_space<vmem>>, vector<2x7x7x16xf32>
    tpu.vector_store %arg10[%c0_117, %c1_118, %c1_119, %c0_120], %80 {strides = array<i32>} : memref<2x8x8x144xf32, #tpu.memory_space<vmem>>, vector<2x7x7x16xf32>,
    %cst_121 = arith.constant 0.000000e+00 : f32
    %82 = vector.broadcast %cst_121 : f32 to vector<2x1x8x16xf32>
    %c0_122 = arith.constant 0 : index
    %c0_123 = arith.constant 0 : index
    %c0_124 = arith.constant 0 : index
    %c16_125 = arith.constant 16 : index
    %83 = vector.load %arg10[%c0_122, %c0_123, %c0_124, %c16_125] : memref<2x8x8x144xf32, #tpu.memory_space<vmem>>, vector<2x1x8x16xf32>
    tpu.vector_store %arg10[%c0_122, %c0_123, %c0_124, %c16_125], %82 {strides = array<i32>} : memref<2x8x8x144xf32, #tpu.memory_space<vmem>>, vector<2x1x8x16xf32>,
    %84 = vector.extract_strided_slice %75 {offsets = [0, 0, 0, 0], sizes = [2, 7, 8, 16], strides = [1, 1, 1, 1]} : vector<2x8x8x16xf32> to vector<2x7x8x16xf32>
    %c0_126 = arith.constant 0 : index
    %c1_127 = arith.constant 1 : index
    %c0_128 = arith.constant 0 : index
    %c16_129 = arith.constant 16 : index
    %85 = vector.load %arg10[%c0_126, %c1_127, %c0_128, %c16_129] : memref<2x8x8x144xf32, #tpu.memory_space<vmem>>, vector<2x7x8x16xf32>
    tpu.vector_store %arg10[%c0_126, %c1_127, %c0_128, %c16_129], %84 {strides = array<i32>} : memref<2x8x8x144xf32, #tpu.memory_space<vmem>>, vector<2x7x8x16xf32>,
    %cst_130 = arith.constant 0.000000e+00 : f32
    %86 = vector.broadcast %cst_130 : f32 to vector<2x1x8x16xf32>
    %c0_131 = arith.constant 0 : index
    %c0_132 = arith.constant 0 : index
    %c0_133 = arith.constant 0 : index
    %c32_134 = arith.constant 32 : index
    %87 = vector.load %arg10[%c0_131, %c0_132, %c0_133, %c32_134] : memref<2x8x8x144xf32, #tpu.memory_space<vmem>>, vector<2x1x8x16xf32>
    tpu.vector_store %arg10[%c0_131, %c0_132, %c0_133, %c32_134], %86 {strides = array<i32>} : memref<2x8x8x144xf32, #tpu.memory_space<vmem>>, vector<2x1x8x16xf32>,
    %cst_135 = arith.constant 0.000000e+00 : f32
    %88 = vector.broadcast %cst_135 : f32 to vector<2x8x1x16xf32>
    %c0_136 = arith.constant 0 : index
    %c0_137 = arith.constant 0 : index
    %c7_138 = arith.constant 7 : index
    %c32_139 = arith.constant 32 : index
    %89 = vector.load %arg10[%c0_136, %c0_137, %c7_138, %c32_139] : memref<2x8x8x144xf32, #tpu.memory_space<vmem>>, vector<2x8x1x16xf32>
    tpu.vector_store %arg10[%c0_136, %c0_137, %c7_138, %c32_139], %88 {strides = array<i32>} : memref<2x8x8x144xf32, #tpu.memory_space<vmem>>, vector<2x8x1x16xf32>,
    %90 = vector.extract_strided_slice %75 {offsets = [0, 0, 1, 0], sizes = [2, 7, 7, 16], strides = [1, 1, 1, 1]} : vector<2x8x8x16xf32> to vector<2x7x7x16xf32>
    %c0_140 = arith.constant 0 : index
    %c1_141 = arith.constant 1 : index
    %c0_142 = arith.constant 0 : index
    %c32_143 = arith.constant 32 : index
    %91 = vector.load %arg10[%c0_140, %c1_141, %c0_142, %c32_143] : memref<2x8x8x144xf32, #tpu.memory_space<vmem>>, vector<2x7x7x16xf32>
    tpu.vector_store %arg10[%c0_140, %c1_141, %c0_142, %c32_143], %90 {strides = array<i32>} : memref<2x8x8x144xf32, #tpu.memory_space<vmem>>, vector<2x7x7x16xf32>,
    %cst_144 = arith.constant 0.000000e+00 : f32
    %92 = vector.broadcast %cst_144 : f32 to vector<2x8x1x16xf32>
    %c0_145 = arith.constant 0 : index
    %c0_146 = arith.constant 0 : index
    %c0_147 = arith.constant 0 : index
    %c48 = arith.constant 48 : index
    %93 = vector.load %arg10[%c0_145, %c0_146, %c0_147, %c48] : memref<2x8x8x144xf32, #tpu.memory_space<vmem>>, vector<2x8x1x16xf32>
    tpu.vector_store %arg10[%c0_145, %c0_146, %c0_147, %c48], %92 {strides = array<i32>} : memref<2x8x8x144xf32, #tpu.memory_space<vmem>>, vector<2x8x1x16xf32>,
    %94 = vector.extract_strided_slice %75 {offsets = [0, 0, 0, 0], sizes = [2, 8, 7, 16], strides = [1, 1, 1, 1]} : vector<2x8x8x16xf32> to vector<2x8x7x16xf32>
    %c0_148 = arith.constant 0 : index
    %c0_149 = arith.constant 0 : index
    %c1_150 = arith.constant 1 : index
    %c48_151 = arith.constant 48 : index
    %95 = vector.load %arg10[%c0_148, %c0_149, %c1_150, %c48_151] : memref<2x8x8x144xf32, #tpu.memory_space<vmem>>, vector<2x8x7x16xf32>
    tpu.vector_store %arg10[%c0_148, %c0_149, %c1_150, %c48_151], %94 {strides = array<i32>} : memref<2x8x8x144xf32, #tpu.memory_space<vmem>>, vector<2x8x7x16xf32>,
    %c0_152 = arith.constant 0 : index
    %c0_153 = arith.constant 0 : index
    %c0_154 = arith.constant 0 : index
    %c64 = arith.constant 64 : index
    %96 = vector.load %arg10[%c0_152, %c0_153, %c0_154, %c64] : memref<2x8x8x144xf32, #tpu.memory_space<vmem>>, vector<2x8x8x16xf32>
    tpu.vector_store %arg10[%c0_152, %c0_153, %c0_154, %c64], %75 {strides = array<i32>} : memref<2x8x8x144xf32, #tpu.memory_space<vmem>>, vector<2x8x8x16xf32>,
    %cst_155 = arith.constant 0.000000e+00 : f32
    %97 = vector.broadcast %cst_155 : f32 to vector<2x8x1x16xf32>
    %c0_156 = arith.constant 0 : index
    %c0_157 = arith.constant 0 : index
    %c7_158 = arith.constant 7 : index
    %c80 = arith.constant 80 : index
    %98 = vector.load %arg10[%c0_156, %c0_157, %c7_158, %c80] : memref<2x8x8x144xf32, #tpu.memory_space<vmem>>, vector<2x8x1x16xf32>
    tpu.vector_store %arg10[%c0_156, %c0_157, %c7_158, %c80], %97 {strides = array<i32>} : memref<2x8x8x144xf32, #tpu.memory_space<vmem>>, vector<2x8x1x16xf32>,
    %99 = vector.extract_strided_slice %75 {offsets = [0, 0, 1, 0], sizes = [2, 8, 7, 16], strides = [1, 1, 1, 1]} : vector<2x8x8x16xf32> to vector<2x8x7x16xf32>
    %c0_159 = arith.constant 0 : index
    %c0_160 = arith.constant 0 : index
    %c0_161 = arith.constant 0 : index
    %c80_162 = arith.constant 80 : index
    %100 = vector.load %arg10[%c0_159, %c0_160, %c0_161, %c80_162] : memref<2x8x8x144xf32, #tpu.memory_space<vmem>>, vector<2x8x7x16xf32>
    tpu.vector_store %arg10[%c0_159, %c0_160, %c0_161, %c80_162], %99 {strides = array<i32>} : memref<2x8x8x144xf32, #tpu.memory_space<vmem>>, vector<2x8x7x16xf32>,
    %cst_163 = arith.constant 0.000000e+00 : f32
    %101 = vector.broadcast %cst_163 : f32 to vector<2x1x8x16xf32>
    %c0_164 = arith.constant 0 : index
    %c7_165 = arith.constant 7 : index
    %c0_166 = arith.constant 0 : index
    %c96 = arith.constant 96 : index
    %102 = vector.load %arg10[%c0_164, %c7_165, %c0_166, %c96] : memref<2x8x8x144xf32, #tpu.memory_space<vmem>>, vector<2x1x8x16xf32>
    tpu.vector_store %arg10[%c0_164, %c7_165, %c0_166, %c96], %101 {strides = array<i32>} : memref<2x8x8x144xf32, #tpu.memory_space<vmem>>, vector<2x1x8x16xf32>,
    %cst_167 = arith.constant 0.000000e+00 : f32
    %103 = vector.broadcast %cst_167 : f32 to vector<2x8x1x16xf32>
    %c0_168 = arith.constant 0 : index
    %c0_169 = arith.constant 0 : index
    %c0_170 = arith.constant 0 : index
    %c96_171 = arith.constant 96 : index
    %104 = vector.load %arg10[%c0_168, %c0_169, %c0_170, %c96_171] : memref<2x8x8x144xf32, #tpu.memory_space<vmem>>, vector<2x8x1x16xf32>
    tpu.vector_store %arg10[%c0_168, %c0_169, %c0_170, %c96_171], %103 {strides = array<i32>} : memref<2x8x8x144xf32, #tpu.memory_space<vmem>>, vector<2x8x1x16xf32>,
    %105 = vector.extract_strided_slice %75 {offsets = [0, 1, 0, 0], sizes = [2, 7, 7, 16], strides = [1, 1, 1, 1]} : vector<2x8x8x16xf32> to vector<2x7x7x16xf32>
    %c0_172 = arith.constant 0 : index
    %c0_173 = arith.constant 0 : index
    %c1_174 = arith.constant 1 : index
    %c96_175 = arith.constant 96 : index
    %106 = vector.load %arg10[%c0_172, %c0_173, %c1_174, %c96_175] : memref<2x8x8x144xf32, #tpu.memory_space<vmem>>, vector<2x7x7x16xf32>
    tpu.vector_store %arg10[%c0_172, %c0_173, %c1_174, %c96_175], %105 {strides = array<i32>} : memref<2x8x8x144xf32, #tpu.memory_space<vmem>>, vector<2x7x7x16xf32>,
    %cst_176 = arith.constant 0.000000e+00 : f32
    %107 = vector.broadcast %cst_176 : f32 to vector<2x1x8x16xf32>
    %c0_177 = arith.constant 0 : index
    %c7_178 = arith.constant 7 : index
    %c0_179 = arith.constant 0 : index
    %c112 = arith.constant 112 : index
    %108 = vector.load %arg10[%c0_177, %c7_178, %c0_179, %c112] : memref<2x8x8x144xf32, #tpu.memory_space<vmem>>, vector<2x1x8x16xf32>
    tpu.vector_store %arg10[%c0_177, %c7_178, %c0_179, %c112], %107 {strides = array<i32>} : memref<2x8x8x144xf32, #tpu.memory_space<vmem>>, vector<2x1x8x16xf32>,
    %109 = vector.extract_strided_slice %75 {offsets = [0, 1, 0, 0], sizes = [2, 7, 8, 16], strides = [1, 1, 1, 1]} : vector<2x8x8x16xf32> to vector<2x7x8x16xf32>
    %c0_180 = arith.constant 0 : index
    %c0_181 = arith.constant 0 : index
    %c0_182 = arith.constant 0 : index
    %c112_183 = arith.constant 112 : index
    %110 = vector.load %arg10[%c0_180, %c0_181, %c0_182, %c112_183] : memref<2x8x8x144xf32, #tpu.memory_space<vmem>>, vector<2x7x8x16xf32>
    tpu.vector_store %arg10[%c0_180, %c0_181, %c0_182, %c112_183], %109 {strides = array<i32>} : memref<2x8x8x144xf32, #tpu.memory_space<vmem>>, vector<2x7x8x16xf32>,
    %cst_184 = arith.constant 0.000000e+00 : f32
    %111 = vector.broadcast %cst_184 : f32 to vector<2x1x8x16xf32>
    %c0_185 = arith.constant 0 : index
    %c7_186 = arith.constant 7 : index
    %c0_187 = arith.constant 0 : index
    %c128 = arith.constant 128 : index
    %112 = vector.load %arg10[%c0_185, %c7_186, %c0_187, %c128] : memref<2x8x8x144xf32, #tpu.memory_space<vmem>>, vector<2x1x8x16xf32>
    tpu.vector_store %arg10[%c0_185, %c7_186, %c0_187, %c128], %111 {strides = array<i32>} : memref<2x8x8x144xf32, #tpu.memory_space<vmem>>, vector<2x1x8x16xf32>,
    %cst_188 = arith.constant 0.000000e+00 : f32
    %113 = vector.broadcast %cst_188 : f32 to vector<2x8x1x16xf32>
    %c0_189 = arith.constant 0 : index
    %c0_190 = arith.constant 0 : index
    %c7_191 = arith.constant 7 : index
    %c128_192 = arith.constant 128 : index
    %114 = vector.load %arg10[%c0_189, %c0_190, %c7_191, %c128_192] : memref<2x8x8x144xf32, #tpu.memory_space<vmem>>, vector<2x8x1x16xf32>
    tpu.vector_store %arg10[%c0_189, %c0_190, %c7_191, %c128_192], %113 {strides = array<i32>} : memref<2x8x8x144xf32, #tpu.memory_space<vmem>>, vector<2x8x1x16xf32>,
    %115 = vector.extract_strided_slice %75 {offsets = [0, 1, 1, 0], sizes = [2, 7, 7, 16], strides = [1, 1, 1, 1]} : vector<2x8x8x16xf32> to vector<2x7x7x16xf32>
    %c0_193 = arith.constant 0 : index
    %c0_194 = arith.constant 0 : index
    %c0_195 = arith.constant 0 : index
    %c128_196 = arith.constant 128 : index
    %116 = vector.load %arg10[%c0_193, %c0_194, %c0_195, %c128_196] : memref<2x8x8x144xf32, #tpu.memory_space<vmem>>, vector<2x7x7x16xf32>
    tpu.vector_store %arg10[%c0_193, %c0_194, %c0_195, %c128_196], %115 {strides = array<i32>} : memref<2x8x8x144xf32, #tpu.memory_space<vmem>>, vector<2x7x7x16xf32>,
    %c0_197 = arith.constant 0 : index
    %c0_198 = arith.constant 0 : index
    %c0_199 = arith.constant 0 : index
    %c0_200 = arith.constant 0 : index
    %117 = vector.load %arg10[%c0_197, %c0_198, %c0_199, %c0_200] : memref<2x8x8x144xf32, #tpu.memory_space<vmem>>, vector<2x8x8x144xf32>
    %118 = vector.shape_cast %117 : vector<2x8x8x144xf32> to vector<128x144xf32>
    %c0_201 = arith.constant 0 : index
    %c0_202 = arith.constant 0 : index
    %119 = vector.load %arg5[%c0_201, %c0_202] : memref<144x8xf32, #tpu.memory_space<vmem>>, vector<144x8xf32>
    %cst_203 = arith.constant dense<0.000000e+00> : vector<128x8xf32>
    %120 = tpu.matmul %118, %119, %cst_203 {dimension_numbers = #tpu.dot_dimension_numbers<[1], [0], [0], [1], [0, 0, 1, 1], [], []>} : vector<128x144xf32>, vector<144x8xf32>, vector<128x8xf32> -> vector<128x8xf32>
    %c0_204 = arith.constant 0 : index
    %c0_205 = arith.constant 0 : index
    %121 = vector.load %arg6[%c0_204, %c0_205] : memref<1x8xf32, #tpu.memory_space<vmem>>, vector<1x8xf32>
    %122 = vector.broadcast %121 : vector<1x8xf32> to vector<128x8xf32>
    %123 = arith.addf %120, %122 : vector<128x8xf32>
    %124 = tpu.transpose %123, [1, 0] : vector<128x8xf32> -> vector<8x128xf32>
    %c0_206 = arith.constant 0 : index
    %c0_207 = arith.constant 0 : index
    %125 = vector.load %arg7[%c0_206, %c0_207] : memref<128x2048xf32, #tpu.memory_space<vmem>>, vector<128x2048xf32>
    %cst_208 = arith.constant dense<0.000000e+00> : vector<8x2048xf32>
    %126 = tpu.matmul %124, %125, %cst_208 {dimension_numbers = #tpu.dot_dimension_numbers<[1], [0], [0], [1], [0, 0, 1, 1], [], []>} : vector<8x128xf32>, vector<128x2048xf32>, vector<8x2048xf32> -> vector<8x2048xf32>
    %c0_209 = arith.constant 0 : index
    %c0_210 = arith.constant 0 : index
    %127 = vector.load %arg8[%c0_209, %c0_210] : memref<8x2048xf32, #tpu.memory_space<vmem>>, vector<8x2048xf32>
    tpu.vector_store %arg8[%c0_209, %c0_210], %126 {strides = array<i32>} : memref<8x2048xf32, #tpu.memory_space<vmem>>, vector<8x2048xf32>,
    return
  }
}

</mosaic_0001>

<bundles_post_ra>
// kernel: tpu_custom_call.1
= control target key start
LH: loop header
LB: loop body
LE: loop exit
PB: predicated region body
PF: predicated region fallthrough
CT: control target
= control target key end

     0   :  { %13 = vsyncpa [#allocation5], 0  ;;  %s4769_s0 = inlined_call_operand.vmem [shape: f32[2,8,8,4], index: 0, kind: input, shape index: {}]   ;;  %s4770_s1 = inlined_call_operand.vmem [shape: f32[36,16], index: 1, kind: input, shape index: {}]   ;;  %s4771_s2 = inlined_call_operand.vmem [shape: f32[1,16], index: 2, kind: input, shape index: {}]   ;;  %s4772_s3 = inlined_call_operand.vmem [shape: f32[1,16], index: 3, kind: input, shape index: {}]   ;;  %s4773_s4 = inlined_call_operand.vmem [shape: f32[1,16], index: 4, kind: input, shape index: {}]   ;;  %s4774_s5 = inlined_call_operand.vmem [shape: f32[144,8], index: 5, kind: input, shape index: {}]   ;;  %s4775_s6 = inlined_call_operand.vmem [shape: f32[1,8], index: 6, kind: input, shape index: {}]   ;;  %s4776_s7 = inlined_call_operand.hbm [shape: f32[128,2048], index: 7, kind: input, shape index: {}]   ;;  %s4777_s8 = inlined_call_operand.hbm [shape: f32[8,2048], index: 8, kind: output, shape index: {}]  }
   0x1   :  { %14 = vsyncpa [#allocation6], 0  ;;  %s33_s29 = sshll.u32 %s4776_s7, 4  ;;  %s2756_s30 = smov [#allocation4]   ;;  %s34_s29 = int_to_ptr.hbm [resolvable:$true] %s33_s29 }
   0x2   :  { %s35_s9 = sshll.u32 %s2756_s30, 4  ;;  %s2757_s10 = smov 2048   ;;  %s36_s9 = int_to_ptr.vmem [resolvable:$true] %s35_s9 }
   0x3   :  { %s2758_s11 = smov 128  }
   0x4   :  { %41 = dma.hbm_to_vmem [thread:$0]  %s34_s29, 32768, %s36_s9, [#allocation5], %s2757_s10, %s2757_s10, %s2758_s11  }
   0x5   :  { %2752 = dma.done.wait [#allocation5], 32768  }
   0x6   :  { %2753 = vsyncadd [#allocation5], 4294934528  ;;  %v2829_v0 = vld [vmem:[%s4769_s0] sm:$0xff]  ;;  %v2834_v1 = vld [vmem:[%s4769_s0 + $0x8] sm:$0xff]  ;;  %s2759_s7 = smov 20   ;;  %s2760_s16 = smov 12  }
   0x7   :  { %414 = vrot.lane.b32.xlu1 %v2829_v0, %s2759_s7  ;;  %267 = vrot.lane.b32.xlu0 %v2829_v0, %s2760_s16  ;;  %s2761_s17 = smov 28   ;;  %s2762_s18 = smov 24   ;;  %v2861_v2 = vld [vmem:[%s4769_s0 + $0x10] sm:$0xff]  ;;  %v2880_v3 = vld [vmem:[%s4769_s0 + $0x18] sm:$0xff]  ;;  %vm62_vm0 = vcmask 31744   ;;  %v2767_v5 = vmov 0.0  }
   0x8   :  { %560 = vrot.lane.b32.xlu2 %v2834_v1, %s2761_s17  ;;  %s2763_s19 = smov 16   ;;  %s2764_s20 = smov 32   ;;  %v2903_v4 = vld [vmem:[%s4769_s0 + $0x20] sm:$0xff]  ;;  %63 = vst.msk [vmem:[#allocation2] sm:$0xff] %vm62_vm0, %v2767_v5  ;;  %vm65_vm1 = vcmask 24576   ;;  %vm4778_vm2 = vcmask 64544  }
   0x9   :  { %s2765_s21 = smov 8   ;;  %s2766_s22 = smov 4   ;;  %66 = vst.msk [vmem:[#allocation2] sm:$0x1] %vm65_vm1, %v2767_v5  ;;  %vm171_vm3 = vcmask 97344   ;;  %vm174_vm4 = vcmask 90176  }
   0xa   :  { %99 = vst.msk [vmem:[#allocation2] sm:$0xff] %vm4778_vm2, %v2767_v5  ;;  %v51_v6 = vld [vmem:[%s4769_s0 + $0x28] sm:$0xff]  ;;  %v713_v8 = vld [vmem:[%s4770_s1 + $0x20] sm:$0xf]  ;;  %vm767_vm5 = vcmask 1043456   ;;  %vm248_vm6 = vcmask 122976  }
   0xb   :  { %172 = vst.msk [vmem:[#allocation2] sm:$0xff] %vm171_vm3, %v2767_v5  ;;  %2554 = vmatpush.msk.msra.mxu0 %vm767_vm5, %v713_v8  ;;  %v712_v10 = vld [vmem:[%s4770_s1 + $0x18] sm:$0xff]  ;;  %vm83_vm7 = vcmask 30720   ;;  %v711_v11 = vld [vmem:[%s4770_s1 + $0x10] sm:$0xff]  ;;  %v710_v12 = vld [vmem:[%s4770_s1 + $0x8] sm:$0xff]  ;;  %vm315_vm8 = vcmask 129120  }
   0xc   :  { %175 = vst.msk [vmem:[#allocation2 + $0x7] sm:$0x1] %vm174_vm4, %v2767_v5  ;;  %v709_v13 = vld [vmem:[%s4770_s1] sm:$0xff]  ;;  %v3013_v15 = vld [vmem:[%s4769_s0 + $0x30] sm:$0xff]  ;;  %vm380_vm9 = vcmask 162944   ;;  %vm397_vm10 = vcmask 188576  }
   0xd   :  { %64 = vst.msk [vmem:[#allocation2 + $0x40] sm:$0xff] %vm62_vm0, %v2767_v5  ;;  %783 = vmatpush.msra.mxu0 %v712_v10  ;;  %vm462_vm11 = vcmask 195745   ;;  %vm483_vm12 = vcmask 221376   ;;  %vm542_vm13 = vcmask 227520   ;;  %vm557_vm14 = vcmask 261344   ;;  %v53_v25 = vld [vmem:[%s4769_s0 + $0x38] sm:$0xff] }
   0xe   :  { %67 = vst.msk [vmem:[#allocation2 + $0x8] sm:$0x1] %vm65_vm1, %v2767_v5  ;;  %vm619_vm15 = vcmask 286976   ;;  %vm678_vm0 = vcmask 294145   ;;  %v54_v27 = vld [vmem:[%s4769_s0 + $0x40] sm:$0xff]  ;;  %v3078_v31 = vld [vmem:[%s4769_s0 + $0x48] sm:$0xff] }
   0xf   :  { %500 = vrot.lane.b32.xlu1 %v2834_v1, %s2762_s18  ;;  %332 = vrot.lane.b32.xlu0 %v2829_v0, %s2763_s19  ;;  %68 = vst.msk [vmem:[#allocation2 + $0x10] sm:$0x1] %vm65_vm1, %v2767_v5  ;;  %v3095_v35 = vld [vmem:[%s4769_s0 + $0x50] sm:$0xff]  ;;  %v3134_v46 = vld [vmem:[%s4769_s0 + $0x58] sm:$0xff]  ;;  %vm852_vm5 = vcmask 130048   ;;  %s2770_s30 = smov 112  }
  0x10   :  { %636 = vrot.lane.b32.xlu2 %v2834_v1, %s2764_s20  ;;  %69 = vst.msk [vmem:[#allocation2 + $0x18] sm:$0x1] %vm65_vm1, %v2767_v5  ;;  %784 = vmatpush.msra.mxu0 %v711_v11  ;;  %v3182_v58 = vld [vmem:[%s4769_s0 + $0x60] sm:$0xff]  ;;  %s2771_s9 = smov 48   ;;  %s2772_s10 = smov 80  }
  0x11   :  { %70 = vst.msk [vmem:[#allocation2 + $0x20] sm:$0x1] %vm65_vm1, %v2767_v5  ;;  %s2773_s11 = smov 96  }
  0x12   :  { %71 = vst.msk [vmem:[#allocation2 + $0x28] sm:$0x1] %vm65_vm1, %v2767_v5  ;;  %785 = vmatpush.msra.mxu0 %v710_v12 }
  0x13   :  { %72 = vst.msk [vmem:[#allocation2 + $0x30] sm:$0x1] %vm65_vm1, %v2767_v5 }
  0x14   :  { %73 = vst.msk [vmem:[#allocation2 + $0x38] sm:$0x1] %vm65_vm1, %v2767_v5  ;;  %786 = vmatpush.msra.mxu0 %v709_v13 }
  0x15   :  { %75 = vst.msk [vmem:[#allocation2 + $0x48] sm:$0x1] %vm65_vm1, %v2767_v5 }
  0x16   :  { %76 = vst.msk [vmem:[#allocation2 + $0x50] sm:$0x1] %vm65_vm1, %v2767_v5 }
  0x17   :  { %191 = vrot.lane.b32.xlu1 %v2829_v0, %s2765_s21  ;;  %115 = vrot.lane.b32.xlu0 %v2829_v0, %s2766_s22  ;;  %77 = vst.msk [vmem:[#allocation2 + $0x58] sm:$0x1] %vm65_vm1, %v2767_v5 }
  0x18   :  { %269 = vrot.lane.b32.xlu2 %v2834_v1, %s2760_s16  ;;  %78 = vst.msk [vmem:[#allocation2 + $0x60] sm:$0x1] %vm65_vm1, %v2767_v5 }
  0x19   :  { %79 = vst.msk [vmem:[#allocation2 + $0x68] sm:$0x1] %vm65_vm1, %v2767_v5 }
  0x1a   :  { %80 = vst.msk [vmem:[#allocation2 + $0x70] sm:$0x1] %vm65_vm1, %v2767_v5 }
  0x1b   :  { %81 = vst.msk [vmem:[#allocation2 + $0x78] sm:$0x1] %vm65_vm1, %v2767_v5 }
  0x1c   :  { %74 = vst.msk [vmem:[#allocation2 + $0x40] sm:$0x1] %vm65_vm1, %v2767_v5  ;;  %vm233_vm1 = vcmask 97345  }
  0x1d   :  { %100 = vst.msk [vmem:[#allocation2 + $0x40] sm:$0xff] %vm4778_vm2, %v2767_v5 }
  0x1e   :  { %173 = vst.msk [vmem:[#allocation2 + $0x40] sm:$0xff] %vm171_vm3, %v2767_v5  ;;  %vm718_vm3 = vcmask 293888  }
  0x1f   :  { %416 = vrot.lane.b32.xlu1 %v2834_v1, %s2759_s7  ;;  %334 = vrot.lane.b32.xlu0 %v2834_v1, %s2763_s19  ;;  %183 = vst.msk [vmem:[#allocation2 + $0x47] sm:$0x1] %vm174_vm4, %v2767_v5 }
  0x20   :  { %502 = vrot.lane.b32.xlu2 %v2861_v2, %s2762_s18  ;;  %249 = vst.msk [vmem:[#allocation2] sm:$0x1] %vm248_vm6, %v2767_v5 }
  0x21   :  { %257 = vst.msk [vmem:[#allocation2 + $0x40] sm:$0x1] %vm248_vm6, %v2767_v5 }
  0x22   :  { %84 = vst.msk [vmem:[#allocation2 + $0x9] sm:$0x7f] %vm83_vm7, %v2829_v0 }
  0x23   :  { %85 = vst.msk [vmem:[#allocation2 + $0x11] sm:$0x7f] %vm83_vm7, %v2834_v1 }
  0x24   :  { %86 = vst.msk [vmem:[#allocation2 + $0x19] sm:$0x7f] %vm83_vm7, %v2861_v2 }
  0x25   :  { %87 = vst.msk [vmem:[#allocation2 + $0x21] sm:$0x7f] %vm83_vm7, %v2880_v3 }
  0x26   :  { %88 = vst.msk [vmem:[#allocation2 + $0x29] sm:$0x7f] %vm83_vm7, %v2903_v4 }
  0x27   :  { %638 = vrot.lane.b32.xlu1 %v2861_v2, %s2764_s20  ;;  %562 = vrot.lane.b32.xlu0 %v2861_v2, %s2761_s17  ;;  %89 = vst.msk [vmem:[#allocation2 + $0x31] sm:$0x7f] %vm83_vm7, %v51_v6 }
  0x28   :  { %117 = vrot.lane.b32.xlu2 %v2834_v1, %s2766_s22  ;;  %90 = vst.msk [vmem:[#allocation2 + $0x39] sm:$0x7f] %vm83_vm7, %v3013_v15 }
  0x29   :  { %91 = vst.msk [vmem:[#allocation2 + $0x49] sm:$0x7f] %vm83_vm7, %v54_v27 }
  0x2a   :  { %92 = vst.msk [vmem:[#allocation2 + $0x51] sm:$0x7f] %vm83_vm7, %v3078_v31 }
  0x2b   :  { %93 = vst.msk [vmem:[#allocation2 + $0x59] sm:$0x7f] %vm83_vm7, %v3095_v35 }
  0x2c   :  { %94 = vst.msk [vmem:[#allocation2 + $0x61] sm:$0x7f] %vm83_vm7, %v3134_v46 }
  0x2d   :  { %95 = vst.msk [vmem:[#allocation2 + $0x69] sm:$0x7f] %vm83_vm7, %v3182_v58 }
  0x2e   :  { %1035 = vst.msk [vmem:[#allocation3] sm:$0xff] %vm852_vm5, %v2767_v5 }
  0x2f   :  { %271 = vrot.lane.b32.xlu1 %v2861_v2, %s2760_s16  ;;  %193 = vrot.lane.b32.xlu0 %v2834_v1, %s2765_s21  ;;  %v3216_v1 = vld [vmem:[%s4769_s0 + $0x68] sm:$0xff]  ;;  %1036 = vst.msk [vmem:[#allocation3 + $0x80] sm:$0xff] %vm852_vm5, %v2767_v5 }
  0x30   :  { %336 = vrot.lane.b32.xlu2 %v2861_v2, %s2763_s19  ;;  %96 = vst.msk [vmem:[#allocation2 + $0x71] sm:$0x7f] %vm83_vm7, %v3216_v1 }
  0x31   :  { %1634 = vst.msk [vmem:[#allocation3 + $0x78] sm:$0xff] %vm852_vm5, %v2767_v5 }
  0x32   :  { %1635 = vst.msk [vmem:[#allocation3 + $0xf8] sm:$0xff] %vm852_vm5, %v2767_v5 }
  0x37   :  { %504 = vrot.lane.b32.xlu1 %v2880_v3, %s2762_s18  ;;  %418 = vrot.lane.b32.xlu0 %v2861_v2, %s2759_s7 }
  0x38   :  { %564 = vrot.lane.b32.xlu2 %v2880_v3, %s2761_s17 }
  0x3f   :  { %119 = vrot.lane.b32.xlu1 %v2861_v2, %s2766_s22  ;;  %640 = vrot.lane.b32.xlu0 %v2880_v3, %s2764_s20 }
  0x40   :  { %195 = vrot.lane.b32.xlu2 %v2861_v2, %s2765_s21 }
  0x47   :  { %338 = vrot.lane.b32.xlu1 %v2880_v3, %s2763_s19  ;;  %273 = vrot.lane.b32.xlu0 %v2880_v3, %s2760_s16 }
  0x48   :  { %420 = vrot.lane.b32.xlu2 %v2880_v3, %s2759_s7 }
  0x4f   :  { %566 = vrot.lane.b32.xlu1 %v2903_v4, %s2761_s17  ;;  %506 = vrot.lane.b32.xlu0 %v2903_v4, %s2762_s18 }
  0x50   :  { %642 = vrot.lane.b32.xlu2 %v2903_v4, %s2764_s20 }
  0x57   :  { %197 = vrot.lane.b32.xlu1 %v2880_v3, %s2765_s21  ;;  %121 = vrot.lane.b32.xlu0 %v2880_v3, %s2766_s22 }
  0x58   :  { %275 = vrot.lane.b32.xlu2 %v2903_v4, %s2760_s16 }
  0x5f   :  { %422 = vrot.lane.b32.xlu1 %v2903_v4, %s2759_s7  ;;  %340 = vrot.lane.b32.xlu0 %v2903_v4, %s2763_s19 }
  0x60   :  { %508 = vrot.lane.b32.xlu2 %v51_v6, %s2762_s18 }
  0x62   :  { %v2951_v7 = vpop.permute.xlu2 %560 }
  0x67   :  { %644 = vrot.lane.b32.xlu1 %v51_v6, %s2764_s20  ;;  %568 = vrot.lane.b32.xlu0 %v51_v6, %s2761_s17 }
  0x68   :  { %123 = vrot.lane.b32.xlu2 %v2903_v4, %s2766_s22 }
  0x6a   :  { %v637_v9 = vpop.permute.xlu2 %636 }
  0x6f   :  { %277 = vrot.lane.b32.xlu1 %v51_v6, %s2760_s16  ;;  %199 = vrot.lane.b32.xlu0 %v2903_v4, %s2765_s21 }
  0x70   :  { %342 = vrot.lane.b32.xlu2 %v51_v6, %s2763_s19 }
  0x72   :  { %v270_v14 = vpop.permute.xlu2 %269 }
  0x77   :  { %510 = vrot.lane.b32.xlu1 %v3013_v15, %s2762_s18  ;;  %424 = vrot.lane.b32.xlu0 %v51_v6, %s2759_s7 }
  0x78   :  { %570 = vrot.lane.b32.xlu2 %v3013_v15, %s2761_s17 }
  0x79   :  { %v415_v16 = vpop.permute.xlu1 %414  ;;  %v268_v17 = vpop.permute.xlu0 %267 }
  0x7a   :  { %316 = vst.msk [vmem:[#allocation2 + $0x1] sm:$0x7f] %vm315_vm8, %v268_v17  ;;  %v503_v18 = vpop.permute.xlu2 %502  ;;  %v3286_v17 = vld [vmem:[%s4769_s0 + $0x70] sm:$0xff] }
  0x7b   :  { %97 = vst.msk [vmem:[#allocation2 + $0x79] sm:$0x7f] %vm83_vm7, %v3286_v17  ;;  %vm4780_vm7 = vcmask 228544  }
  0x7f   :  { %125 = vrot.lane.b32.xlu1 %v51_v6, %s2766_s22  ;;  %646 = vrot.lane.b32.xlu0 %v3013_v15, %s2764_s20 }
  0x80   :  { %201 = vrot.lane.b32.xlu2 %v51_v6, %s2765_s21 }
  0x81   :  { %v501_v19 = vpop.permute.xlu1 %500  ;;  %v333_v20 = vpop.permute.xlu0 %332 }
  0x82   :  { %381 = vst.msk [vmem:[#allocation2] sm:$0xff] %vm380_vm9, %v333_v20  ;;  %v118_v21 = vpop.permute.xlu2 %117 }
  0x83   :  { %398 = vst.msk [vmem:[#allocation2 + $0x7] sm:$0x1] %vm397_vm10, %v2767_v5 }
  0x84   :  { %463 = vst.msk [vmem:[#allocation2 - $0x1] sm:$0xfe] %vm462_vm11, %v415_v16 }
  0x85   :  { %484 = vst.msk [vmem:[#allocation2] sm:$0x1] %vm483_vm12, %v2767_v5 }
  0x86   :  { %543 = vst.msk [vmem:[#allocation2 + $0x1] sm:$0x7f] %vm542_vm13, %v501_v19 }
  0x87   :  { %602 = vst.msk [vmem:[#allocation2] sm:$0xff] %vm557_vm14, %v2951_v7  ;;  %344 = vrot.lane.b32.xlu1 %v3013_v15, %s2763_s19  ;;  %279 = vrot.lane.b32.xlu0 %v3013_v15, %s2760_s16 }
  0x88   :  { %620 = vst.msk [vmem:[#allocation2 + $0x7] sm:$0x1] %vm619_vm15, %v2767_v5  ;;  %426 = vrot.lane.b32.xlu2 %v3013_v15, %s2759_s7 }
  0x89   :  { %679 = vst.msk [vmem:[#allocation2 - $0x1] sm:$0xfe] %vm678_vm0, %v637_v9  ;;  %v192_v22 = vpop.permute.xlu1 %191  ;;  %v116_v23 = vpop.permute.xlu0 %115 }
  0x8a   :  { %157 = vst.msk [vmem:[#allocation2 + $0x8] sm:$0xff] %vm4778_vm2, %v116_v23  ;;  %v337_v24 = vpop.permute.xlu2 %336 }
  0x8b   :  { %176 = vst.msk [vmem:[#allocation2 + $0xf] sm:$0x1] %vm174_vm4, %v2767_v5 }
  0x8c   :  { %234 = vst.msk [vmem:[#allocation2 + $0x7] sm:$0xfe] %vm233_vm1, %v192_v22 }
  0x8d   :  { %250 = vst.msk [vmem:[#allocation2 + $0x8] sm:$0x1] %vm248_vm6, %v2767_v5 }
  0x8e   :  { %317 = vst.msk [vmem:[#allocation2 + $0x9] sm:$0x7f] %vm315_vm8, %v270_v14 }
  0x8f   :  { %127 = vrot.lane.b32.xlu1 %v3013_v15, %s2766_s22  ;;  %512 = vrot.lane.b32.xlu0 %v53_v25, %s2762_s18  ;;  %158 = vst.msk [vmem:[#allocation2 + $0x10] sm:$0xff] %vm4778_vm2, %v118_v21 }
  0x90   :  { %v693_v26 = vld [vmem:[#allocation2] sm:$0xff]  ;;  %177 = vst.msk [vmem:[#allocation2 + $0x17] sm:$0x1] %vm174_vm4, %v2767_v5  ;;  %572 = vrot.lane.b32.xlu2 %v53_v25, %s2761_s17 }
  0x91   :  { %v417_v28 = vpop.permute.xlu1 %416  ;;  %2555 = vmatmul.msk.f32.vlgmr.msra.gmra.mxu0 %vm718_vm3, %v693_v26  ;;  %v335_v29 = vpop.permute.xlu0 %334 }
  0x92   :  { %382 = vst.msk [vmem:[#allocation2 + $0x8] sm:$0xff] %vm380_vm9, %v335_v29  ;;  %v565_v30 = vpop.permute.xlu2 %564 }
  0x93   :  { %399 = vst.msk [vmem:[#allocation2 + $0xf] sm:$0x1] %vm397_vm10, %v2767_v5 }
  0x94   :  { %464 = vst.msk [vmem:[#allocation2 + $0x7] sm:$0xfe] %vm462_vm11, %v417_v28 }
  0x95   :  { %485 = vst.msk [vmem:[#allocation2 + $0x8] sm:$0x1] %vm483_vm12, %v2767_v5 }
  0x96   :  { %544 = vst.msk [vmem:[#allocation2 + $0x9] sm:$0x7f] %vm542_vm13, %v503_v18 }
  0x97   :  { %648 = vrot.lane.b32.xlu1 %v53_v25, %s2764_s20  ;;  %203 = vrot.lane.b32.xlu0 %v3013_v15, %s2765_s21 }
  0x98   :  { %281 = vrot.lane.b32.xlu2 %v53_v25, %s2760_s16 }
  0x99   :  { %v639_v32 = vpop.permute.xlu1 %638  ;;  %v563_v33 = vpop.permute.xlu0 %562 }
  0x9a   :  { %603 = vst.msk [vmem:[#allocation2 + $0x8] sm:$0xff] %vm557_vm14, %v563_v33  ;;  %v196_v34 = vpop.permute.xlu2 %195 }
  0x9b   :  { %621 = vst.msk [vmem:[#allocation2 + $0xf] sm:$0x1] %vm619_vm15, %v2767_v5 }
  0x9c   :  { %680 = vst.msk [vmem:[#allocation2 + $0x7] sm:$0xfe] %vm678_vm0, %v639_v32 }
  0x9f   :  { %346 = vrot.lane.b32.xlu0 %v53_v25, %s2763_s19  ;;  %428 = vrot.lane.b32.xlu1 %v53_v25, %s2759_s7 }
  0xa0   :  { %283 = vrot.lane.b32.xlu2 %v54_v27, %s2760_s16 }
  0xa1   :  { %v272_v36 = vpop.permute.xlu1 %271  ;;  %v194_v37 = vpop.permute.xlu0 %193 }
  0xa2   :  { %235 = vst.msk [vmem:[#allocation2 + $0xf] sm:$0xfe] %vm233_vm1, %v194_v37  ;;  %v421_v38 = vpop.permute.xlu2 %420 }
  0xa3   :  { %251 = vst.msk [vmem:[#allocation2 + $0x10] sm:$0x1] %vm248_vm6, %v2767_v5  ;;  %v694_v39 = vld [vmem:[#allocation2 + $0x8] sm:$0xff] }
  0xa4   :  { %318 = vst.msk [vmem:[#allocation2 + $0x11] sm:$0x7f] %vm315_vm8, %v272_v36  ;;  %2556 = vmatmul.msk.f32.gmra.mxu0 %vm718_vm3, %v694_v39 }
  0xa5   :  { %383 = vst.msk [vmem:[#allocation2 + $0x10] sm:$0xff] %vm380_vm9, %v337_v24 }
  0xa6   :  { %400 = vst.msk [vmem:[#allocation2 + $0x17] sm:$0x1] %vm397_vm10, %v2767_v5 }
  0xa7   :  { %348 = vrot.lane.b32.xlu0 %v54_v27, %s2763_s19  ;;  %430 = vrot.lane.b32.xlu1 %v54_v27, %s2759_s7 }
  0xa8   :  { %514 = vrot.lane.b32.xlu2 %v3078_v31, %s2762_s18 }
  0xa9   :  { %v505_v40 = vpop.permute.xlu1 %504  ;;  %v419_v41 = vpop.permute.xlu0 %418 }
  0xaa   :  { %465 = vst.msk [vmem:[#allocation2 + $0xf] sm:$0xfe] %vm462_vm11, %v419_v41  ;;  %v643_v42 = vpop.permute.xlu2 %642 }
  0xab   :  { %486 = vst.msk [vmem:[#allocation2 + $0x10] sm:$0x1] %vm483_vm12, %v2767_v5 }
  0xac   :  { %545 = vst.msk [vmem:[#allocation2 + $0x11] sm:$0x7f] %vm542_vm13, %v505_v40 }
  0xad   :  { %604 = vst.msk [vmem:[#allocation2 + $0x10] sm:$0xff] %vm557_vm14, %v565_v30 }
  0xae   :  { %622 = vst.msk [vmem:[#allocation2 + $0x17] sm:$0x1] %vm619_vm15, %v2767_v5 }
  0xaf   :  { %574 = vrot.lane.b32.xlu0 %v3078_v31, %s2761_s17  ;;  %650 = vrot.lane.b32.xlu1 %v3078_v31, %s2764_s20 }
  0xb0   :  { %129 = vrot.lane.b32.xlu2 %v54_v27, %s2766_s22 }
  0xb1   :  { %v120_v43 = vpop.permute.xlu1 %119  ;;  %v641_v44 = vpop.permute.xlu0 %640 }
  0xb2   :  { %159 = vst.msk [vmem:[#allocation2 + $0x18] sm:$0xff] %vm4778_vm2, %v120_v43  ;;  %v276_v45 = vpop.permute.xlu2 %275 }
  0xb3   :  { %178 = vst.msk [vmem:[#allocation2 + $0x1f] sm:$0x1] %vm174_vm4, %v2767_v5 }
  0xb4   :  { %681 = vst.msk [vmem:[#allocation2 + $0xf] sm:$0xfe] %vm678_vm0, %v641_v44 }
  0xb5   :  { %236 = vst.msk [vmem:[#allocation2 + $0x17] sm:$0xfe] %vm233_vm1, %v196_v34 }
  0xb6   :  { %252 = vst.msk [vmem:[#allocation2 + $0x18] sm:$0x1] %vm248_vm6, %v2767_v5 }
  0xb7   :  { %205 = vrot.lane.b32.xlu0 %v54_v27, %s2765_s21  ;;  %285 = vrot.lane.b32.xlu1 %v3078_v31, %s2760_s16 }
  0xb8   :  { %350 = vrot.lane.b32.xlu2 %v3078_v31, %s2763_s19 }
  0xb9   :  { %v339_v47 = vpop.permute.xlu1 %338  ;;  %v274_v48 = vpop.permute.xlu0 %273 }
  0xba   :  { %319 = vst.msk [vmem:[#allocation2 + $0x19] sm:$0x7f] %vm315_vm8, %v274_v48  ;;  %v509_v49 = vpop.permute.xlu2 %508 }
  0xbb   :  { %384 = vst.msk [vmem:[#allocation2 + $0x18] sm:$0xff] %vm380_vm9, %v339_v47  ;;  %v695_v50 = vld [vmem:[#allocation2 + $0x10] sm:$0xff] }
  0xbc   :  { %2557 = vmatmul.msk.f32.gmra.mxu0 %vm718_vm3, %v695_v50  ;;  %401 = vst.msk [vmem:[#allocation2 + $0x1f] sm:$0x1] %vm397_vm10, %v2767_v5 }
  0xbd   :  { %466 = vst.msk [vmem:[#allocation2 + $0x17] sm:$0xfe] %vm462_vm11, %v421_v38 }
  0xbe   :  { %487 = vst.msk [vmem:[#allocation2 + $0x18] sm:$0x1] %vm483_vm12, %v2767_v5 }
  0xbf   :  { %432 = vrot.lane.b32.xlu0 %v3078_v31, %s2759_s7  ;;  %516 = vrot.lane.b32.xlu1 %v3095_v35, %s2762_s18 }
  0xc0   :  { %576 = vrot.lane.b32.xlu2 %v3095_v35, %s2761_s17 }
  0xc1   :  { %v567_v51 = vpop.permute.xlu1 %566  ;;  %v507_v52 = vpop.permute.xlu0 %506 }
  0xc2   :  { %546 = vst.msk [vmem:[#allocation2 + $0x19] sm:$0x7f] %vm542_vm13, %v507_v52  ;;  %v124_v53 = vpop.permute.xlu2 %123 }
  0xc3   :  { %605 = vst.msk [vmem:[#allocation2 + $0x18] sm:$0xff] %vm557_vm14, %v567_v51 }
  0xc4   :  { %623 = vst.msk [vmem:[#allocation2 + $0x1f] sm:$0x1] %vm619_vm15, %v2767_v5 }
  0xc5   :  { %682 = vst.msk [vmem:[#allocation2 + $0x17] sm:$0xfe] %vm678_vm0, %v643_v42 }
  0xc6   :  { %161 = vst.msk [vmem:[#allocation2 + $0x28] sm:$0xff] %vm4778_vm2, %v124_v53 }
  0xc7   :  { %652 = vrot.lane.b32.xlu0 %v3095_v35, %s2764_s20  ;;  %131 = vrot.lane.b32.xlu1 %v3078_v31, %s2766_s22  ;;  %180 = vst.msk [vmem:[#allocation2 + $0x2f] sm:$0x1] %vm174_vm4, %v2767_v5 }
  0xc8   :  { %207 = vrot.lane.b32.xlu2 %v3078_v31, %s2765_s21  ;;  %v3343_v31 = vld [vmem:[%s4771_s2] ss:$0 sm:$0xff] }
  0xc9   :  { %v198_v54 = vpop.permute.xlu1 %197  ;;  %v122_v55 = vpop.permute.xlu0 %121 }
  0xca   :  { %160 = vst.msk [vmem:[#allocation2 + $0x20] sm:$0xff] %vm4778_vm2, %v122_v55  ;;  %v343_v56 = vpop.permute.xlu2 %342 }
  0xcb   :  { %179 = vst.msk [vmem:[#allocation2 + $0x27] sm:$0x1] %vm174_vm4, %v2767_v5 }
  0xcc   :  { %237 = vst.msk [vmem:[#allocation2 + $0x1f] sm:$0xfe] %vm233_vm1, %v198_v54  ;;  %v696_v57 = vld [vmem:[#allocation2 + $0x18] sm:$0xff] }
  0xcd   :  { %253 = vst.msk [vmem:[#allocation2 + $0x20] sm:$0x1] %vm248_vm6, %v2767_v5  ;;  %2558 = vmatmul.msk.f32.gmra.mxu0 %vm718_vm3, %v696_v57 }
  0xce   :  { %320 = vst.msk [vmem:[#allocation2 + $0x21] sm:$0x7f] %vm315_vm8, %v276_v45  ;;  %v61_v45 = vld [vmem:[%s4769_s0 + $0x78] sm:$0xff] }
  0xcf   :  { %287 = vrot.lane.b32.xlu0 %v3095_v35, %s2760_s16  ;;  %352 = vrot.lane.b32.xlu1 %v3095_v35, %s2763_s19 }
  0xd0   :  { %434 = vrot.lane.b32.xlu2 %v3095_v35, %s2759_s7 }
  0xd1   :  { %v423_v59 = vpop.permute.xlu1 %422  ;;  %v341_v60 = vpop.permute.xlu0 %340 }
  0xd2   :  { %385 = vst.msk [vmem:[#allocation2 + $0x20] sm:$0xff] %vm380_vm9, %v341_v60  ;;  %v571_v61 = vpop.permute.xlu2 %570 }
  0xd3   :  { %402 = vst.msk [vmem:[#allocation2 + $0x27] sm:$0x1] %vm397_vm10, %v2767_v5 }
  0xd4   :  { %467 = vst.msk [vmem:[#allocation2 + $0x1f] sm:$0xfe] %vm462_vm11, %v423_v59 }
  0xd5   :  { %488 = vst.msk [vmem:[#allocation2 + $0x20] sm:$0x1] %vm483_vm12, %v2767_v5 }
  0xd6   :  { %547 = vst.msk [vmem:[#allocation2 + $0x21] sm:$0x7f] %vm542_vm13, %v509_v49 }
  0xd7   :  { %518 = vrot.lane.b32.xlu0 %v3134_v46, %s2762_s18  ;;  %578 = vrot.lane.b32.xlu1 %v3134_v46, %s2761_s17 }
  0xd8   :  { %654 = vrot.lane.b32.xlu2 %v3134_v46, %s2764_s20 }
  0xd9   :  { %v645_v62 = vpop.permute.xlu1 %644  ;;  %v569_v63 = vpop.permute.xlu0 %568 }
  0xda   :  { %606 = vst.msk [vmem:[#allocation2 + $0x20] sm:$0xff] %vm557_vm14, %v569_v63  ;;  %v202_v0 = vpop.permute.xlu2 %201 }
  0xdb   :  { %624 = vst.msk [vmem:[#allocation2 + $0x27] sm:$0x1] %vm619_vm15, %v2767_v5 }
  0xdc   :  { %683 = vst.msk [vmem:[#allocation2 + $0x1f] sm:$0xfe] %vm678_vm0, %v645_v62 }
  0xdf   :  { %133 = vrot.lane.b32.xlu0 %v3095_v35, %s2766_s22  ;;  %209 = vrot.lane.b32.xlu1 %v3095_v35, %s2765_s21 }
  0xe0   :  { %289 = vrot.lane.b32.xlu2 %v3134_v46, %s2760_s16 }
  0xe1   :  { %v278_v2 = vpop.permute.xlu1 %277  ;;  %v200_v3 = vpop.permute.xlu0 %199 }
  0xe2   :  { %238 = vst.msk [vmem:[#allocation2 + $0x27] sm:$0xfe] %vm233_vm1, %v200_v3  ;;  %v427_v4 = vpop.permute.xlu2 %426 }
  0xe3   :  { %254 = vst.msk [vmem:[#allocation2 + $0x28] sm:$0x1] %vm248_vm6, %v2767_v5  ;;  %v697_v6 = vld [vmem:[#allocation2 + $0x20] sm:$0xff] }
  0xe4   :  { %321 = vst.msk [vmem:[#allocation2 + $0x29] sm:$0x7f] %vm315_vm8, %v278_v2  ;;  %2559 = vmatmul.msk.f32.gmra.mxu0 %vm718_vm3, %v697_v6 }
  0xe5   :  { %386 = vst.msk [vmem:[#allocation2 + $0x28] sm:$0xff] %vm380_vm9, %v343_v56 }
  0xe6   :  { %403 = vst.msk [vmem:[#allocation2 + $0x2f] sm:$0x1] %vm397_vm10, %v2767_v5 }
  0xe7   :  { %354 = vrot.lane.b32.xlu0 %v3134_v46, %s2763_s19  ;;  %436 = vrot.lane.b32.xlu1 %v3134_v46, %s2759_s7 }
  0xe8   :  { %520 = vrot.lane.b32.xlu2 %v3182_v58, %s2762_s18 }
  0xe9   :  { %v511_v7 = vpop.permute.xlu1 %510  ;;  %v425_v8 = vpop.permute.xlu0 %424 }
  0xea   :  { %468 = vst.msk [vmem:[#allocation2 + $0x27] sm:$0xfe] %vm462_vm11, %v425_v8  ;;  %v573_v9 = vpop.permute.xlu2 %572 }
  0xeb   :  { %489 = vst.msk [vmem:[#allocation2 + $0x28] sm:$0x1] %vm483_vm12, %v2767_v5 }
  0xec   :  { %548 = vst.msk [vmem:[#allocation2 + $0x29] sm:$0x7f] %vm542_vm13, %v511_v7 }
  0xed   :  { %607 = vst.msk [vmem:[#allocation2 + $0x28] sm:$0xff] %vm557_vm14, %v571_v61 }
  0xee   :  { %625 = vst.msk [vmem:[#allocation2 + $0x2f] sm:$0x1] %vm619_vm15, %v2767_v5 }
  0xef   :  { %580 = vrot.lane.b32.xlu0 %v3182_v58, %s2761_s17  ;;  %656 = vrot.lane.b32.xlu1 %v3182_v58, %s2764_s20 }
  0xf0   :  { %135 = vrot.lane.b32.xlu2 %v3134_v46, %s2766_s22 }
  0xf1   :  { %v126_v10 = vpop.permute.xlu1 %125  ;;  %v647_v11 = vpop.permute.xlu0 %646 }
  0xf2   :  { %162 = vst.msk [vmem:[#allocation2 + $0x30] sm:$0xff] %vm4778_vm2, %v126_v10  ;;  %v282_v12 = vpop.permute.xlu2 %281 }
  0xf3   :  { %181 = vst.msk [vmem:[#allocation2 + $0x37] sm:$0x1] %vm174_vm4, %v2767_v5 }
  0xf4   :  { %684 = vst.msk [vmem:[#allocation2 + $0x27] sm:$0xfe] %vm678_vm0, %v647_v11 }
  0xf5   :  { %239 = vst.msk [vmem:[#allocation2 + $0x2f] sm:$0xfe] %vm233_vm1, %v202_v0 }
  0xf6   :  { %255 = vst.msk [vmem:[#allocation2 + $0x30] sm:$0x1] %vm248_vm6, %v2767_v5 }
  0xf7   :  { %211 = vrot.lane.b32.xlu0 %v3134_v46, %s2765_s21  ;;  %291 = vrot.lane.b32.xlu1 %v3182_v58, %s2760_s16 }
  0xf8   :  { %356 = vrot.lane.b32.xlu2 %v3182_v58, %s2763_s19 }
  0xf9   :  { %v345_v13 = vpop.permute.xlu1 %344  ;;  %v280_v14 = vpop.permute.xlu0 %279 }
  0xfa   :  { %322 = vst.msk [vmem:[#allocation2 + $0x31] sm:$0x7f] %vm315_vm8, %v280_v14  ;;  %v284_v15 = vpop.permute.xlu2 %283 }
  0xfb   :  { %387 = vst.msk [vmem:[#allocation2 + $0x30] sm:$0xff] %vm380_vm9, %v345_v13  ;;  %v698_v16 = vld [vmem:[#allocation2 + $0x28] sm:$0xff] }
  0xfc   :  { %2560 = vmatmul.msk.f32.gmra.mxu0 %vm718_vm3, %v698_v16  ;;  %404 = vst.msk [vmem:[#allocation2 + $0x37] sm:$0x1] %vm397_vm10, %v2767_v5 }
  0xfd   :  { %469 = vst.msk [vmem:[#allocation2 + $0x2f] sm:$0xfe] %vm462_vm11, %v427_v4 }
  0xfe   :  { %490 = vst.msk [vmem:[#allocation2 + $0x30] sm:$0x1] %vm483_vm12, %v2767_v5 }
  0xff   :  { %438 = vrot.lane.b32.xlu0 %v3182_v58, %s2759_s7  ;;  %522 = vrot.lane.b32.xlu1 %v3216_v1, %s2762_s18  ;;  %324 = vst.msk [vmem:[#allocation2 + $0x41] sm:$0x7f] %vm315_vm8, %v284_v15 }
 0x100   :  { %582 = vrot.lane.b32.xlu2 %v3216_v1, %s2761_s17 }
 0x101   :  { %v128_v18 = vpop.permute.xlu1 %127  ;;  %v513_v19 = vpop.permute.xlu0 %512 }
 0x102   :  { %163 = vst.msk [vmem:[#allocation2 + $0x38] sm:$0xff] %vm4778_vm2, %v128_v18  ;;  %v515_v20 = vpop.permute.xlu2 %514 }
 0x103   :  { %182 = vst.msk [vmem:[#allocation2 + $0x3f] sm:$0x1] %vm174_vm4, %v2767_v5 }
 0x104   :  { %549 = vst.msk [vmem:[#allocation2 + $0x31] sm:$0x7f] %vm542_vm13, %v513_v19 }
 0x105   :  { %608 = vst.msk [vmem:[#allocation2 + $0x30] sm:$0xff] %vm557_vm14, %v573_v9 }
 0x106   :  { %626 = vst.msk [vmem:[#allocation2 + $0x37] sm:$0x1] %vm619_vm15, %v2767_v5 }
 0x107   :  { %658 = vrot.lane.b32.xlu0 %v3216_v1, %s2764_s20  ;;  %137 = vrot.lane.b32.xlu1 %v3182_v58, %s2766_s22 }
 0x108   :  { %213 = vrot.lane.b32.xlu2 %v3182_v58, %s2765_s21 }
 0x109   :  { %v649_v21 = vpop.permute.xlu1 %648  ;;  %v204_v22 = vpop.permute.xlu0 %203 }
 0x10a   :  { %685 = vst.msk [vmem:[#allocation2 + $0x2f] sm:$0xfe] %vm678_vm0, %v649_v21  ;;  %v130_v23 = vpop.permute.xlu2 %129 }
 0x10b   :  { %240 = vst.msk [vmem:[#allocation2 + $0x37] sm:$0xfe] %vm233_vm1, %v204_v22 }
 0x10c   :  { %256 = vst.msk [vmem:[#allocation2 + $0x38] sm:$0x1] %vm248_vm6, %v2767_v5 }
 0x10d   :  { %323 = vst.msk [vmem:[#allocation2 + $0x39] sm:$0x7f] %vm315_vm8, %v282_v12 }
 0x10e   :  { %164 = vst.msk [vmem:[#allocation2 + $0x48] sm:$0xff] %vm4778_vm2, %v130_v23  ;;  %vm4779_vm2 = vcmask 294144   ;;  %v788_v28 = vpop.f32.mrf.mxu0 }
 0x10f   :  { %293 = vrot.lane.b32.xlu0 %v3216_v1, %s2760_s16  ;;  %358 = vrot.lane.b32.xlu1 %v3216_v1, %s2763_s19  ;;  %184 = vst.msk [vmem:[#allocation2 + $0x4f] sm:$0x1] %vm174_vm4, %v2767_v5  ;;  %v3352_v33 = vadd.f32 %v3343_v31, %v788_v28 }
 0x110   :  { %440 = vrot.lane.b32.xlu2 %v3216_v1, %s2759_s7 }
 0x111   :  { %v347_v24 = vpop.permute.xlu0 %346  ;;  %v429_v25 = vpop.permute.xlu1 %428  ;;  %v699_v26 = vld [vmem:[#allocation2 + $0x30] sm:$0xff]  ;;  %v836_v37 = vmax.f32 %v3352_v33, 0.0 }
 0x112   :  { %388 = vst.msk [vmem:[#allocation2 + $0x38] sm:$0xff] %vm380_vm9, %v347_v24  ;;  %2561 = vmatmul.msk.f32.gmra.mxu0 %vm718_vm3, %v699_v26  ;;  %v351_v27 = vpop.permute.xlu2 %350 }
 0x113   :  { %405 = vst.msk [vmem:[#allocation2 + $0x3f] sm:$0x1] %vm397_vm10, %v2767_v5  ;;  %v853_v42 = vsel %vm852_vm5, %v836_v37, 0.0 }
 0x114   :  { %470 = vst.msk [vmem:[#allocation2 + $0x37] sm:$0xfe] %vm462_vm11, %v429_v25 }
 0x115   :  { %481 = vst.msk [vmem:[#allocation2 + $0x38] sm:$0xff] %vm4780_vm7, %v2767_v5 }
 0x116   :  { %491 = vst.msk [vmem:[#allocation2 + $0x38] sm:$0x1] %vm483_vm12, %v2767_v5 }
 0x117   :  { %558 = vst.msk [vmem:[#allocation2 + $0x38] sm:$0xff] %vm557_vm14, %v2767_v5  ;;  %524 = vrot.lane.b32.xlu0 %v3286_v17, %s2762_s18  ;;  %584 = vrot.lane.b32.xlu1 %v3286_v17, %s2761_s17 }
 0x118   :  { %617 = vst.msk [vmem:[#allocation2 + $0x38] sm:$0xff] %vm4779_vm2, %v2767_v5  ;;  %660 = vrot.lane.b32.xlu2 %v3286_v17, %s2764_s20  ;;  %vm4781_vm2 = vcmask 64544  }
 0x119   :  { %627 = vst.msk [vmem:[#allocation2 + $0x3f] sm:$0x1] %vm619_vm15, %v2767_v5  ;;  %v349_v29 = vpop.permute.xlu0 %348  ;;  %v431_v30 = vpop.permute.xlu1 %430  ;;  %vm4782_vm7 = vmmov %vm4781_vm2 }
 0x11a   :  { %389 = vst.msk [vmem:[#allocation2 + $0x40] sm:$0xff] %vm380_vm9, %v349_v29  ;;  %v577_v32 = vpop.permute.xlu2 %576 }
 0x11b   :  { %406 = vst.msk [vmem:[#allocation2 + $0x47] sm:$0x1] %vm397_vm10, %v2767_v5 }
 0x11c   :  { %471 = vst.msk [vmem:[#allocation2 + $0x3f] sm:$0xfe] %vm462_vm11, %v431_v30 }
 0x11d   :  { %492 = vst.msk [vmem:[#allocation2 + $0x40] sm:$0x1] %vm483_vm12, %v2767_v5 }
 0x11e   :  { %550 = vst.msk [vmem:[#allocation2 + $0x41] sm:$0x7f] %vm542_vm13, %v515_v20 }
 0x11f   :  { %139 = vrot.lane.b32.xlu0 %v3216_v1, %s2766_s22  ;;  %215 = vrot.lane.b32.xlu1 %v3216_v1, %s2765_s21 }
 0x120   :  { %v700_v34 = vld [vmem:[#allocation2 + $0x38] sm:$0xff]  ;;  %295 = vrot.lane.b32.xlu2 %v3286_v17, %s2760_s16 }
 0x121   :  { %v791_v35 = vpop.f32.mrf.mxu0  ;;  %2562 = vmatmul.msk.f32.gmra.mxu0 %vm718_vm3, %v700_v34  ;;  %v575_v36 = vpop.permute.xlu0 %574 }
 0x122   :  { %v3364_v38 = vadd.f32 %v3343_v31, %v791_v35  ;;  %609 = vst.msk [vmem:[#allocation2 + $0x40] sm:$0xff] %vm557_vm14, %v575_v36  ;;  %v651_v39 = vpop.permute.xlu1 %650  ;;  %v208_v40 = vpop.permute.xlu2 %207 }
 0x123   :  { %628 = vst.msk [vmem:[#allocation2 + $0x47] sm:$0x1] %vm619_vm15, %v2767_v5 }
 0x124   :  { %v837_v41 = vmax.f32 %v3364_v38, 0.0  ;;  %686 = vst.msk [vmem:[#allocation2 + $0x3f] sm:$0xfe] %vm678_vm0, %v651_v39 }
 0x126   :  { %v854_v43 = vsel %vm852_vm5, %v837_v41, 0.0 }
 0x127   :  { %v855_v44 = vadd.f32 %v854_v43, %v853_v42  ;;  %360 = vrot.lane.b32.xlu0 %v3286_v17, %s2763_s19  ;;  %442 = vrot.lane.b32.xlu1 %v3286_v17, %s2759_s7 }
 0x128   :  { %526 = vrot.lane.b32.xlu2 %v61_v45, %s2762_s18 }
 0x129   :  { %v206_v46 = vpop.permute.xlu0 %205 }
 0x12a   :  { %241 = vst.msk [vmem:[#allocation2 + $0x47] sm:$0xfe] %vm233_vm1, %v206_v46  ;;  %v286_v47 = vpop.permute.xlu1 %285  ;;  %v435_v48 = vpop.permute.xlu2 %434 }
 0x12b   :  { %258 = vst.msk [vmem:[#allocation2 + $0x48] sm:$0x1] %vm248_vm6, %v2767_v5  ;;  %v701_v49 = vld [vmem:[#allocation2 + $0x40] sm:$0xff] }
 0x12c   :  { %325 = vst.msk [vmem:[#allocation2 + $0x49] sm:$0x7f] %vm315_vm8, %v286_v47  ;;  %2563 = vmatmul.msk.f32.gmra.mxu0 %vm718_vm3, %v701_v49 }
 0x12d   :  { %390 = vst.msk [vmem:[#allocation2 + $0x48] sm:$0xff] %vm380_vm9, %v351_v27 }
 0x12e   :  { %407 = vst.msk [vmem:[#allocation2 + $0x4f] sm:$0x1] %vm397_vm10, %v2767_v5 }
 0x12f   :  { %141 = vrot.lane.b32.xlu0 %v3286_v17, %s2766_s22  ;;  %586 = vrot.lane.b32.xlu1 %v61_v45, %s2761_s17 }
 0x130   :  { %217 = vrot.lane.b32.xlu2 %v3286_v17, %s2765_s21 }
 0x131   :  { %v433_v50 = vpop.permute.xlu0 %432 }
 0x132   :  { %472 = vst.msk [vmem:[#allocation2 + $0x47] sm:$0xfe] %vm462_vm11, %v433_v50  ;;  %v517_v51 = vpop.permute.xlu1 %516  ;;  %v655_v52 = vpop.permute.xlu2 %654 }
 0x133   :  { %493 = vst.msk [vmem:[#allocation2 + $0x48] sm:$0x1] %vm483_vm12, %v2767_v5 }
 0x134   :  { %551 = vst.msk [vmem:[#allocation2 + $0x49] sm:$0x7f] %vm542_vm13, %v517_v51 }
 0x135   :  { %610 = vst.msk [vmem:[#allocation2 + $0x48] sm:$0xff] %vm557_vm14, %v577_v32 }
 0x136   :  { %629 = vst.msk [vmem:[#allocation2 + $0x4f] sm:$0x1] %vm619_vm15, %v2767_v5 }
 0x137   :  { %662 = vrot.lane.b32.xlu0 %v61_v45, %s2764_s20  ;;  %297 = vrot.lane.b32.xlu1 %v61_v45, %s2760_s16 }
 0x138   :  { %362 = vrot.lane.b32.xlu2 %v61_v45, %s2763_s19 }
 0x139   :  { %v794_v53 = vpop.f32.mrf.mxu0  ;;  %v653_v54 = vpop.permute.xlu0 %652 }
 0x13a   :  { %v3409_v55 = vadd.f32 %v3343_v31, %v794_v53  ;;  %687 = vst.msk [vmem:[#allocation2 + $0x47] sm:$0xfe] %vm678_vm0, %v653_v54  ;;  %v132_v56 = vpop.permute.xlu1 %131  ;;  %v290_v57 = vpop.permute.xlu2 %289 }
 0x13b   :  { %165 = vst.msk [vmem:[#allocation2 + $0x50] sm:$0xff] %vm4781_vm2, %v132_v56 }
 0x13c   :  { %v838_v58 = vmax.f32 %v3409_v55, 0.0  ;;  %185 = vst.msk [vmem:[#allocation2 + $0x57] sm:$0x1] %vm174_vm4, %v2767_v5 }
 0x13d   :  { %242 = vst.msk [vmem:[#allocation2 + $0x4f] sm:$0xfe] %vm233_vm1, %v208_v40 }
 0x13e   :  { %v856_v59 = vsel %vm852_vm5, %v838_v58, 0.0  ;;  %259 = vst.msk [vmem:[#allocation2 + $0x50] sm:$0x1] %vm248_vm6, %v2767_v5 }
 0x13f   :  { %v857_v60 = vadd.f32 %v856_v59, %v855_v44  ;;  %444 = vrot.lane.b32.xlu0 %v61_v45, %s2759_s7 }
 0x141   :  { %v288_v61 = vpop.permute.xlu0 %287  ;;  %v702_v62 = vld [vmem:[#allocation2 + $0x48] sm:$0xff] }
 0x142   :  { %326 = vst.msk [vmem:[#allocation2 + $0x51] sm:$0x7f] %vm315_vm8, %v288_v61  ;;  %v353_v63 = vpop.permute.xlu1 %352  ;;  %2564 = vmatmul.msk.f32.gmra.mxu0 %vm718_vm3, %v702_v62  ;;  %v521_v0 = vpop.permute.xlu2 %520 }
 0x143   :  { %391 = vst.msk [vmem:[#allocation2 + $0x50] sm:$0xff] %vm380_vm9, %v353_v63 }
 0x144   :  { %408 = vst.msk [vmem:[#allocation2 + $0x57] sm:$0x1] %vm397_vm10, %v2767_v5 }
 0x145   :  { %473 = vst.msk [vmem:[#allocation2 + $0x4f] sm:$0xfe] %vm462_vm11, %v435_v48 }
 0x146   :  { %494 = vst.msk [vmem:[#allocation2 + $0x50] sm:$0x1] %vm483_vm12, %v2767_v5 }
 0x149   :  { %v519_v1 = vpop.permute.xlu0 %518 }
 0x14a   :  { %552 = vst.msk [vmem:[#allocation2 + $0x51] sm:$0x7f] %vm542_vm13, %v519_v1  ;;  %v797_v2 = vpop.f32.mrf.mxu0  ;;  %v579_v3 = vpop.permute.xlu1 %578 }
 0x14b   :  { %v3433_v4 = vadd.f32 %v3343_v31, %v797_v2  ;;  %611 = vst.msk [vmem:[#allocation2 + $0x50] sm:$0xff] %vm557_vm14, %v579_v3  ;;  %v136_v7 = vpop.permute.xlu2 %135 }
 0x14c   :  { %630 = vst.msk [vmem:[#allocation2 + $0x57] sm:$0x1] %vm619_vm15, %v2767_v5 }
 0x14d   :  { %v839_v6 = vmax.f32 %v3433_v4, 0.0  ;;  %688 = vst.msk [vmem:[#allocation2 + $0x4f] sm:$0xfe] %vm678_vm0, %v655_v52 }
 0x14e   :  { %167 = vst.msk [vmem:[#allocation2 + $0x60] sm:$0xff] %vm4781_vm2, %v136_v7 }
 0x14f   :  { %v858_v8 = vsel %vm852_vm5, %v839_v6, 0.0  ;;  %187 = vst.msk [vmem:[#allocation2 + $0x67] sm:$0x1] %vm174_vm4, %v2767_v5 }
 0x150   :  { %v859_v9 = vadd.f32 %v858_v8, %v857_v60 }
 0x151   :  { %v134_v10 = vpop.permute.xlu0 %133 }
 0x152   :  { %166 = vst.msk [vmem:[#allocation2 + $0x58] sm:$0xff] %vm4782_vm7, %v134_v10  ;;  %v210_v11 = vpop.permute.xlu1 %209  ;;  %vm4783_vm7 = vmmov %vm4781_vm2 }
 0x153   :  { %186 = vst.msk [vmem:[#allocation2 + $0x5f] sm:$0x1] %vm174_vm4, %v2767_v5  ;;  %v357_v15 = vpop.permute.xlu2 %356 }
 0x154   :  { %243 = vst.msk [vmem:[#allocation2 + $0x57] sm:$0xfe] %vm233_vm1, %v210_v11  ;;  %v703_v12 = vld [vmem:[#allocation2 + $0x50] sm:$0xff] }
 0x155   :  { %260 = vst.msk [vmem:[#allocation2 + $0x58] sm:$0x1] %vm248_vm6, %v2767_v5  ;;  %2565 = vmatmul.msk.f32.gmra.mxu0 %vm718_vm3, %v703_v12 }
 0x156   :  { %327 = vst.msk [vmem:[#allocation2 + $0x59] sm:$0x7f] %vm315_vm8, %v290_v57 }
 0x159   :  { %v355_v13 = vpop.permute.xlu0 %354 }
 0x15a   :  { %392 = vst.msk [vmem:[#allocation2 + $0x58] sm:$0xff] %vm380_vm9, %v355_v13  ;;  %v437_v14 = vpop.permute.xlu1 %436 }
 0x15b   :  { %409 = vst.msk [vmem:[#allocation2 + $0x5f] sm:$0x1] %vm397_vm10, %v2767_v5  ;;  %v583_v21 = vpop.permute.xlu2 %582 }
 0x15c   :  { %474 = vst.msk [vmem:[#allocation2 + $0x57] sm:$0xfe] %vm462_vm11, %v437_v14 }
 0x15d   :  { %495 = vst.msk [vmem:[#allocation2 + $0x58] sm:$0x1] %vm483_vm12, %v2767_v5 }
 0x15e   :  { %553 = vst.msk [vmem:[#allocation2 + $0x59] sm:$0x7f] %vm542_vm13, %v521_v0 }
 0x161   :  { %v800_v16 = vpop.f32.mrf.mxu0  ;;  %v581_v17 = vpop.permute.xlu0 %580 }
 0x162   :  { %v3462_v18 = vadd.f32 %v3343_v31, %v800_v16  ;;  %612 = vst.msk [vmem:[#allocation2 + $0x58] sm:$0xff] %vm557_vm14, %v581_v17  ;;  %v657_v19 = vpop.permute.xlu1 %656 }
 0x163   :  { %631 = vst.msk [vmem:[#allocation2 + $0x5f] sm:$0x1] %vm619_vm15, %v2767_v5  ;;  %v214_v27 = vpop.permute.xlu2 %213 }
 0x164   :  { %v840_v20 = vmax.f32 %v3462_v18, 0.0  ;;  %689 = vst.msk [vmem:[#allocation2 + $0x57] sm:$0xfe] %vm678_vm0, %v657_v19 }
 0x166   :  { %v860_v22 = vsel %vm852_vm5, %v840_v20, 0.0 }
 0x167   :  { %v3472_v23 = vadd.f32 %v860_v22, %v859_v9 }
 0x169   :  { %v212_v24 = vpop.permute.xlu0 %211 }
 0x16a   :  { %244 = vst.msk [vmem:[#allocation2 + $0x5f] sm:$0xfe] %vm233_vm1, %v212_v24  ;;  %v292_v25 = vpop.permute.xlu1 %291 }
 0x16b   :  { %261 = vst.msk [vmem:[#allocation2 + $0x60] sm:$0x1] %vm248_vm6, %v2767_v5  ;;  %v704_v26 = vld [vmem:[#allocation2 + $0x58] sm:$0xff]  ;;  %v441_v32 = vpop.permute.xlu2 %440 }
 0x16c   :  { %328 = vst.msk [vmem:[#allocation2 + $0x61] sm:$0x7f] %vm315_vm8, %v292_v25  ;;  %2566 = vmatmul.msk.f32.gmra.mxu0 %vm718_vm3, %v704_v26 }
 0x16d   :  { %393 = vst.msk [vmem:[#allocation2 + $0x60] sm:$0xff] %vm380_vm9, %v357_v15 }
 0x16e   :  { %410 = vst.msk [vmem:[#allocation2 + $0x67] sm:$0x1] %vm397_vm10, %v2767_v5 }
 0x171   :  { %v439_v28 = vpop.permute.xlu0 %438 }
 0x172   :  { %475 = vst.msk [vmem:[#allocation2 + $0x5f] sm:$0xfe] %vm462_vm11, %v439_v28  ;;  %v523_v29 = vpop.permute.xlu1 %522 }
 0x173   :  { %496 = vst.msk [vmem:[#allocation2 + $0x60] sm:$0x1] %vm483_vm12, %v2767_v5  ;;  %v661_v40 = vpop.permute.xlu2 %660 }
 0x174   :  { %554 = vst.msk [vmem:[#allocation2 + $0x61] sm:$0x7f] %vm542_vm13, %v523_v29 }
 0x175   :  { %613 = vst.msk [vmem:[#allocation2 + $0x60] sm:$0xff] %vm557_vm14, %v583_v21 }
 0x176   :  { %632 = vst.msk [vmem:[#allocation2 + $0x67] sm:$0x1] %vm619_vm15, %v2767_v5 }
 0x179   :  { %v659_v30 = vpop.permute.xlu0 %658  ;;  %v803_v62 = vpop.f32.mrf.mxu0 }
 0x17a   :  { %690 = vst.msk [vmem:[#allocation2 + $0x5f] sm:$0xfe] %vm678_vm0, %v659_v30  ;;  %v138_v34 = vpop.permute.xlu1 %137  ;;  %v3552_v9 = vadd.f32 %v3343_v31, %v803_v62 }
 0x17b   :  { %168 = vst.msk [vmem:[#allocation2 + $0x68] sm:$0xff] %vm4783_vm7, %v138_v34  ;;  %v296_v44 = vpop.permute.xlu2 %295  ;;  %vm4784_vm7 = vmmov %vm4781_vm2 }
 0x17c   :  { %188 = vst.msk [vmem:[#allocation2 + $0x6f] sm:$0x1] %vm174_vm4, %v2767_v5  ;;  %v841_v11 = vmax.f32 %v3552_v9, 0.0 }
 0x17d   :  { %245 = vst.msk [vmem:[#allocation2 + $0x67] sm:$0xfe] %vm233_vm1, %v214_v27 }
 0x17e   :  { %262 = vst.msk [vmem:[#allocation2 + $0x68] sm:$0x1] %vm248_vm6, %v2767_v5  ;;  %v862_v16 = vsel %vm852_vm5, %v841_v11, 0.0 }
 0x17f   :  { %v863_v25 = vadd.f32 %v862_v16, %v3472_v23 }
 0x181   :  { %v294_v35 = vpop.permute.xlu0 %293  ;;  %v705_v36 = vld [vmem:[#allocation2 + $0x60] sm:$0xff] }
 0x182   :  { %329 = vst.msk [vmem:[#allocation2 + $0x69] sm:$0x7f] %vm315_vm8, %v294_v35  ;;  %v359_v39 = vpop.permute.xlu1 %358  ;;  %2567 = vmatmul.msk.f32.gmra.mxu0 %vm718_vm3, %v705_v36 }
 0x183   :  { %394 = vst.msk [vmem:[#allocation2 + $0x68] sm:$0xff] %vm380_vm9, %v359_v39  ;;  %v527_v48 = vpop.permute.xlu2 %526 }
 0x184   :  { %411 = vst.msk [vmem:[#allocation2 + $0x6f] sm:$0x1] %vm397_vm10, %v2767_v5 }
 0x185   :  { %476 = vst.msk [vmem:[#allocation2 + $0x67] sm:$0xfe] %vm462_vm11, %v441_v32 }
 0x186   :  { %497 = vst.msk [vmem:[#allocation2 + $0x68] sm:$0x1] %vm483_vm12, %v2767_v5 }
 0x189   :  { %v525_v42 = vpop.permute.xlu0 %524 }
 0x18a   :  { %555 = vst.msk [vmem:[#allocation2 + $0x69] sm:$0x7f] %vm542_vm13, %v525_v42  ;;  %v585_v43 = vpop.permute.xlu1 %584 }
 0x18b   :  { %614 = vst.msk [vmem:[#allocation2 + $0x68] sm:$0xff] %vm557_vm14, %v585_v43  ;;  %v218_v51 = vpop.permute.xlu2 %217  ;;  %v2768_v43 = vmov 128.0  }
 0x18c   :  { %633 = vst.msk [vmem:[#allocation2 + $0x6f] sm:$0x1] %vm619_vm15, %v2767_v5  ;;  %2700 = vrcp.f32 %v2768_v43 }
 0x18d   :  { %691 = vst.msk [vmem:[#allocation2 + $0x67] sm:$0xfe] %vm678_vm0, %v661_v40 }
 0x18f   :  { %v806_v63 = vpop.f32.mrf.mxu0 }
 0x190   :  { %v3555_v10 = vadd.f32 %v3343_v31, %v806_v63 }
 0x191   :  { %v140_v45 = vpop.permute.xlu0 %139 }
 0x192   :  { %169 = vst.msk [vmem:[#allocation2 + $0x70] sm:$0xff] %vm4781_vm2, %v140_v45  ;;  %v216_v46 = vpop.permute.xlu1 %215  ;;  %v842_v13 = vmax.f32 %v3555_v10, 0.0  ;;  %vm1247_vm2 = vcmask 391424  }
 0x193   :  { %189 = vst.msk [vmem:[#allocation2 + $0x77] sm:$0x1] %vm174_vm4, %v2767_v5  ;;  %v363_v56 = vpop.permute.xlu2 %362 }
 0x194   :  { %v706_v47 = vld [vmem:[#allocation2 + $0x68] sm:$0xff]  ;;  %246 = vst.msk [vmem:[#allocation2 + $0x6f] sm:$0xfe] %vm233_vm1, %v216_v46  ;;  %v864_v21 = vsel %vm852_vm5, %v842_v13, 0.0 }
 0x195   :  { %2568 = vmatmul.msk.f32.gmra.mxu0 %vm718_vm3, %v706_v47  ;;  %263 = vst.msk [vmem:[#allocation2 + $0x70] sm:$0x1] %vm248_vm6, %v2767_v5  ;;  %v865_v29 = vadd.f32 %v864_v21, %v863_v25 }
 0x196   :  { %330 = vst.msk [vmem:[#allocation2 + $0x71] sm:$0x7f] %vm315_vm8, %v296_v44 }
 0x199   :  { %v361_v49 = vpop.permute.xlu0 %360 }
 0x19a   :  { %395 = vst.msk [vmem:[#allocation2 + $0x70] sm:$0xff] %vm380_vm9, %v361_v49  ;;  %v443_v50 = vpop.permute.xlu1 %442 }
 0x19b   :  { %412 = vst.msk [vmem:[#allocation2 + $0x77] sm:$0x1] %vm397_vm10, %v2767_v5 }
 0x19c   :  { %477 = vst.msk [vmem:[#allocation2 + $0x6f] sm:$0xfe] %vm462_vm11, %v443_v50 }
 0x19d   :  { %498 = vst.msk [vmem:[#allocation2 + $0x70] sm:$0x1] %vm483_vm12, %v2767_v5 }
 0x19e   :  { %556 = vst.msk [vmem:[#allocation2 + $0x71] sm:$0x7f] %vm542_vm13, %v527_v48  ;;  %v809_v0 = vpop.f32.mrf.mxu0  ;;  %vm1666_vm13 = vcmask 129024  }
 0x19f   :  { %v3559_v12 = vadd.f32 %v3343_v31, %v809_v0 }
 0x1a1   :  { %v142_v52 = vpop.permute.xlu0 %141  ;;  %v843_v17 = vmax.f32 %v3559_v12, 0.0 }
 0x1a2   :  { %170 = vst.msk [vmem:[#allocation2 + $0x78] sm:$0xff] %vm4784_vm7, %v142_v52  ;;  %v587_v53 = vpop.permute.xlu1 %586  ;;  %vm1331_vm7 = vcmask 523649  }
 0x1a3   :  { %190 = vst.msk [vmem:[#allocation2 + $0x7f] sm:$0x1] %vm174_vm4, %v2767_v5  ;;  %vm4785_vm4 = vcmask 228544   ;;  %v866_v26 = vsel %vm852_vm5, %v843_v17, 0.0 }
 0x1a4   :  { %615 = vst.msk [vmem:[#allocation2 + $0x70] sm:$0xff] %vm557_vm14, %v587_v53  ;;  %v867_v23 = vadd.f32 %v866_v26, %v865_v29  ;;  %v2701_v53 = vpop.eup %2700 }
 0x1a5   :  { %634 = vst.msk [vmem:[#allocation2 + $0x77] sm:$0x1] %vm619_vm15, %v2767_v5  ;;  %v891_v62 = vmul.f32 128.0, %v2701_v53 }
 0x1a6   :  { %247 = vst.msk [vmem:[#allocation2 + $0x77] sm:$0xfe] %vm233_vm1, %v218_v51  ;;  %vm1171_vm1 = vcmask 392448  }
 0x1a7   :  { %264 = vst.msk [vmem:[#allocation2 + $0x78] sm:$0x1] %vm248_vm6, %v2767_v5  ;;  %vm4786_vm6 = vcmask 294144  }
 0x1a9   :  { %v663_v54 = vpop.permute.xlu0 %662  ;;  %v812_v1 = vpop.f32.mrf.mxu0 }
 0x1aa   :  { %692 = vst.msk [vmem:[#allocation2 + $0x6f] sm:$0xfe] %vm678_vm0, %v663_v54  ;;  %v298_v57 = vpop.permute.xlu1 %297  ;;  %v3563_v14 = vadd.f32 %v3343_v31, %v812_v1  ;;  %vm1174_vm0 = vcmask 385280  }
 0x1ab   :  { %331 = vst.msk [vmem:[#allocation2 + $0x79] sm:$0x7f] %vm315_vm8, %v298_v57  ;;  %vm895_vm8 = vweird.f32 %v2701_v53 }
 0x1ac   :  { %396 = vst.msk [vmem:[#allocation2 + $0x78] sm:$0xff] %vm380_vm9, %v363_v56  ;;  %v844_v22 = vmax.f32 %v3563_v14, 0.0  ;;  %vm1037_vm9 = vcmask 122880  }
 0x1ad   :  { %413 = vst.msk [vmem:[#allocation2 + $0x7f] sm:$0x1] %vm397_vm10, %v2767_v5 }
 0x1ae   :  { %v868_v30 = vsel %vm852_vm5, %v844_v22, 0.0  ;;  %1636 = vst.msk [vmem:[#allocation3 + $0xf] sm:$0x1] %vm1037_vm9, %v2767_v5 }
 0x1af   :  { %v869_v42 = vadd.f32 %v868_v30, %v867_v23  ;;  %1038 = vst.msk [vmem:[#allocation3] sm:$0x1] %vm1037_vm9, %v2767_v5 }
 0x1b0   :  { %1039 = vst.msk [vmem:[#allocation3 + $0x10] sm:$0x1] %vm1037_vm9, %v2767_v5 }
 0x1b1   :  { %v445_v59 = vpop.permute.xlu0 %444  ;;  %v707_v60 = vld [vmem:[#allocation2 + $0x70] sm:$0xff]  ;;  %1040 = vst.msk [vmem:[#allocation3 + $0x20] sm:$0x1] %vm1037_vm9, %v2767_v5 }
 0x1b2   :  { %478 = vst.msk [vmem:[#allocation2 + $0x77] sm:$0xfe] %vm462_vm11, %v445_v59  ;;  %2569 = vmatmul.msk.f32.gmra.mxu0 %vm718_vm3, %v707_v60 }
 0x1b3   :  { %482 = vst.msk [vmem:[#allocation2 + $0x78] sm:$0xff] %vm4785_vm4, %v2767_v5  ;;  %vm1396_vm4 = vcmask 654848  }
 0x1b4   :  { %499 = vst.msk [vmem:[#allocation2 + $0x78] sm:$0x1] %vm483_vm12, %v2767_v5 }
 0x1b5   :  { %559 = vst.msk [vmem:[#allocation2 + $0x78] sm:$0xff] %vm557_vm14, %v2767_v5  ;;  %vm1097_vm14 = vcmask 130049  }
 0x1b6   :  { %618 = vst.msk [vmem:[#allocation2 + $0x78] sm:$0xff] %vm4786_vm6, %v2767_v5  ;;  %vm1413_vm6 = vcmask 778880  }
 0x1b7   :  { %635 = vst.msk [vmem:[#allocation2 + $0x7f] sm:$0x1] %vm619_vm15, %v2767_v5  ;;  %vm1112_vm15 = vcmask 261248  }
 0x1b8   :  { %1041 = vst.msk [vmem:[#allocation3 + $0x30] sm:$0x1] %vm1037_vm9, %v2767_v5 }
 0x1b9   :  { %1042 = vst.msk [vmem:[#allocation3 + $0x40] sm:$0x1] %vm1037_vm9, %v2767_v5 }
 0x1ba   :  { %1043 = vst.msk [vmem:[#allocation3 + $0x50] sm:$0x1] %vm1037_vm9, %v2767_v5 }
 0x1bb   :  { %1044 = vst.msk [vmem:[#allocation3 + $0x60] sm:$0x1] %vm1037_vm9, %v2767_v5 }
 0x1bc   :  { %1045 = vst.msk [vmem:[#allocation3 + $0x70] sm:$0x1] %vm1037_vm9, %v2767_v5 }
 0x1bd   :  { %1046 = vst.msk [vmem:[#allocation3 + $0x80] sm:$0x1] %vm1037_vm9, %v2767_v5 }
 0x1be   :  { %v708_v61 = vld [vmem:[#allocation2 + $0x78] sm:$0xff]  ;;  %1047 = vst.msk [vmem:[#allocation3 + $0x90] sm:$0x1] %vm1037_vm9, %v2767_v5 }
 0x1bf   :  { %2570 = vmatmul.msk.f32.gmra.mxu0 %vm718_vm3, %v708_v61  ;;  %v815_v2 = vpop.f32.mrf.mxu0  ;;  %1048 = vst.msk [vmem:[#allocation3 + $0xa0] sm:$0x1] %vm1037_vm9, %v2767_v5  ;;  %vm1262_vm3 = vcmask 516480  }
 0x1c0   :  { %v3570_v19 = vadd.f32 %v3343_v31, %v815_v2  ;;  %1049 = vst.msk [vmem:[#allocation3 + $0xb0] sm:$0x1] %vm1037_vm9, %v2767_v5 }
 0x1c1   :  { %1050 = vst.msk [vmem:[#allocation3 + $0xc0] sm:$0x1] %vm1037_vm9, %v2767_v5 }
 0x1c2   :  { %v845_v27 = vmax.f32 %v3570_v19, 0.0  ;;  %1051 = vst.msk [vmem:[#allocation3 + $0xd0] sm:$0x1] %vm1037_vm9, %v2767_v5 }
 0x1c3   :  { %1052 = vst.msk [vmem:[#allocation3 + $0xe0] sm:$0x1] %vm1037_vm9, %v2767_v5 }
 0x1c4   :  { %v870_v36 = vsel %vm852_vm5, %v845_v27, 0.0  ;;  %1053 = vst.msk [vmem:[#allocation3 + $0xf0] sm:$0x1] %vm1037_vm9, %v2767_v5 }
 0x1c5   :  { %v871_v47 = vadd.f32 %v870_v36, %v869_v42  ;;  %1637 = vst.msk [vmem:[#allocation3 + $0x1f] sm:$0x1] %vm1037_vm9, %v2767_v5 }
 0x1c6   :  { %1638 = vst.msk [vmem:[#allocation3 + $0x2f] sm:$0x1] %vm1037_vm9, %v2767_v5 }
 0x1c7   :  { %1639 = vst.msk [vmem:[#allocation3 + $0x3f] sm:$0x1] %vm1037_vm9, %v2767_v5 }
 0x1c8   :  { %1640 = vst.msk [vmem:[#allocation3 + $0x4f] sm:$0x1] %vm1037_vm9, %v2767_v5 }
 0x1c9   :  { %1641 = vst.msk [vmem:[#allocation3 + $0x5f] sm:$0x1] %vm1037_vm9, %v2767_v5 }
 0x1ca   :  { %1642 = vst.msk [vmem:[#allocation3 + $0x6f] sm:$0x1] %vm1037_vm9, %v2767_v5 }
 0x1cb   :  { %1643 = vst.msk [vmem:[#allocation3 + $0x7f] sm:$0x1] %vm1037_vm9, %v2767_v5 }
 0x1cc   :  { %1644 = vst.msk [vmem:[#allocation3 + $0x8f] sm:$0x1] %vm1037_vm9, %v2767_v5 }
 0x1cd   :  { %1645 = vst.msk [vmem:[#allocation3 + $0x9f] sm:$0x1] %vm1037_vm9, %v2767_v5 }
 0x1ce   :  { %1646 = vst.msk [vmem:[#allocation3 + $0xaf] sm:$0x1] %vm1037_vm9, %v2767_v5 }
 0x1cf   :  { %1647 = vst.msk [vmem:[#allocation3 + $0xbf] sm:$0x1] %vm1037_vm9, %v2767_v5 }
 0x1d0   :  { %1648 = vst.msk [vmem:[#allocation3 + $0xcf] sm:$0x1] %vm1037_vm9, %v2767_v5 }
 0x1d1   :  { %1649 = vst.msk [vmem:[#allocation3 + $0xdf] sm:$0x1] %vm1037_vm9, %v2767_v5 }
 0x1d2   :  { %v818_v3 = vpop.f32.mrf.mxu0  ;;  %1650 = vst.msk [vmem:[#allocation3 + $0xef] sm:$0x1] %vm1037_vm9, %v2767_v5 }
 0x1d3   :  { %v3577_v24 = vadd.f32 %v3343_v31, %v818_v3  ;;  %v892_v3 = vsub.f32 1.0, %v891_v62  ;;  %1651 = vst.msk [vmem:[#allocation3 + $0xff] sm:$0x1] %vm1037_vm9, %v2767_v5  ;;  %vm1501_vm9 = vcmask 910080  }
 0x1d4   :  { %1113 = vst.msk [vmem:[#allocation3] sm:$0xff] %vm1112_vm15, %v2767_v5 }
 0x1d5   :  { %v846_v32 = vmax.f32 %v3577_v24, 0.0  ;;  %1114 = vst.msk [vmem:[#allocation3 + $0x80] sm:$0xff] %vm1112_vm15, %v2767_v5 }
 0x1d6   :  { %1172 = vst.msk [vmem:[#allocation3] sm:$0xff] %vm1171_vm1, %v2767_v5 }
 0x1d7   :  { %v872_v44 = vsel %vm852_vm5, %v846_v32, 0.0  ;;  %1175 = vst.msk [vmem:[#allocation3 + $0x7] sm:$0x1] %vm1174_vm0, %v2767_v5 }
 0x1d8   :  { %v873_v50 = vadd.f32 %v872_v44, %v871_v47  ;;  %1173 = vst.msk [vmem:[#allocation3 + $0x80] sm:$0xff] %vm1171_vm1, %v2767_v5 }
 0x1d9   :  { %1263 = vst.msk [vmem:[#allocation3] sm:$0x1] %vm1262_vm3, %v2767_v5 }
 0x1da   :  { %1183 = vst.msk [vmem:[#allocation3 + $0x87] sm:$0x1] %vm1174_vm0, %v2767_v5 }
 0x1db   :  { %1271 = vst.msk [vmem:[#allocation3 + $0x80] sm:$0x1] %vm1262_vm3, %v2767_v5 }
 0x1e9   :  { %v821_v7 = vpop.f32.mrf.mxu0 }
 0x1ea   :  { %v3585_v28 = vadd.f32 %v3343_v31, %v821_v7 }
 0x1ec   :  { %v847_v39 = vmax.f32 %v3585_v28, 0.0 }
 0x1ee   :  { %v874_v48 = vsel %vm852_vm5, %v847_v39, 0.0 }
 0x1ef   :  { %v875_v54 = vadd.f32 %v874_v48, %v873_v50 }
 0x1ff   :  { %v824_v8 = vpop.f32.mrf.mxu0 }
 0x200   :  { %v3592_v34 = vadd.f32 %v3343_v31, %v824_v8 }
 0x202   :  { %v848_v45 = vmax.f32 %v3592_v34, 0.0 }
 0x204   :  { %v876_v51 = vsel %vm852_vm5, %v848_v45, 0.0 }
 0x205   :  { %v877_v57 = vadd.f32 %v876_v51, %v875_v54 }
 0x212   :  { %v827_v15 = vpop.f32.mrf.mxu0 }
 0x213   :  { %v3599_v40 = vadd.f32 %v3343_v31, %v827_v15  ;;  %v893_v15 = vmul.f32 %v2701_v53, %v892_v3 }
 0x215   :  { %v849_v49 = vmax.f32 %v3599_v40, 0.0  ;;  %v894_v25 = vadd.f32 %v2701_v53, %v893_v15 }
 0x217   :  { %v878_v56 = vsel %vm852_vm5, %v849_v49, 0.0  ;;  %v3629_v29 = vsel %vm895_vm8, %v2701_v53, %v894_v25  ;;  %vm1480_vm8 = vcmask 785024  }
 0x218   :  { %v879_v63 = vadd.f32 %v878_v56, %v877_v57 }
 0x22f   :  { %v830_v35 = vpop.f32.mrf.mxu0 }
 0x230   :  { %v3606_v46 = vadd.f32 %v3343_v31, %v830_v35 }
 0x232   :  { %v850_v52 = vmax.f32 %v3606_v46, 0.0 }
 0x234   :  { %v880_v60 = vsel %vm852_vm5, %v850_v52, 0.0 }
 0x235   :  { %v881_v1 = vadd.f32 %v880_v60, %v879_v63 }
 0x23c   :  { %v833_v59 = vpop.f32.mrf.mxu0 }
 0x23d   :  { %v3623_v61 = vadd.f32 %v3343_v31, %v833_v59 }
 0x23f   :  { %v851_v0 = vmax.f32 %v3623_v61, 0.0 }
 0x241   :  { %v882_v2 = vsel %vm852_vm5, %v851_v0, 0.0 }
 0x242   :  { %v883_v7 = vadd.f32 %v882_v2, %v881_v1 }
 0x244   :  { %v884_v8 = vrot.slane %v883_v7, 4 }
 0x246   :  { %v885_v16 = vadd.f32 %v884_v8, %v883_v7 }
 0x248   :  { %v886_v21 = vrot.slane %v885_v16, 2 }
 0x24a   :  { %v887_v26 = vadd.f32 %v886_v21, %v885_v16 }
 0x24c   :  { %v888_v31 = vrot.slane %v887_v26, 1 }
 0x24e   :  { %v889_v30 = vadd.f32 %v888_v31, %v887_v26 }
 0x250   :  { %v897_v23 = vmul.f32 %v3629_v29, %v889_v30 }
 0x252   :  { %v3634_v35 = vsub.f32 %v836_v37, %v897_v23  ;;  %v3638_v36 = vsub.f32 %v837_v41, %v897_v23  ;;  %v3642_v42 = vsub.f32 %v838_v58, %v897_v23  ;;  %v3646_v43 = vsub.f32 %v839_v6, %v897_v23 }
 0x253   :  { %v3650_v44 = vsub.f32 %v840_v20, %v897_v23  ;;  %v3660_v41 = vsub.f32 %v841_v11, %v897_v23  ;;  %v3668_v18 = vsub.f32 %v842_v13, %v897_v23  ;;  %v3675_v11 = vsub.f32 %v843_v17, %v897_v23 }
 0x254   :  { %v914_v33 = vmul.f32 %v3634_v35, %v3634_v35  ;;  %v915_v37 = vmul.f32 %v3638_v36, %v3638_v36  ;;  %v916_v38 = vmul.f32 %v3642_v42, %v3642_v42  ;;  %v917_v55 = vmul.f32 %v3646_v43, %v3646_v43 }
 0x255   :  { %v918_v20 = vmul.f32 %v3650_v44, %v3650_v44  ;;  %v919_v48 = vmul.f32 %v3660_v41, %v3660_v41  ;;  %v3682_v10 = vsub.f32 %v844_v22, %v897_v23  ;;  %v920_v13 = vmul.f32 %v3668_v18, %v3668_v18 }
 0x256   :  { %v930_v58 = vsel %vm852_vm5, %v914_v33, 0.0  ;;  %v931_v4 = vsel %vm852_vm5, %v915_v37, 0.0  ;;  %v933_v47 = vsel %vm852_vm5, %v916_v38, 0.0  ;;  %v935_v50 = vsel %vm852_vm5, %v917_v55, 0.0 }
 0x257   :  { %v932_v6 = vadd.f32 %v931_v4, %v930_v58  ;;  %v937_v53 = vsel %vm852_vm5, %v918_v20, 0.0  ;;  %v3689_v12 = vsub.f32 %v845_v27, %v897_v23  ;;  %v921_v17 = vmul.f32 %v3675_v11, %v3675_v11 }
 0x258   :  { %v939_v56 = vsel %vm852_vm5, %v919_v48, 0.0  ;;  %v3696_v14 = vsub.f32 %v846_v32, %v897_v23  ;;  %v922_v22 = vmul.f32 %v3682_v10, %v3682_v10  ;;  %v941_v59 = vsel %vm852_vm5, %v920_v13, 0.0 }
 0x259   :  { %v934_v9 = vadd.f32 %v933_v47, %v932_v6  ;;  %v3703_v19 = vsub.f32 %v847_v39, %v897_v23  ;;  %v923_v27 = vmul.f32 %v3689_v12, %v3689_v12  ;;  %v943_v62 = vsel %vm852_vm5, %v921_v17, 0.0  ;;  %v3788_v17 = vld [vmem:[%s4772_s3] ss:$0 sm:$0xff] }
 0x25a   :  { %v3710_v24 = vsub.f32 %v848_v45, %v897_v23  ;;  %v924_v32 = vmul.f32 %v3696_v14, %v3696_v14  ;;  %v945_v1 = vsel %vm852_vm5, %v922_v22, 0.0  ;;  %v3717_v28 = vsub.f32 %v849_v49, %v897_v23 }
 0x25b   :  { %v936_v51 = vadd.f32 %v935_v50, %v934_v9  ;;  %v925_v39 = vmul.f32 %v3703_v19, %v3703_v19  ;;  %v947_v3 = vsel %vm852_vm5, %v923_v27, 0.0  ;;  %v3724_v34 = vsub.f32 %v850_v52, %v897_v23  ;;  %v1730_v9 = vld [vmem:[%s4774_s5 + $0x88] sm:$0xff] }
 0x25c   :  { %v926_v45 = vmul.f32 %v3710_v24, %v3710_v24  ;;  %v949_v8 = vsel %vm852_vm5, %v924_v32, 0.0  ;;  %v3731_v40 = vsub.f32 %v851_v0, %v897_v23  ;;  %v927_v49 = vmul.f32 %v3717_v28, %v3717_v28  ;;  %1862 = vmatpush.msra.mxu2 %v1730_v9 }
 0x25d   :  { %v938_v54 = vadd.f32 %v937_v53, %v936_v51  ;;  %v951_v16 = vsel %vm852_vm5, %v925_v39, 0.0  ;;  %v928_v46 = vmul.f32 %v3724_v34, %v3724_v34 }
 0x25e   :  { %v953_v52 = vsel %vm852_vm5, %v926_v45, 0.0  ;;  %v929_v26 = vmul.f32 %v3731_v40, %v3731_v40  ;;  %v955_v31 = vsel %vm852_vm5, %v927_v49, 0.0 }
 0x25f   :  { %v940_v57 = vadd.f32 %v939_v56, %v938_v54  ;;  %v957_v0 = vsel %vm852_vm5, %v928_v46, 0.0 }
 0x260   :  { %v959_v23 = vsel %vm852_vm5, %v929_v26, 0.0 }
 0x261   :  { %v942_v60 = vadd.f32 %v941_v59, %v940_v57 }
 0x263   :  { %v944_v63 = vadd.f32 %v943_v62, %v942_v60  ;;  %v3805_v60 = vld [vmem:[%s4773_s4] ss:$0 sm:$0xff]  ;;  %s2769_s4 = smov 64  }
 0x265   :  { %v946_v2 = vadd.f32 %v945_v1, %v944_v63 }
 0x267   :  { %v948_v7 = vadd.f32 %v947_v3, %v946_v2 }
 0x269   :  { %v950_v15 = vadd.f32 %v949_v8, %v948_v7 }
 0x26b   :  { %v952_v21 = vadd.f32 %v951_v16, %v950_v15 }
 0x26d   :  { %v954_v25 = vadd.f32 %v953_v52, %v952_v21 }
 0x26f   :  { %v956_v61 = vadd.f32 %v955_v31, %v954_v25 }
 0x271   :  { %v958_v30 = vadd.f32 %v957_v0, %v956_v61 }
 0x273   :  { %v960_v33 = vadd.f32 %v959_v23, %v958_v30 }
 0x275   :  { %v961_v37 = vrot.slane %v960_v33, 4 }
 0x277   :  { %v962_v38 = vadd.f32 %v961_v37, %v960_v33 }
 0x279   :  { %v963_v55 = vrot.slane %v962_v38, 2 }
 0x27b   :  { %v964_v58 = vadd.f32 %v963_v55, %v962_v38 }
 0x27d   :  { %v965_v4 = vrot.slane %v964_v58, 1 }
 0x27f   :  { %v966_v6 = vadd.f32 %v965_v4, %v964_v58 }
 0x281   :  { %v967_v20 = vmul.f32 %v966_v6, %v3629_v29  ;;  %v1729_v29 = vld [vmem:[%s4774_s5 + $0x80] sm:$0xff] }
 0x282   :  { %1863 = vmatpush.msra.mxu2 %v1729_v29 }
 0x283   :  { %v968_v47 = vadd.f32 1e-05, %v967_v20 }
 0x285   :  { %2702 = vrsqrt.f32 %v968_v47  ;;  %vm975_vm11 = vweird.f32 %v968_v47 }
 0x28b   :  { %v2703_v48 = vpop.eup %2702 }
 0x28c   :  { %v970_v50 = vmul.f32 %v2703_v48, %v968_v47  ;;  %vm976_vm10 = vweird.f32 %v2703_v48 }
 0x28d   :  { %vm977_vm12 = vmor %vm975_vm11, %vm976_vm10  ;;  %vm1560_vm10 = vcmask 917249   ;;  %vm1575_vm11 = vcmask 1048448  }
 0x28e   :  { %v971_v51 = vmul.f32 %v2703_v48, %v970_v50 }
 0x290   :  { %v972_v13 = vmul.f32 0.5, %v971_v51 }
 0x292   :  { %v973_v53 = vsub.f32 1.5, %v972_v13 }
 0x294   :  { %v974_v54 = vmul.f32 %v2703_v48, %v973_v53 }
 0x296   :  { %v3792_v56 = vsel %vm977_vm12, %v2703_v48, %v974_v54  ;;  %vm1498_vm12 = vcmask 917248  }
 0x297   :  { %v991_v57 = vmul.f32 %v3792_v56, %v3710_v24  ;;  %v992_v22 = vmul.f32 %v3792_v56, %v3717_v28  ;;  %v993_v59 = vmul.f32 %v3792_v56, %v3724_v34  ;;  %v994_v27 = vmul.f32 %v3792_v56, %v3731_v40 }
 0x298   :  { %v980_v62 = vmul.f32 %v3792_v56, %v3638_v36  ;;  %v979_v63 = vmul.f32 %v3792_v56, %v3634_v35  ;;  %v981_v24 = vmul.f32 %v3792_v56, %v3642_v42  ;;  %v982_v16 = vmul.f32 %v3792_v56, %v3646_v43 }
 0x299   :  { %v1011_v32 = vmul.f32 %v3788_v17, %v991_v57  ;;  %v1012_v1 = vmul.f32 %v3788_v17, %v992_v22  ;;  %v1013_v2 = vmul.f32 %v3788_v17, %v993_v59  ;;  %v1014_v36 = vmul.f32 %v3788_v17, %v994_v27 }
 0x29a   :  { %v1000_v28 = vmul.f32 %v3788_v17, %v980_v62  ;;  %v999_v35 = vmul.f32 %v3788_v17, %v979_v63  ;;  %v1001_v42 = vmul.f32 %v3788_v17, %v981_v24  ;;  %v983_v52 = vmul.f32 %v3792_v56, %v3650_v44 }
 0x29b   :  { %v3831_v39 = vadd.f32 %v3805_v60, %v1011_v32  ;;  %v3834_v3 = vadd.f32 %v3805_v60, %v1012_v1  ;;  %v3837_v7 = vadd.f32 %v3805_v60, %v1013_v2  ;;  %v3842_v34 = vadd.f32 %v3805_v60, %v1014_v36 }
 0x29c   :  { %v3845_v45 = vadd.f32 %v3805_v60, %v1000_v28  ;;  %v3848_v8 = vadd.f32 %v3805_v60, %v999_v35  ;;  %v3851_v15 = vadd.f32 %v3805_v60, %v1001_v42  ;;  %v1002_v25 = vmul.f32 %v3788_v17, %v982_v16 }
 0x29d   :  { %v3856_v40 = vrot.slane %v3831_v39, 1  ;;  %v3859_v49 = vrot.slane %v3834_v3, 1  ;;  %v3866_v21 = vrot.slane %v3837_v7, 1  ;;  %v1431_v46 = vrot.slane %v3842_v34, 1 }
 0x29e   :  { %1117 = vrot.lane.b32.xlu1 %v3845_v45, %s2763_s19  ;;  %1115 = vrot.lane.b32.xlu0 %v3848_v8, %s2763_s19  ;;  %v3880_v43 = vrot.slane %v3845_v45, 1  ;;  %v984_v26 = vmul.f32 %v3792_v56, %v3660_v41  ;;  %v985_v31 = vmul.f32 %v3792_v56, %v3668_v18  ;;  %v3893_v44 = vrot.slane %v3851_v15, 1 }
 0x29f   :  { %1677 = vst.msk [vmem:[#allocation3 + $0xb8] sm:$0x7f] %vm1666_vm13, %v3856_v40  ;;  %1348 = vrot.lane.b32.xlu2 %v3848_v8, %s2769_s4  ;;  %v1003_v61 = vmul.f32 %v3788_v17, %v983_v52  ;;  %v988_v0 = vmul.f32 %v3792_v56, %v3689_v12  ;;  %v986_v30 = vmul.f32 %v3792_v56, %v3675_v11  ;;  %v3990_v57 = vrot.slane %v3845_v45, 7 }
 0x2a0   :  { %1680 = vst.msk [vmem:[#allocation3 + $0xe8] sm:$0x7f] %vm1666_vm13, %v1431_v46  ;;  %v1004_v41 = vmul.f32 %v3788_v17, %v984_v26  ;;  %v1005_v18 = vmul.f32 %v3788_v17, %v985_v31  ;;  %v989_v23 = vmul.f32 %v3792_v56, %v3696_v14  ;;  %v3909_v33 = vadd.f32 %v3805_v60, %v1002_v25  ;;  %v1696_v31 = vld [vmem:[#allocation3 + $0x78] sm:$0xff] }
 0x2a1   :  { %1678 = vst.msk [vmem:[#allocation3 + $0xc8] sm:$0x7f] %vm1666_vm13, %v3859_v49  ;;  %v1008_v12 = vmul.f32 %v3788_v17, %v988_v0  ;;  %v3915_v11 = vadd.f32 %v3805_v60, %v1003_v61  ;;  %v1006_v37 = vmul.f32 %v3788_v17, %v986_v30  ;;  %v990_v38 = vmul.f32 %v3792_v56, %v3703_v19 }
 0x2a2   :  { %1679 = vst.msk [vmem:[#allocation3 + $0xd8] sm:$0x7f] %vm1666_vm13, %v3866_v21  ;;  %v3923_v14 = vadd.f32 %v3805_v60, %v1004_v41  ;;  %v1009_v55 = vmul.f32 %v3788_v17, %v989_v23  ;;  %v3929_v58 = vadd.f32 %v3805_v60, %v1005_v18  ;;  %v3938_v19 = vrot.slane %v3909_v33, 1 }
 0x2a3   :  { %1667 = vst.msk [vmem:[#allocation3 + $0x8] sm:$0x7f] %vm1666_vm13, %v3880_v43  ;;  %v3941_v4 = vadd.f32 %v3805_v60, %v1008_v12  ;;  %v3948_v6 = vrot.slane %v3915_v11, 1  ;;  %v3951_v20 = vadd.f32 %v3805_v60, %v1006_v37  ;;  %v1010_v47 = vmul.f32 %v3788_v17, %v990_v38 }
 0x2a4   :  { %1668 = vst.msk [vmem:[#allocation3 + $0x18] sm:$0x7f] %vm1666_vm13, %v3893_v44  ;;  %v3957_v9 = vrot.slane %v3923_v14, 1  ;;  %v3960_v29 = vadd.f32 %v3805_v60, %v1009_v55  ;;  %v3965_v48 = vrot.slane %v3929_v58, 1  ;;  %v987_v50 = vmul.f32 %v3792_v56, %v3682_v10 }
 0x2a5   :  { %1669 = vst.msk [vmem:[#allocation3 + $0x28] sm:$0x7f] %vm1666_vm13, %v3938_v19  ;;  %v3972_v13 = vrot.slane %v3941_v4, 1  ;;  %v1430_v53 = vrot.slane %v3951_v20, 1  ;;  %v3979_v54 = vadd.f32 %v3805_v60, %v1010_v47  ;;  %v1068_v22 = vrot.slane %v3848_v8, 7 }
 0x2a6   :  { %1352 = vrot.lane.b32.xlu1 %v3851_v15, %s2769_s4  ;;  %1350 = vrot.lane.b32.xlu0 %v3845_v45, %s2769_s4  ;;  %1670 = vst.msk [vmem:[#allocation3 + $0x38] sm:$0x7f] %vm1666_vm13, %v3948_v6  ;;  %v3984_v10 = vrot.slane %v3960_v29, 1  ;;  %v1007_v56 = vmul.f32 %v3788_v17, %v987_v50  ;;  %v4005_v17 = vrot.slane %v3851_v15, 7  ;;  %v4018_v62 = vrot.slane %v3909_v33, 7  ;;  %v1704_v23 = vld [vmem:[#allocation3 + $0xb8] sm:$0xff] }
 0x2a7   :  { %1578 = vrot.lane.b32.xlu2 %v3845_v45, %s2770_s30  ;;  %1671 = vst.msk [vmem:[#allocation3 + $0x48] sm:$0x7f] %vm1666_vm13, %v3957_v9  ;;  %v4010_v59 = vrot.slane %v3979_v54, 1  ;;  %v4024_v24 = vrot.slane %v3915_v11, 7  ;;  %v4035_v32 = vrot.slane %v3929_v58, 7  ;;  %v4047_v2 = vrot.slane %v3941_v4, 7 }
 0x2a8   :  { %1672 = vst.msk [vmem:[#allocation3 + $0x58] sm:$0x7f] %vm1666_vm13, %v3965_v48  ;;  %v4013_v27 = vadd.f32 %v3805_v60, %v1007_v56  ;;  %v4030_v60 = vrot.slane %v3923_v14, 7  ;;  %v4054_v36 = vrot.slane %v3960_v29, 7  ;;  %v4059_v28 = vrot.slane %v3979_v54, 7  ;;  %v1706_v12 = vld [vmem:[#allocation3 + $0xc8] sm:$0xff] }
 0x2a9   :  { %1674 = vst.msk [vmem:[#allocation3 + $0x88] sm:$0x7f] %vm1666_vm13, %v3972_v13  ;;  %v4065_v35 = vrot.slane %v3831_v39, 7  ;;  %v4070_v45 = vrot.slane %v3834_v3, 7  ;;  %v1191_v0 = vrot.slane %v3848_v8, 1  ;;  %v1708_v37 = vld [vmem:[#allocation3 + $0xd8] sm:$0xff] }
 0x2aa   :  { %v1682_v51 = vld [vmem:[#allocation3 + $0x8] sm:$0xff]  ;;  %1673 = vst.msk [vmem:[#allocation3 + $0x68] sm:$0x7f] %vm1666_vm13, %v1430_v53  ;;  %v1075_v1 = vrot.slane %v4013_v27, 7  ;;  %v1281_v50 = vrot.slane %v3951_v20, 7 }
 0x2ab   :  { %2571 = vmatmul.msk.f32.vlgmr.msra.gmra.mxu2 %vm852_vm5, %v1682_v51  ;;  %1675 = vst.msk [vmem:[#allocation3 + $0x98] sm:$0x7f] %vm1666_vm13, %v3984_v10  ;;  %v1684_v63 = vld [vmem:[#allocation3 + $0x18] sm:$0xff] }
 0x2ac   :  { %1099 = vst.msk [vmem:[#allocation3 + $0x20] sm:$0xfe] %vm1097_vm14, %v3990_v57  ;;  %v1686_v42 = vld [vmem:[#allocation3 + $0x28] sm:$0xff] }
 0x2ad   :  { %1098 = vst.msk [vmem:[#allocation3 + $0x10] sm:$0xfe] %vm1097_vm14, %v1068_v22  ;;  %v1688_v16 = vld [vmem:[#allocation3 + $0x38] sm:$0xff] }
 0x2ae   :  { %1582 = vrot.lane.b32.xlu1 %v3909_v33, %s2770_s30  ;;  %1580 = vrot.lane.b32.xlu0 %v3851_v15, %s2770_s30  ;;  %1100 = vst.msk [vmem:[#allocation3 + $0x30] sm:$0xfe] %vm1097_vm14, %v4005_v17  ;;  %v1690_v52 = vld [vmem:[#allocation3 + $0x48] sm:$0xff] }
 0x2af   :  { %1119 = vrot.lane.b32.xlu2 %v3851_v15, %s2763_s19  ;;  %1676 = vst.msk [vmem:[#allocation3 + $0xa8] sm:$0x7f] %vm1666_vm13, %v4010_v59  ;;  %v4076_v15 = vrot.slane %v3837_v7, 7  ;;  %v1692_v25 = vld [vmem:[#allocation3 + $0x58] sm:$0xff] }
 0x2b0   :  { %1101 = vst.msk [vmem:[#allocation3 + $0x40] sm:$0xfe] %vm1097_vm14, %v4018_v62  ;;  %v1698_v61 = vld [vmem:[#allocation3 + $0x88] sm:$0xff] }
 0x2b1   :  { %1102 = vst.msk [vmem:[#allocation3 + $0x50] sm:$0xfe] %vm1097_vm14, %v4024_v24  ;;  %v1694_v26 = vld [vmem:[#allocation3 + $0x68] sm:$0xff] }
 0x2b2   :  { %1103 = vst.msk [vmem:[#allocation3 + $0x60] sm:$0xfe] %vm1097_vm14, %v4030_v60  ;;  %v1700_v30 = vld [vmem:[#allocation3 + $0x98] sm:$0xff] }
 0x2b3   :  { %2572 = vmatmul.msk.f32.gmra.mxu2 %vm852_vm5, %v1684_v63  ;;  %1104 = vst.msk [vmem:[#allocation3 + $0x70] sm:$0xfe] %vm1097_vm14, %v4035_v32 }
 0x2b4   :  { %1105 = vst.msk [vmem:[#allocation3 + $0x90] sm:$0xfe] %vm1097_vm14, %v1075_v1 }
 0x2b5   :  { %1106 = vst.msk [vmem:[#allocation3 + $0xa0] sm:$0xfe] %vm1097_vm14, %v4047_v2 }
 0x2b6   :  { %1123 = vrot.lane.b32.xlu1 %v3915_v11, %s2763_s19  ;;  %1121 = vrot.lane.b32.xlu0 %v3909_v33, %s2763_s19  ;;  %1107 = vst.msk [vmem:[#allocation3 + $0xb0] sm:$0xfe] %vm1097_vm14, %v4054_v36  ;;  %v1702_v41 = vld [vmem:[#allocation3 + $0xa8] sm:$0xff] }
 0x2b7   :  { %1354 = vrot.lane.b32.xlu2 %v3909_v33, %s2769_s4  ;;  %1108 = vst.msk [vmem:[#allocation3 + $0xc0] sm:$0xfe] %vm1097_vm14, %v4059_v28 }
 0x2b8   :  { %1109 = vst.msk [vmem:[#allocation3 + $0xd0] sm:$0xfe] %vm1097_vm14, %v4065_v35 }
 0x2b9   :  { %1110 = vst.msk [vmem:[#allocation3 + $0xe0] sm:$0xfe] %vm1097_vm14, %v4070_v45 }
 0x2ba   :  { %1111 = vst.msk [vmem:[#allocation3 + $0xf0] sm:$0xfe] %vm1097_vm14, %v4076_v15 }
 0x2bb   :  { %2573 = vmatmul.msk.f32.gmra.mxu2 %vm852_vm5, %v1686_v42 }
 0x2be   :  { %1358 = vrot.lane.b32.xlu1 %v3923_v14, %s2769_s4  ;;  %1356 = vrot.lane.b32.xlu0 %v3915_v11, %s2769_s4 }
 0x2bf   :  { %1584 = vrot.lane.b32.xlu2 %v3915_v11, %s2770_s30 }
 0x2c3   :  { %2574 = vmatmul.msk.f32.gmra.mxu2 %vm852_vm5, %v1688_v16 }
 0x2c6   :  { %1588 = vrot.lane.b32.xlu1 %v3929_v58, %s2770_s30  ;;  %1586 = vrot.lane.b32.xlu0 %v3923_v14, %s2770_s30 }
 0x2c7   :  { %1125 = vrot.lane.b32.xlu2 %v3923_v14, %s2763_s19 }
 0x2cb   :  { %2575 = vmatmul.msk.f32.gmra.mxu2 %vm852_vm5, %v1690_v52  ;;  %v1721_v52 = vld [vmem:[%s4774_s5 + $0x40] sm:$0xff] }
 0x2ce   :  { %1129 = vrot.lane.b32.xlu1 %v4013_v27, %s2763_s19  ;;  %1127 = vrot.lane.b32.xlu0 %v3929_v58, %s2763_s19 }
 0x2cf   :  { %1360 = vrot.lane.b32.xlu2 %v3929_v58, %s2769_s4  ;;  %v1710_v58 = vld [vmem:[#allocation3 + $0xe8] sm:$0xff] }
 0x2d3   :  { %2576 = vmatmul.msk.f32.gmra.mxu2 %vm852_vm5, %v1692_v25  ;;  %v1720_v25 = vld [vmem:[%s4774_s5 + $0x38] sm:$0xff] }
 0x2d6   :  { %1366 = vrot.lane.b32.xlu1 %v3941_v4, %s2769_s4  ;;  %1362 = vrot.lane.b32.xlu0 %v3951_v20, %s2769_s4 }
 0x2d7   :  { %1590 = vrot.lane.b32.xlu2 %v3951_v20, %s2770_s30  ;;  %v1718_v20 = vld [vmem:[%s4774_s5 + $0x28] sm:$0xff] }
 0x2db   :  { %2577 = vmatmul.msk.f32.gmra.mxu2 %vm852_vm5, %v1694_v26 }
 0x2de   :  { %1594 = vrot.lane.b32.xlu1 %v3960_v29, %s2770_s30  ;;  %1364 = vrot.lane.b32.xlu0 %v4013_v27, %s2769_s4 }
 0x2df   :  { %1131 = vrot.lane.b32.xlu2 %v3941_v4, %s2763_s19 }
 0x2e3   :  { %2578 = vmatmul.msk.f32.gmra.mxu2 %vm852_vm5, %v1696_v31 }
 0x2e6   :  { %1592 = vrot.lane.b32.xlu0 %v3941_v4, %s2770_s30  ;;  %1283 = vrot.lane.b32.xlu1 %v1068_v22, %s2771_s9 }
 0x2e7   :  { %1285 = vrot.lane.b32.xlu2 %v3990_v57, %s2771_s9 }
 0x2eb   :  { %2579 = vmatmul.msk.f32.gmra.mxu2 %vm852_vm5, %v1698_v61  ;;  %v1717_v61 = vld [vmem:[%s4774_s5 + $0x20] sm:$0xff] }
 0x2ee   :  { %1432 = vrot.lane.b32.xlu0 %v1191_v0, %s2772_s10  ;;  %1518 = vrot.lane.b32.xlu1 %v3990_v57, %s2773_s11  ;;  %v1727_v57 = vld [vmem:[%s4774_s5 + $0x70] sm:$0xff] }
 0x2ef   :  { %1520 = vrot.lane.b32.xlu2 %v4005_v17, %s2773_s11 }
 0x2f3   :  { %2580 = vmatmul.msk.f32.gmra.mxu2 %vm852_vm5, %v1700_v30  ;;  %v1715_v30 = vld [vmem:[%s4774_s5 + $0x10] sm:$0xff] }
 0x2f6   :  { %1287 = vrot.lane.b32.xlu0 %v4005_v17, %s2771_s9  ;;  %1205 = vrot.lane.b32.xlu1 %v1191_v0, %s2764_s20  ;;  %v1716_v0 = vld [vmem:[%s4774_s5 + $0x18] sm:$0xff] }
 0x2f7   :  { %1207 = vrot.lane.b32.xlu2 %v3880_v43, %s2764_s20 }
 0x2f9   :  { %v4145_v8 = vpop.permute.xlu2 %1348 }
 0x2fb   :  { %2581 = vmatmul.msk.f32.gmra.mxu2 %vm852_vm5, %v1702_v41 }
 0x2fe   :  { %1522 = vrot.lane.b32.xlu0 %v4018_v62, %s2773_s11  ;;  %1434 = vrot.lane.b32.xlu1 %v3880_v43, %s2772_s10 }
 0x2ff   :  { %1436 = vrot.lane.b32.xlu2 %v3893_v44, %s2772_s10 }
 0x301   :  { %v4154_v18 = vpop.permute.xlu2 %1578 }
 0x303   :  { %2582 = vmatmul.msk.f32.gmra.mxu2 %vm852_vm5, %v1704_v23 }
 0x306   :  { %1209 = vrot.lane.b32.xlu0 %v3893_v44, %s2764_s20  ;;  %1289 = vrot.lane.b32.xlu1 %v4018_v62, %s2771_s9  ;;  %v1726_v62 = vld [vmem:[%s4774_s5 + $0x68] sm:$0xff] }
 0x307   :  { %1291 = vrot.lane.b32.xlu2 %v4024_v24, %s2771_s9 }
 0x309   :  { %v1120_v33 = vpop.permute.xlu2 %1119 }
 0x30a   :  { %1159 = vst.msk [vmem:[#allocation3 + $0x30] sm:$0xff] %vm1112_vm15, %v1120_v33  ;;  %v1714_v33 = vld [vmem:[%s4774_s5 + $0x8] sm:$0xff] }
 0x30b   :  { %2583 = vmatmul.msk.f32.gmra.mxu2 %vm852_vm5, %v1706_v12  ;;  %1178 = vst.msk [vmem:[#allocation3 + $0x37] sm:$0x1] %vm1174_vm0, %v2767_v5 }
 0x30e   :  { %1438 = vrot.lane.b32.xlu0 %v3938_v19, %s2772_s10  ;;  %1524 = vrot.lane.b32.xlu1 %v4024_v24, %s2773_s11  ;;  %v1725_v24 = vld [vmem:[%s4774_s5 + $0x60] sm:$0xff] }
 0x30f   :  { %1526 = vrot.lane.b32.xlu2 %v4030_v60, %s2773_s11 }
 0x310   :  { %v1118_v43 = vpop.permute.xlu1 %1117  ;;  %v1116_v44 = vpop.permute.xlu0 %1115 }
 0x311   :  { %1158 = vst.msk [vmem:[#allocation3 + $0x20] sm:$0xff] %vm1112_vm15, %v1118_v43  ;;  %v4174_v11 = vpop.permute.xlu2 %1354 }
 0x312   :  { %1177 = vst.msk [vmem:[#allocation3 + $0x27] sm:$0x1] %vm1174_vm0, %v2767_v5 }
 0x313   :  { %2584 = vmatmul.msk.f32.gmra.mxu2 %vm852_vm5, %v1708_v37  ;;  %1157 = vst.msk [vmem:[#allocation3 + $0x10] sm:$0xff] %vm1112_vm15, %v1116_v44  ;;  %v1713_v37 = vld [vmem:[%s4774_s5] sm:$0xff] }
 0x314   :  { %1176 = vst.msk [vmem:[#allocation3 + $0x17] sm:$0x1] %vm1174_vm0, %v2767_v5 }
 0x316   :  { %1293 = vrot.lane.b32.xlu0 %v4030_v60, %s2771_s9  ;;  %1211 = vrot.lane.b32.xlu1 %v3938_v19, %s2764_s20  ;;  %v1724_v60 = vld [vmem:[%s4774_s5 + $0x58] sm:$0xff] }
 0x317   :  { %1213 = vrot.lane.b32.xlu2 %v3948_v6, %s2764_s20 }
 0x318   :  { %v4188_v38 = vpop.permute.xlu1 %1352  ;;  %v4190_v14 = vpop.permute.xlu0 %1350 }
 0x319   :  { %v4192_v55 = vpop.permute.xlu2 %1584 }
 0x31b   :  { %2585 = vmatmul.msk.f32.gmra.mxu2 %vm852_vm5, %v1710_v58 }
 0x31e   :  { %1528 = vrot.lane.b32.xlu0 %v4035_v32, %s2773_s11  ;;  %1440 = vrot.lane.b32.xlu1 %v3948_v6, %s2772_s10 }
 0x31f   :  { %1442 = vrot.lane.b32.xlu2 %v3957_v9, %s2772_s10 }
 0x320   :  { %v4201_v19 = vpop.permute.xlu1 %1582  ;;  %v4203_v4 = vpop.permute.xlu0 %1580 }
 0x321   :  { %v1126_v47 = vpop.permute.xlu2 %1125 }
 0x322   :  { %1162 = vst.msk [vmem:[#allocation3 + $0x60] sm:$0xff] %vm1112_vm15, %v1126_v47 }
 0x323   :  { %1181 = vst.msk [vmem:[#allocation3 + $0x67] sm:$0x1] %vm1174_vm0, %v2767_v5 }
 0x326   :  { %1215 = vrot.lane.b32.xlu0 %v3957_v9, %s2764_s20  ;;  %1295 = vrot.lane.b32.xlu1 %v4035_v32, %s2771_s9  ;;  %v1728_v9 = vld [vmem:[%s4774_s5 + $0x78] sm:$0xff]  ;;  %v1723_v32 = vld [vmem:[%s4774_s5 + $0x50] sm:$0xff] }
 0x327   :  { %1297 = vrot.lane.b32.xlu2 %v1281_v50, %s2771_s9  ;;  %1783 = vmatpush.msra.mxu1 %v1728_v9 }
 0x328   :  { %v1124_v6 = vpop.permute.xlu1 %1123  ;;  %v1122_v51 = vpop.permute.xlu0 %1121 }
 0x329   :  { %1161 = vst.msk [vmem:[#allocation3 + $0x50] sm:$0xff] %vm1112_vm15, %v1124_v6  ;;  %v4215_v56 = vpop.permute.xlu2 %1360  ;;  %1784 = vmatpush.msra.mxu1 %v1727_v57 }
 0x32a   :  { %1180 = vst.msk [vmem:[#allocation3 + $0x57] sm:$0x1] %vm1174_vm0, %v2767_v5 }
 0x32b   :  { %1160 = vst.msk [vmem:[#allocation3 + $0x40] sm:$0xff] %vm1112_vm15, %v1122_v51  ;;  %1785 = vmatpush.msra.mxu1 %v1726_v62 }
 0x32c   :  { %1179 = vst.msk [vmem:[#allocation3 + $0x47] sm:$0x1] %vm1174_vm0, %v2767_v5 }
 0x32d   :  { %1786 = vmatpush.msra.mxu1 %v1725_v24 }
 0x32e   :  { %1444 = vrot.lane.b32.xlu0 %v3965_v48, %s2772_s10  ;;  %1530 = vrot.lane.b32.xlu1 %v1281_v50, %s2773_s11 }
 0x32f   :  { %1299 = vrot.lane.b32.xlu2 %v1075_v1, %s2771_s9  ;;  %1787 = vmatpush.msra.mxu1 %v1724_v60 }
 0x330   :  { %v4234_v22 = vpop.permute.xlu1 %1358  ;;  %v4236_v17 = vpop.permute.xlu0 %1356 }
 0x331   :  { %v4241_v63 = vpop.permute.xlu2 %1590  ;;  %1788 = vmatpush.msra.mxu1 %v1723_v32 }
 0x336   :  { %1301 = vrot.lane.b32.xlu0 %v4047_v2, %s2771_s9  ;;  %1217 = vrot.lane.b32.xlu1 %v3965_v48, %s2764_s20  ;;  %v1722_v48 = vld [vmem:[%s4774_s5 + $0x48] sm:$0xff] }
 0x337   :  { %1532 = vrot.lane.b32.xlu2 %v4047_v2, %s2773_s11  ;;  %1789 = vmatpush.msra.mxu1 %v1722_v48  ;;  %v1198_v2 = vrot.slane %v4013_v27, 1  ;;  %v1719_v27 = vld [vmem:[%s4774_s5 + $0x30] sm:$0xff] }
 0x338   :  { %v4258_v1 = vpop.permute.xlu1 %1588  ;;  %v4260_v42 = vpop.permute.xlu0 %1586 }
 0x339   :  { %v1132_v16 = vpop.permute.xlu2 %1131  ;;  %1790 = vmatpush.msra.mxu1 %v1721_v52 }
 0x33a   :  { %1165 = vst.msk [vmem:[#allocation3 + $0xa0] sm:$0xff] %vm1112_vm15, %v1132_v16 }
 0x33b   :  { %1185 = vst.msk [vmem:[#allocation3 + $0xa7] sm:$0x1] %vm1174_vm0, %v2767_v5  ;;  %1791 = vmatpush.msra.mxu1 %v1720_v25 }
 0x33d   :  { %1792 = vmatpush.msra.mxu1 %v1719_v27 }
 0x33e   :  { %1534 = vrot.lane.b32.xlu0 %v4054_v36, %s2773_s11  ;;  %1446 = vrot.lane.b32.xlu1 %v1430_v53, %s2772_s10 }
 0x33f   :  { %1219 = vrot.lane.b32.xlu2 %v1198_v2, %s2764_s20  ;;  %1793 = vmatpush.msra.mxu1 %v1718_v20 }
 0x340   :  { %v1130_v26 = vpop.permute.xlu1 %1129  ;;  %v1128_v31 = vpop.permute.xlu0 %1127 }
 0x341   :  { %1164 = vst.msk [vmem:[#allocation3 + $0x90] sm:$0xff] %vm1112_vm15, %v1130_v26  ;;  %v4296_v53 = vpop.permute.xlu2 %1285  ;;  %1794 = vmatpush.msra.mxu1 %v1717_v61 }
 0x342   :  { %1184 = vst.msk [vmem:[#allocation3 + $0x97] sm:$0x1] %vm1174_vm0, %v2767_v5 }
 0x343   :  { %1163 = vst.msk [vmem:[#allocation3 + $0x70] sm:$0xff] %vm1112_vm15, %v1128_v31  ;;  %1795 = vmatpush.msra.mxu1 %v1716_v0 }
 0x344   :  { %1182 = vst.msk [vmem:[#allocation3 + $0x77] sm:$0x1] %vm1174_vm0, %v2767_v5 }
 0x345   :  { %1796 = vmatpush.msra.mxu1 %v1715_v30 }
 0x346   :  { %1221 = vrot.lane.b32.xlu0 %v3972_v13, %s2764_s20  ;;  %1448 = vrot.lane.b32.xlu1 %v1198_v2, %s2772_s10 }
 0x347   :  { %1450 = vrot.lane.b32.xlu2 %v3972_v13, %s2772_s10  ;;  %1797 = vmatpush.msra.mxu1 %v1714_v33 }
 0x348   :  { %v4319_v41 = vpop.permute.xlu1 %1366  ;;  %v4321_v23 = vpop.permute.xlu0 %1362 }
 0x349   :  { %v4326_v12 = vpop.permute.xlu2 %1520  ;;  %1798 = vmatpush.msra.mxu1 %v1713_v37 }
 0x34e   :  { %1452 = vrot.lane.b32.xlu0 %v3984_v10, %s2772_s10  ;;  %1303 = vrot.lane.b32.xlu1 %v4054_v36, %s2771_s9 }
 0x34f   :  { %1368 = vrot.lane.b32.xlu2 %v3960_v29, %s2769_s4 }
 0x350   :  { %v4334_v13 = vpop.permute.xlu1 %1594  ;;  %v4336_v43 = vpop.permute.xlu0 %1364 }
 0x351   :  { %v1208_v44 = vpop.permute.xlu2 %1207 }
 0x352   :  { %1249 = vst.msk [vmem:[#allocation3 + $0x20] sm:$0x7f] %vm1247_vm2, %v1208_v44 }
 0x353   :  { %1265 = vst.msk [vmem:[#allocation3 + $0x20] sm:$0x1] %vm1262_vm3, %v2767_v5 }
 0x356   :  { %1133 = vrot.lane.b32.xlu0 %v3960_v29, %s2763_s19  ;;  %1536 = vrot.lane.b32.xlu1 %v4059_v28, %s2773_s11 }
 0x357   :  { %1596 = vrot.lane.b32.xlu2 %v3979_v54, %s2770_s30 }
 0x358   :  { %v4350_v36 = vpop.permute.xlu0 %1592  ;;  %v1284_v58 = vpop.permute.xlu1 %1283 }
 0x359   :  { %v1437_v47 = vpop.permute.xlu2 %1436  ;;  %1332 = vst.msk [vmem:[#allocation3] sm:$0xfe] %vm1331_vm7, %v1284_v58 }
 0x35a   :  { %1397 = vst.msk [vmem:[#allocation3] sm:$0xff] %vm1396_vm4, %v4145_v8 }
 0x35b   :  { %1414 = vst.msk [vmem:[#allocation3 + $0x7] sm:$0x1] %vm1413_vm6, %v2767_v5 }
 0x35e   :  { %1370 = vrot.lane.b32.xlu0 %v3979_v54, %s2769_s4  ;;  %1223 = vrot.lane.b32.xlu1 %v3984_v10, %s2764_s20 }
 0x35f   :  { %1305 = vrot.lane.b32.xlu2 %v4059_v28, %s2771_s9 }
 0x360   :  { %v1433_v29 = vpop.permute.xlu0 %1432  ;;  %v1519_v50 = vpop.permute.xlu1 %1518 }
 0x361   :  { %v4363_v6 = vpop.permute.xlu2 %1291  ;;  %1481 = vst.msk [vmem:[#allocation3] sm:$0x7f] %vm1480_vm8, %v1433_v29  ;;  %v4602_v29 = vld [vmem:[%s4775_s6] ss:$0 sm:$0xff]  ;;  %s2774_s6 = smov [#allocation7]  }
 0x362   :  { %1502 = vst.msk [vmem:[#allocation3] sm:$0x1] %vm1501_vm9, %v2767_v5 }
 0x363   :  { %1561 = vst.msk [vmem:[#allocation3] sm:$0xfe] %vm1560_vm10, %v1519_v50 }
 0x364   :  { %1620 = vst.msk [vmem:[#allocation3] sm:$0xff] %vm1575_vm11, %v4154_v18 }
 0x366   :  { %1598 = vrot.lane.b32.xlu0 %v3831_v39, %s2770_s30  ;;  %1454 = vrot.lane.b32.xlu1 %v4010_v59, %s2772_s10 }
 0x367   :  { %1538 = vrot.lane.b32.xlu2 %v4065_v35, %s2773_s11 }
 0x368   :  { %v1288_v10 = vpop.permute.xlu0 %1287  ;;  %v1206_v28 = vpop.permute.xlu1 %1205 }
 0x369   :  { %v4377_v8 = vpop.permute.xlu2 %1526  ;;  %1334 = vst.msk [vmem:[#allocation3 + $0x20] sm:$0xfe] %vm1331_vm7, %v1288_v10 }
 0x36a   :  { %1399 = vst.msk [vmem:[#allocation3 + $0x20] sm:$0xff] %vm1396_vm4, %v4188_v38 }
 0x36b   :  { %1416 = vst.msk [vmem:[#allocation3 + $0x27] sm:$0x1] %vm1413_vm6, %v2767_v5  ;;  %v1681_v18 = vld [vmem:[#allocation3] sm:$0xff] }
 0x36c   :  { %1483 = vst.msk [vmem:[#allocation3 + $0x20] sm:$0x7f] %vm1480_vm8, %v1437_v47  ;;  %1799 = vmatmul.f32.vlgmr.msra.gmra.mxu1 %v1681_v18 }
 0x36d   :  { %1248 = vst.msk [vmem:[#allocation3 + $0x10] sm:$0x7f] %vm1247_vm2, %v1206_v28 }
 0x36e   :  { %1264 = vst.msk [vmem:[#allocation3 + $0x10] sm:$0x1] %vm1262_vm3, %v2767_v5  ;;  %1307 = vrot.lane.b32.xlu0 %v4065_v35, %s2771_s9  ;;  %1135 = vrot.lane.b32.xlu1 %v3979_v54, %s2763_s19 }
 0x36f   :  { %1333 = vst.msk [vmem:[#allocation3 + $0x10] sm:$0xfe] %vm1331_vm7, %v4296_v53  ;;  %1225 = vrot.lane.b32.xlu2 %v4010_v59, %s2764_s20 }
 0x370   :  { %1398 = vst.msk [vmem:[#allocation3 + $0x10] sm:$0xff] %vm1396_vm4, %v4190_v14  ;;  %v1523_v38 = vpop.permute.xlu0 %1522  ;;  %v1435_v51 = vpop.permute.xlu1 %1434 }
 0x371   :  { %1504 = vst.msk [vmem:[#allocation3 + $0x20] sm:$0x1] %vm1501_vm9, %v2767_v5  ;;  %v1214_v9 = vpop.permute.xlu2 %1213 }
 0x372   :  { %1415 = vst.msk [vmem:[#allocation3 + $0x17] sm:$0x1] %vm1413_vm6, %v2767_v5 }
 0x373   :  { %1252 = vst.msk [vmem:[#allocation3 + $0x50] sm:$0x7f] %vm1247_vm2, %v1214_v9 }
 0x374   :  { %1268 = vst.msk [vmem:[#allocation3 + $0x50] sm:$0x1] %vm1262_vm3, %v2767_v5 }
 0x375   :  { %1563 = vst.msk [vmem:[#allocation3 + $0x20] sm:$0xfe] %vm1560_vm10, %v1523_v38 }
 0x376   :  { %1622 = vst.msk [vmem:[#allocation3 + $0x20] sm:$0xff] %vm1575_vm11, %v4201_v19  ;;  %1540 = vrot.lane.b32.xlu0 %v4070_v45, %s2773_s11  ;;  %1372 = vrot.lane.b32.xlu1 %v3831_v39, %s2769_s4 }
 0x377   :  { %1482 = vst.msk [vmem:[#allocation3 + $0x10] sm:$0x7f] %vm1480_vm8, %v1435_v51  ;;  %1456 = vrot.lane.b32.xlu2 %v3856_v40, %s2772_s10 }
 0x378   :  { %1503 = vst.msk [vmem:[#allocation3 + $0x10] sm:$0x1] %vm1501_vm9, %v2767_v5  ;;  %v1210_v54 = vpop.permute.xlu0 %1209  ;;  %v1290_v59 = vpop.permute.xlu1 %1289 }
 0x379   :  { %1562 = vst.msk [vmem:[#allocation3 + $0x10] sm:$0xfe] %vm1560_vm10, %v4326_v12  ;;  %v1443_v35 = vpop.permute.xlu2 %1442 }
 0x37a   :  { %1621 = vst.msk [vmem:[#allocation3 + $0x10] sm:$0xff] %vm1575_vm11, %v4203_v4 }
 0x37b   :  { %1250 = vst.msk [vmem:[#allocation3 + $0x30] sm:$0x7f] %vm1247_vm2, %v1210_v54 }
 0x37c   :  { %1266 = vst.msk [vmem:[#allocation3 + $0x30] sm:$0x1] %vm1262_vm3, %v2767_v5 }
 0x37d   :  { %1335 = vst.msk [vmem:[#allocation3 + $0x30] sm:$0xfe] %vm1331_vm7, %v1290_v59 }
 0x37e   :  { %1400 = vst.msk [vmem:[#allocation3 + $0x30] sm:$0xff] %vm1396_vm4, %v4174_v11  ;;  %1227 = vrot.lane.b32.xlu0 %v3856_v40, %s2764_s20  ;;  %1600 = vrot.lane.b32.xlu1 %v3834_v3, %s2770_s30  ;;  %v1685_v11 = vld [vmem:[#allocation3 + $0x20] sm:$0xff] }
 0x37f   :  { %1417 = vst.msk [vmem:[#allocation3 + $0x37] sm:$0x1] %vm1413_vm6, %v2767_v5  ;;  %1137 = vrot.lane.b32.xlu2 %v3831_v39, %s2763_s19 }
 0x380   :  { %v1439_v14 = vpop.permute.xlu0 %1438  ;;  %v1525_v19 = vpop.permute.xlu1 %1524 }
 0x381   :  { %v1683_v4 = vld [vmem:[#allocation3 + $0x10] sm:$0xff]  ;;  %v4435_v57 = vpop.permute.xlu2 %1297  ;;  %1484 = vst.msk [vmem:[#allocation3 + $0x30] sm:$0x7f] %vm1480_vm8, %v1439_v14 }
 0x382   :  { %1802 = vmatmul.f32.gmra.mxu1 %v1683_v4  ;;  %1505 = vst.msk [vmem:[#allocation3 + $0x30] sm:$0x1] %vm1501_vm9, %v2767_v5 }
 0x383   :  { %1564 = vst.msk [vmem:[#allocation3 + $0x30] sm:$0xfe] %vm1560_vm10, %v1525_v19 }
 0x384   :  { %1623 = vst.msk [vmem:[#allocation3 + $0x30] sm:$0xff] %vm1575_vm11, %v4192_v55 }
 0x386   :  { %1458 = vrot.lane.b32.xlu0 %v3859_v49, %s2772_s10  ;;  %1309 = vrot.lane.b32.xlu1 %v4070_v45, %s2771_s9 }
 0x387   :  { %1374 = vrot.lane.b32.xlu2 %v3834_v3, %s2769_s4 }
 0x388   :  { %v1294_v39 = vpop.permute.xlu0 %1293  ;;  %v1212_v40 = vpop.permute.xlu1 %1211 }
 0x389   :  { %v1300_v62 = vpop.permute.xlu2 %1299  ;;  %1337 = vst.msk [vmem:[#allocation3 + $0x50] sm:$0xfe] %vm1331_vm7, %v1294_v39 }
 0x38a   :  { %1805 = vmatmul.f32.gmra.mxu1 %v1685_v11  ;;  %1340 = vst.msk [vmem:[#allocation3 + $0x80] sm:$0xfe] %vm1331_vm7, %v1300_v62 }
 0x38b   :  { %1405 = vst.msk [vmem:[#allocation3 + $0x80] sm:$0xff] %vm1396_vm4, %v4336_v43  ;;  %v1687_v45 = vld [vmem:[#allocation3 + $0x30] sm:$0xff] }
 0x38c   :  { %1402 = vst.msk [vmem:[#allocation3 + $0x50] sm:$0xff] %vm1396_vm4, %v4234_v22 }
 0x38d   :  { %1419 = vst.msk [vmem:[#allocation3 + $0x57] sm:$0x1] %vm1413_vm6, %v2767_v5 }
 0x38e   :  { %1422 = vst.msk [vmem:[#allocation3 + $0x87] sm:$0x1] %vm1413_vm6, %v2767_v5  ;;  %1139 = vrot.lane.b32.xlu0 %v3834_v3, %s2763_s19  ;;  %1542 = vrot.lane.b32.xlu1 %v4076_v15, %s2773_s11 }
 0x38f   :  { %1486 = vst.msk [vmem:[#allocation3 + $0x50] sm:$0x7f] %vm1480_vm8, %v1443_v35  ;;  %1602 = vrot.lane.b32.xlu2 %v3837_v7, %s2770_s30 }
 0x390   :  { %1251 = vst.msk [vmem:[#allocation3 + $0x40] sm:$0x7f] %vm1247_vm2, %v1212_v40  ;;  %v1529_v55 = vpop.permute.xlu0 %1528  ;;  %v1441_v22 = vpop.permute.xlu1 %1440 }
 0x391   :  { %1267 = vst.msk [vmem:[#allocation3 + $0x40] sm:$0x1] %vm1262_vm3, %v2767_v5  ;;  %v4469_v24 = vpop.permute.xlu2 %1532 }
 0x392   :  { %1336 = vst.msk [vmem:[#allocation3 + $0x40] sm:$0xfe] %vm1331_vm7, %v4363_v6  ;;  %1808 = vmatmul.f32.gmra.mxu1 %v1687_v45 }
 0x393   :  { %1401 = vst.msk [vmem:[#allocation3 + $0x40] sm:$0xff] %vm1396_vm4, %v4236_v17 }
 0x394   :  { %1507 = vst.msk [vmem:[#allocation3 + $0x50] sm:$0x1] %vm1501_vm9, %v2767_v5 }
 0x395   :  { %1418 = vst.msk [vmem:[#allocation3 + $0x47] sm:$0x1] %vm1413_vm6, %v2767_v5 }
 0x396   :  { %1566 = vst.msk [vmem:[#allocation3 + $0x50] sm:$0xfe] %vm1560_vm10, %v1529_v55  ;;  %1376 = vrot.lane.b32.xlu0 %v3837_v7, %s2769_s4  ;;  %1229 = vrot.lane.b32.xlu1 %v3859_v49, %s2764_s20  ;;  %v1282_v49 = vrot.slane %v3842_v34, 7 }
 0x397   :  { %1625 = vst.msk [vmem:[#allocation3 + $0x50] sm:$0xff] %vm1575_vm11, %v4258_v1  ;;  %1311 = vrot.lane.b32.xlu2 %v4076_v15, %s2771_s9 }
 0x398   :  { %1485 = vst.msk [vmem:[#allocation3 + $0x40] sm:$0x7f] %vm1480_vm8, %v1441_v22  ;;  %v1216_v3 = vpop.permute.xlu0 %1215  ;;  %v1296_v17 = vpop.permute.xlu1 %1295 }
 0x399   :  { %1506 = vst.msk [vmem:[#allocation3 + $0x40] sm:$0x1] %vm1501_vm9, %v2767_v5  ;;  %v1220_v60 = vpop.permute.xlu2 %1219 }
 0x39a   :  { %1565 = vst.msk [vmem:[#allocation3 + $0x40] sm:$0xfe] %vm1560_vm10, %v4377_v8  ;;  %v1865_v8 = vpop.f32.mrf.mxu2 }
 0x39b   :  { %1624 = vst.msk [vmem:[#allocation3 + $0x40] sm:$0xff] %vm1575_vm11, %v4260_v42 }
 0x39c   :  { %1255 = vst.msk [vmem:[#allocation3 + $0x90] sm:$0x7f] %vm1247_vm2, %v1220_v60 }
 0x39d   :  { %1272 = vst.msk [vmem:[#allocation3 + $0x90] sm:$0x1] %vm1262_vm3, %v2767_v5 }
 0x39e   :  { %1253 = vst.msk [vmem:[#allocation3 + $0x60] sm:$0x7f] %vm1247_vm2, %v1216_v3  ;;  %1604 = vrot.lane.b32.xlu0 %v3842_v34, %s2770_s30  ;;  %1460 = vrot.lane.b32.xlu1 %v3866_v21, %s2772_s10  ;;  %v1691_v52 = vld [vmem:[#allocation3 + $0x50] sm:$0xff] }
 0x39f   :  { %1269 = vst.msk [vmem:[#allocation3 + $0x60] sm:$0x1] %vm1262_vm3, %v2767_v5  ;;  %1544 = vrot.lane.b32.xlu2 %v1282_v49, %s2773_s11 }
 0x3a0   :  { %1338 = vst.msk [vmem:[#allocation3 + $0x60] sm:$0xfe] %vm1331_vm7, %v1296_v17  ;;  %v1445_v15 = vpop.permute.xlu0 %1444  ;;  %v1531_v32 = vpop.permute.xlu1 %1530 }
 0x3a1   :  { %1403 = vst.msk [vmem:[#allocation3 + $0x60] sm:$0xff] %vm1396_vm4, %v4215_v56  ;;  %v1451_v1 = vpop.permute.xlu2 %1450 }
 0x3a2   :  { %v1689_v42 = vld [vmem:[#allocation3 + $0x40] sm:$0xff]  ;;  %1420 = vst.msk [vmem:[#allocation3 + $0x67] sm:$0x1] %vm1413_vm6, %v2767_v5  ;;  %v1868_v19 = vpop.f32.mrf.mxu2 }
 0x3a3   :  { %1811 = vmatmul.f32.gmra.mxu1 %v1689_v42  ;;  %1487 = vst.msk [vmem:[#allocation3 + $0x60] sm:$0x7f] %vm1480_vm8, %v1445_v15 }
 0x3a4   :  { %1508 = vst.msk [vmem:[#allocation3 + $0x60] sm:$0x1] %vm1501_vm9, %v2767_v5 }
 0x3a5   :  { %1567 = vst.msk [vmem:[#allocation3 + $0x60] sm:$0xfe] %vm1560_vm10, %v1531_v32 }
 0x3a6   :  { %1626 = vst.msk [vmem:[#allocation3 + $0x60] sm:$0xff] %vm1575_vm11, %v4241_v63  ;;  %1313 = vrot.lane.b32.xlu0 %v1282_v49, %s2771_s9  ;;  %1141 = vrot.lane.b32.xlu1 %v3837_v7, %s2763_s19  ;;  %s2544_s9 = sshll.u32 %s4777_s8, 4  ;;  %s2545_s9 = int_to_ptr.hbm [resolvable:$true] %s2544_s9 }
 0x3a7   :  { %1231 = vrot.lane.b32.xlu2 %v3866_v21, %s2764_s20  ;;  %s2542_s20 = sshll.u32 %s2774_s6, 4  ;;  %s2543_s20 = int_to_ptr.vmem [resolvable:$true] %s2542_s20 }
 0x3a8   :  { %v1302_v56 = vpop.permute.xlu0 %1301  ;;  %v1218_v48 = vpop.permute.xlu1 %1217 }
 0x3a9   :  { %v1369_v16 = vpop.permute.xlu2 %1368  ;;  %1341 = vst.msk [vmem:[#allocation3 + $0x90] sm:$0xfe] %vm1331_vm7, %v1302_v56 }
 0x3aa   :  { %1406 = vst.msk [vmem:[#allocation3 + $0x90] sm:$0xff] %vm1396_vm4, %v4319_v41  ;;  %v1871_v45 = vpop.f32.mrf.mxu2 }
 0x3ab   :  { %1814 = vmatmul.f32.gmra.mxu1 %v1691_v52  ;;  %1423 = vst.msk [vmem:[#allocation3 + $0x97] sm:$0x1] %vm1413_vm6, %v2767_v5 }
 0x3ac   :  { %1490 = vst.msk [vmem:[#allocation3 + $0x90] sm:$0x7f] %vm1480_vm8, %v1451_v1 }
 0x3ad   :  { %1254 = vst.msk [vmem:[#allocation3 + $0x70] sm:$0x7f] %vm1247_vm2, %v1218_v48  ;;  %v1693_v7 = vld [vmem:[#allocation3 + $0x60] sm:$0xff] }
 0x3ae   :  { %1270 = vst.msk [vmem:[#allocation3 + $0x70] sm:$0x1] %vm1262_vm3, %v2767_v5  ;;  %1378 = vrot.lane.b32.xlu1 %v3842_v34, %s2769_s4 }
 0x3af   :  { %1339 = vst.msk [vmem:[#allocation3 + $0x70] sm:$0xfe] %vm1331_vm7, %v4435_v57  ;;  %1462 = vrot.lane.b32.xlu2 %v1431_v46, %s2772_s10 }
 0x3b0   :  { %1404 = vst.msk [vmem:[#allocation3 + $0x70] sm:$0xff] %vm1396_vm4, %v4321_v23  ;;  %v1535_v21 = vpop.permute.xlu0 %1534  ;;  %v1447_v63 = vpop.permute.xlu1 %1446 }
 0x3b1   :  { %1511 = vst.msk [vmem:[#allocation3 + $0x90] sm:$0x1] %vm1501_vm9, %v2767_v5  ;;  %v1597_v2 = vpop.permute.xlu2 %1596 }
 0x3b2   :  { %1421 = vst.msk [vmem:[#allocation3 + $0x77] sm:$0x1] %vm1413_vm6, %v2767_v5  ;;  %v1874_v42 = vpop.f32.mrf.mxu2 }
 0x3b3   :  { %1817 = vmatmul.f32.gmra.mxu1 %v1693_v7  ;;  %1569 = vst.msk [vmem:[#allocation3 + $0x90] sm:$0xfe] %vm1560_vm10, %v1535_v21 }
 0x3b4   :  { %1628 = vst.msk [vmem:[#allocation3 + $0x90] sm:$0xff] %vm1575_vm11, %v4334_v13 }
 0x3b5   :  { %1488 = vst.msk [vmem:[#allocation3 + $0x70] sm:$0x7f] %vm1480_vm8, %v1447_v63 }
 0x3b6   :  { %1499 = vst.msk [vmem:[#allocation3 + $0x70] sm:$0xff] %vm1498_vm12, %v2767_v5 }
 0x3b7   :  { %1509 = vst.msk [vmem:[#allocation3 + $0x70] sm:$0x1] %vm1501_vm9, %v2767_v5 }
 0x3b8   :  { %1576 = vst.msk [vmem:[#allocation3 + $0x70] sm:$0xff] %vm1575_vm11, %v2767_v5  ;;  %v1222_v34 = vpop.permute.xlu0 %1221  ;;  %v1449_v46 = vpop.permute.xlu1 %1448 }
 0x3b9   :  { %v1306_v25 = vpop.permute.xlu2 %1305  ;;  %1256 = vst.msk [vmem:[#allocation3 + $0xa0] sm:$0x7f] %vm1247_vm2, %v1222_v34 }
 0x3ba   :  { %1273 = vst.msk [vmem:[#allocation3 + $0xa0] sm:$0x1] %vm1262_vm3, %v2767_v5  ;;  %v1877_v21 = vpop.f32.mrf.mxu2 }
 0x3bb   :  { %1489 = vst.msk [vmem:[#allocation3 + $0x80] sm:$0x7f] %vm1480_vm8, %v1449_v46  ;;  %v1699_v41 = vld [vmem:[#allocation3 + $0x90] sm:$0xff] }
 0x3bc   :  { %1510 = vst.msk [vmem:[#allocation3 + $0x80] sm:$0x1] %vm1501_vm9, %v2767_v5 }
 0x3bd   :  { %1568 = vst.msk [vmem:[#allocation3 + $0x80] sm:$0xfe] %vm1560_vm10, %v4469_v24 }
 0x3be   :  { %1627 = vst.msk [vmem:[#allocation3 + $0x80] sm:$0xff] %vm1575_vm11, %v4350_v36 }
 0x3bf   :  { %v1695_v27 = vld [vmem:[#allocation3 + $0x70] sm:$0xff] }
 0x3c0   :  { %1820 = vmatmul.f32.gmra.mxu1 %v1695_v27  ;;  %v1453_v26 = vpop.permute.xlu0 %1452  ;;  %v1304_v31 = vpop.permute.xlu1 %1303 }
 0x3c1   :  { %v1539_v20 = vpop.permute.xlu2 %1538  ;;  %1342 = vst.msk [vmem:[#allocation3 + $0xa0] sm:$0xfe] %vm1331_vm7, %v1304_v31 }
 0x3c2   :  { %1407 = vst.msk [vmem:[#allocation3 + $0xa0] sm:$0xff] %vm1396_vm4, %v1369_v16  ;;  %v1712_v16 = vld [vmem:[#allocation3 + $0xf8] sm:$0xff]  ;;  %v1880_v31 = vpop.f32.mrf.mxu2 }
 0x3c3   :  { %1424 = vst.msk [vmem:[#allocation3 + $0xa7] sm:$0x1] %vm1413_vm6, %v2767_v5  ;;  %2586 = vmatmul.msk.f32.gmra.mxu2 %vm852_vm5, %v1712_v16  ;;  %v2009_v16 = vld [vmem:[#allocation4 + $0x200] sm:$0xff] }
 0x3c4   :  { %1491 = vst.msk [vmem:[#allocation3 + $0xa0] sm:$0x7f] %vm1480_vm8, %v1453_v26 }
 0x3c5   :  { %v1697_v53 = vld [vmem:[#allocation3 + $0x80] sm:$0xff]  ;;  %1512 = vst.msk [vmem:[#allocation3 + $0xa0] sm:$0x1] %vm1501_vm9, %v2767_v5 }
 0x3c8   :  { %1823 = vmatmul.f32.gmra.mxu1 %v1697_v53  ;;  %v1134_v61 = vpop.permute.xlu0 %1133  ;;  %v1537_v0 = vpop.permute.xlu1 %1536 }
 0x3c9   :  { %v1226_v30 = vpop.permute.xlu2 %1225  ;;  %1166 = vst.msk [vmem:[#allocation3 + $0xb0] sm:$0xff] %vm1112_vm15, %v1134_v61 }
 0x3ca   :  { %1186 = vst.msk [vmem:[#allocation3 + $0xb7] sm:$0x1] %vm1174_vm0, %v2767_v5 }
 0x3cb   :  { %1570 = vst.msk [vmem:[#allocation3 + $0xa0] sm:$0xfe] %vm1560_vm10, %v1537_v0 }
 0x3cc   :  { %1629 = vst.msk [vmem:[#allocation3 + $0xa0] sm:$0xff] %vm1575_vm11, %v1597_v2 }
 0x3d0   :  { %1826 = vmatmul.f32.gmra.mxu1 %v1699_v41  ;;  %v1371_v23 = vpop.permute.xlu0 %1370  ;;  %v1224_v33 = vpop.permute.xlu1 %1223 }
 0x3d1   :  { %v1457_v12 = vpop.permute.xlu2 %1456  ;;  %1257 = vst.msk [vmem:[#allocation3 + $0xb0] sm:$0x7f] %vm1247_vm2, %v1224_v33 }
 0x3d2   :  { %1274 = vst.msk [vmem:[#allocation3 + $0xb0] sm:$0x1] %vm1262_vm3, %v2767_v5 }
 0x3d3   :  { %1343 = vst.msk [vmem:[#allocation3 + $0xb0] sm:$0xfe] %vm1331_vm7, %v1306_v25  ;;  %v1701_v13 = vld [vmem:[#allocation3 + $0xa0] sm:$0xff] }
 0x3d4   :  { %1408 = vst.msk [vmem:[#allocation3 + $0xb0] sm:$0xff] %vm1396_vm4, %v1371_v23 }
 0x3d5   :  { %1425 = vst.msk [vmem:[#allocation3 + $0xb7] sm:$0x1] %vm1413_vm6, %v2767_v5 }
 0x3d8   :  { %1829 = vmatmul.f32.gmra.mxu1 %v1701_v13  ;;  %v1599_v43 = vpop.permute.xlu0 %1598  ;;  %v1455_v44 = vpop.permute.xlu1 %1454 }
 0x3d9   :  { %v1138_v37 = vpop.permute.xlu2 %1137  ;;  %1492 = vst.msk [vmem:[#allocation3 + $0xb0] sm:$0x7f] %vm1480_vm8, %v1455_v44 }
 0x3da   :  { %1168 = vst.msk [vmem:[#allocation3 + $0xd0] sm:$0xff] %vm1112_vm15, %v1138_v37 }
 0x3db   :  { %1188 = vst.msk [vmem:[#allocation3 + $0xd7] sm:$0x1] %vm1174_vm0, %v2767_v5 }
 0x3dc   :  { %1513 = vst.msk [vmem:[#allocation3 + $0xb0] sm:$0x1] %vm1501_vm9, %v2767_v5 }
 0x3dd   :  { %1571 = vst.msk [vmem:[#allocation3 + $0xb0] sm:$0xfe] %vm1560_vm10, %v1539_v20 }
 0x3de   :  { %1630 = vst.msk [vmem:[#allocation3 + $0xb0] sm:$0xff] %vm1575_vm11, %v1599_v43 }
 0x3e0   :  { %v1308_v36 = vpop.permute.xlu0 %1307  ;;  %v1136_v58 = vpop.permute.xlu1 %1135 }
 0x3e1   :  { %1167 = vst.msk [vmem:[#allocation3 + $0xc0] sm:$0xff] %vm1112_vm15, %v1136_v58  ;;  %v1375_v38 = vpop.permute.xlu2 %1374 }
 0x3e2   :  { %1187 = vst.msk [vmem:[#allocation3 + $0xc7] sm:$0x1] %vm1174_vm0, %v2767_v5 }
 0x3e3   :  { %1258 = vst.msk [vmem:[#allocation3 + $0xc0] sm:$0x7f] %vm1247_vm2, %v1226_v30  ;;  %v1883_v30 = vpop.f32.mrf.mxu2 }
 0x3e4   :  { %1275 = vst.msk [vmem:[#allocation3 + $0xc0] sm:$0x1] %vm1262_vm3, %v2767_v5 }
 0x3e5   :  { %1344 = vst.msk [vmem:[#allocation3 + $0xc0] sm:$0xfe] %vm1331_vm7, %v1308_v36  ;;  %v1703_v47 = vld [vmem:[#allocation3 + $0xb0] sm:$0xff] }
 0x3e6   :  { %1832 = vmatmul.f32.gmra.mxu1 %v1703_v47 }
 0x3e8   :  { %v1541_v50 = vpop.permute.xlu0 %1540  ;;  %v1373_v6 = vpop.permute.xlu1 %1372 }
 0x3e9   :  { %v1800_v10 = vpop.f32.mrf.mxu1  ;;  %1409 = vst.msk [vmem:[#allocation3 + $0xc0] sm:$0xff] %vm1396_vm4, %v1373_v6  ;;  %v1603_v35 = vpop.permute.xlu2 %1602 }
 0x3ea   :  { %v1801_v28 = vadd.f32 %v4602_v29, %v1800_v10  ;;  %1426 = vst.msk [vmem:[#allocation3 + $0xc7] sm:$0x1] %vm1413_vm6, %v2767_v5 }
 0x3eb   :  { %1493 = vst.msk [vmem:[#allocation3 + $0xc0] sm:$0x7f] %vm1480_vm8, %v1457_v12  ;;  %v1886_v12 = vpop.f32.mrf.mxu2 }
 0x3ec   :  { %v4609_v18 = vadd.f32 %v1865_v8, %v1801_v28  ;;  %1514 = vst.msk [vmem:[#allocation3 + $0xc0] sm:$0x1] %vm1501_vm9, %v2767_v5 }
 0x3ed   :  { %1572 = vst.msk [vmem:[#allocation3 + $0xc0] sm:$0xfe] %vm1560_vm10, %v1541_v50 }
 0x3ee   :  { %1913 = vxpose.xlu0.b32.start [1/16] (narrow) %v4609_v18, 8 }
 0x3f0   :  { %v1228_v51 = vpop.permute.xlu0 %1227  ;;  %v1601_v9 = vpop.permute.xlu1 %1600 }
 0x3f1   :  { %1259 = vst.msk [vmem:[#allocation3 + $0xd0] sm:$0x7f] %vm1247_vm2, %v1228_v51  ;;  %v1312_v62 = vpop.permute.xlu2 %1311 }
 0x3f2   :  { %1276 = vst.msk [vmem:[#allocation3 + $0xd0] sm:$0x1] %vm1262_vm3, %v2767_v5 }
 0x3f3   :  { %1631 = vst.msk [vmem:[#allocation3 + $0xc0] sm:$0xff] %vm1575_vm11, %v1601_v9  ;;  %v1889_v44 = vpop.f32.mrf.mxu2 }
 0x3f8   :  { %v1459_v54 = vpop.permute.xlu0 %1458  ;;  %v1310_v59 = vpop.permute.xlu1 %1309 }
 0x3f9   :  { %1345 = vst.msk [vmem:[#allocation3 + $0xd0] sm:$0xfe] %vm1331_vm7, %v1310_v59  ;;  %v1545_v49 = vpop.permute.xlu2 %1544 }
 0x3fa   :  { %1410 = vst.msk [vmem:[#allocation3 + $0xd0] sm:$0xff] %vm1396_vm4, %v1375_v38  ;;  %v1705_v14 = vld [vmem:[#allocation3 + $0xc0] sm:$0xff] }
 0x3fb   :  { %1427 = vst.msk [vmem:[#allocation3 + $0xd7] sm:$0x1] %vm1413_vm6, %v2767_v5  ;;  %1835 = vmatmul.f32.gmra.mxu1 %v1705_v14  ;;  %v1892_v47 = vpop.f32.mrf.mxu2 }
 0x3fc   :  { %1494 = vst.msk [vmem:[#allocation3 + $0xd0] sm:$0x7f] %vm1480_vm8, %v1459_v54 }
 0x3fd   :  { %1515 = vst.msk [vmem:[#allocation3 + $0xd0] sm:$0x1] %vm1501_vm9, %v2767_v5 }
 0x3ff   :  { %v1803_v4 = vpop.f32.mrf.mxu1 }
 0x400   :  { %v1804_v57 = vadd.f32 %v4602_v29, %v1803_v4  ;;  %v1140_v39 = vpop.permute.xlu0 %1139  ;;  %v1543_v40 = vpop.permute.xlu1 %1542 }
 0x401   :  { %1169 = vst.msk [vmem:[#allocation3 + $0xe0] sm:$0xff] %vm1112_vm15, %v1140_v39  ;;  %v1232_v52 = vpop.permute.xlu2 %1231  ;;  %v2185_v39 = vld [vmem:[#allocation4 + $0x780] sm:$0xff] }
 0x402   :  { %v4628_v11 = vadd.f32 %v1868_v19, %v1804_v57  ;;  %1189 = vst.msk [vmem:[#allocation3 + $0xe7] sm:$0x1] %vm1174_vm0, %v2767_v5  ;;  %2201 = vmatpush.msra.mxu3 %v2185_v39  ;;  %v2094_v39 = vld [vmem:[#allocation4 + $0x4a8] sm:$0xff] }
 0x403   :  { %1573 = vst.msk [vmem:[#allocation3 + $0xd0] sm:$0xfe] %vm1560_vm10, %v1543_v40  ;;  %v1895_v38 = vpop.f32.mrf.mxu2  ;;  %v2169_v40 = vld [vmem:[#allocation4 + $0x700] sm:$0xff] }
 0x404   :  { %1914 = vxpose.xlu0.b32.cont [2/16] (narrow) %v4628_v11, 8  ;;  %1632 = vst.msk [vmem:[#allocation3 + $0xd0] sm:$0xff] %vm1575_vm11, %v1603_v35  ;;  %2202 = vmatpush.msra.mxu3 %v2169_v40  ;;  %v2077_v40 = vld [vmem:[#allocation4 + $0x420] sm:$0xff] }
 0x407   :  { %v1806_v55 = vpop.f32.mrf.mxu1 }
 0x408   :  { %v1807_v22 = vadd.f32 %v4602_v29, %v1806_v55  ;;  %v1377_v24 = vpop.permute.xlu0 %1376  ;;  %v1230_v3 = vpop.permute.xlu1 %1229  ;;  %v2121_v55 = vld [vmem:[#allocation4 + $0x580] sm:$0xff] }
 0x409   :  { %1260 = vst.msk [vmem:[#allocation3 + $0xe0] sm:$0x7f] %vm1247_vm2, %v1230_v3  ;;  %v1463_v27 = vpop.permute.xlu2 %1462 }
 0x40a   :  { %v4637_v17 = vadd.f32 %v1871_v45, %v1807_v22  ;;  %1277 = vst.msk [vmem:[#allocation3 + $0xe0] sm:$0x1] %vm1262_vm3, %v2767_v5  ;;  %v2137_v45 = vld [vmem:[#allocation4 + $0x600] sm:$0xff] }
 0x40b   :  { %1346 = vst.msk [vmem:[#allocation3 + $0xe0] sm:$0xfe] %vm1331_vm7, %v1312_v62  ;;  %v1707_v60 = vld [vmem:[#allocation3 + $0xd0] sm:$0xff]  ;;  %v1898_v59 = vpop.f32.mrf.mxu2  ;;  %v2153_v62 = vld [vmem:[#allocation4 + $0x680] sm:$0xff] }
 0x40c   :  { %1915 = vxpose.xlu0.b32.cont [3/16] (narrow) %v4637_v17, 8  ;;  %1411 = vst.msk [vmem:[#allocation3 + $0xe0] sm:$0xff] %vm1396_vm4, %v1377_v24  ;;  %1838 = vmatmul.f32.gmra.mxu1 %v1707_v60  ;;  %v2105_v22 = vld [vmem:[#allocation4 + $0x500] sm:$0xff] }
 0x40d   :  { %1428 = vst.msk [vmem:[#allocation3 + $0xe7] sm:$0x1] %vm1413_vm6, %v2767_v5  ;;  %2203 = vmatpush.msra.mxu3 %v2153_v62  ;;  %v2095_v62 = vld [vmem:[#allocation4 + $0x4b0] sm:$0xff] }
 0x40f   :  { %v1809_v15 = vpop.f32.mrf.mxu1  ;;  %2204 = vmatpush.msra.mxu3 %v2137_v45  ;;  %v2078_v45 = vld [vmem:[#allocation4 + $0x428] sm:$0xff] }
 0x410   :  { %v1810_v32 = vadd.f32 %v4602_v29, %v1809_v15  ;;  %v1461_v1 = vpop.permute.xlu1 %1460  ;;  %v1605_v48 = vpop.permute.xlu0 %1604  ;;  %v2089_v15 = vld [vmem:[#allocation4 + $0x480] sm:$0xff] }
 0x411   :  { %1495 = vst.msk [vmem:[#allocation3 + $0xe0] sm:$0x7f] %vm1480_vm8, %v1461_v1  ;;  %2205 = vmatpush.msra.mxu3 %v2121_v55  ;;  %v2057_v1 = vld [vmem:[#allocation4 + $0x380] sm:$0xff] }
 0x412   :  { %v4648_v56 = vadd.f32 %v1874_v42, %v1810_v32  ;;  %1516 = vst.msk [vmem:[#allocation3 + $0xe0] sm:$0x1] %vm1501_vm9, %v2767_v5  ;;  %v2073_v32 = vld [vmem:[#allocation4 + $0x400] sm:$0xff] }
 0x413   :  { %1574 = vst.msk [vmem:[#allocation3 + $0xe0] sm:$0xfe] %vm1560_vm10, %v1545_v49  ;;  %v1901_v4 = vpop.f32.mrf.mxu2  ;;  %2206 = vmatpush.msra.mxu3 %v2105_v22  ;;  %v2041_v42 = vld [vmem:[#allocation4 + $0x300] sm:$0xff]  ;;  %v2187_v22 = vld [vmem:[#allocation4 + $0x790] sm:$0xff] }
 0x414   :  { %1916 = vxpose.xlu0.b32.cont [4/16] (narrow) %v4648_v56, 8  ;;  %1633 = vst.msk [vmem:[#allocation3 + $0xe0] sm:$0xff] %vm1575_vm11, %v1605_v48  ;;  %v2025_v48 = vld [vmem:[#allocation4 + $0x280] sm:$0xff] }
 0x415   :  { %2207 = vmatpush.msra.mxu3 %v2089_v15  ;;  %v2061_v55 = vld [vmem:[#allocation4 + $0x3a0] sm:$0xff]  ;;  %v2063_v15 = vld [vmem:[#allocation4 + $0x3b0] sm:$0xff] }
 0x417   :  { %2208 = vmatpush.msra.mxu3 %v2073_v32  ;;  %v2139_v32 = vld [vmem:[#allocation4 + $0x610] sm:$0xff] }
 0x418   :  { %v1142_v7 = vpop.permute.xlu1 %1141  ;;  %v1314_v2 = vpop.permute.xlu0 %1313 }
 0x419   :  { %1170 = vst.msk [vmem:[#allocation3 + $0xf0] sm:$0xff] %vm1112_vm15, %v1142_v7  ;;  %2209 = vmatpush.msra.mxu3 %v2057_v1  ;;  %v2045_v1 = vld [vmem:[#allocation4 + $0x320] sm:$0xff] }
 0x41a   :  { %1190 = vst.msk [vmem:[#allocation3 + $0xf7] sm:$0x1] %vm1174_vm0, %v2767_v5 }
 0x41b   :  { %1261 = vst.msk [vmem:[#allocation3 + $0xf0] sm:$0x7f] %vm1247_vm2, %v1232_v52  ;;  %v1709_v63 = vld [vmem:[#allocation3 + $0xe0] sm:$0xff]  ;;  %v1904_v60 = vpop.f32.mrf.mxu2  ;;  %2210 = vmatpush.msra.mxu3 %v2041_v42  ;;  %v2123_v42 = vld [vmem:[#allocation4 + $0x590] sm:$0xff] }
 0x41c   :  { %1278 = vst.msk [vmem:[#allocation3 + $0xf0] sm:$0x1] %vm1262_vm3, %v2767_v5  ;;  %1841 = vmatmul.f32.gmra.mxu1 %v1709_v63  ;;  %v1993_v52 = vld [vmem:[#allocation4 + $0x180] sm:$0xff] }
 0x41d   :  { %1347 = vst.msk [vmem:[#allocation3 + $0xf0] sm:$0xfe] %vm1331_vm7, %v1314_v2  ;;  %2211 = vmatpush.msra.mxu3 %v2025_v48  ;;  %v2189_v63 = vld [vmem:[#allocation4 + $0x7a0] sm:$0xff]  ;;  %v2107_v48 = vld [vmem:[#allocation4 + $0x510] sm:$0xff] }
 0x41e   :  { %2281 = vmatpush.msra.mxu2 %v2189_v63  ;;  %v2029_v63 = vld [vmem:[#allocation4 + $0x2a0] sm:$0xff] }
 0x41f   :  { %2212 = vmatpush.msra.mxu3 %v2009_v16  ;;  %v2091_v16 = vld [vmem:[#allocation4 + $0x490] sm:$0xff] }
 0x420   :  { %v1812_v34 = vpop.f32.mrf.mxu1  ;;  %v1379_v46 = vpop.permute.xlu1 %1378 }
 0x421   :  { %v1813_v25 = vadd.f32 %v4602_v29, %v1812_v34  ;;  %1412 = vst.msk [vmem:[#allocation3 + $0xf0] sm:$0xff] %vm1396_vm4, %v1379_v46  ;;  %2213 = vmatpush.msra.mxu3 %v1993_v52  ;;  %v1961_v46 = vld [vmem:[#allocation4 + $0x80] sm:$0xff]  ;;  %v2046_v52 = vld [vmem:[#allocation4 + $0x328] sm:$0xff] }
 0x422   :  { %1429 = vst.msk [vmem:[#allocation3 + $0xf7] sm:$0x1] %vm1413_vm6, %v2767_v5 }
 0x423   :  { %v4667_v26 = vadd.f32 %v1877_v21, %v1813_v25  ;;  %1496 = vst.msk [vmem:[#allocation3 + $0xf0] sm:$0x7f] %vm1480_vm8, %v1463_v27  ;;  %v1977_v21 = vld [vmem:[#allocation4 + $0x100] sm:$0xff]  ;;  %v1907_v34 = vpop.f32.mrf.mxu2 }
 0x424   :  { %1500 = vst.msk [vmem:[#allocation3 + $0xf0] sm:$0xff] %vm1498_vm12, %v2767_v5  ;;  %2214 = vmatpush.msra.mxu3 %v1977_v21  ;;  %v1945_v27 = vld [vmem:[#allocation4] sm:$0xff]  ;;  %v2075_v21 = vld [vmem:[#allocation4 + $0x410] sm:$0xff] }
 0x425   :  { %1917 = vxpose.xlu0.b32.cont [5/16] (narrow) %v4667_v26, 8  ;;  %1517 = vst.msk [vmem:[#allocation3 + $0xf0] sm:$0x1] %vm1501_vm9, %v2767_v5 }
 0x426   :  { %1577 = vst.msk [vmem:[#allocation3 + $0xf0] sm:$0xff] %vm1575_vm11, %v2767_v5  ;;  %2215 = vmatpush.msra.mxu3 %v1961_v46  ;;  %v2027_v46 = vld [vmem:[#allocation4 + $0x290] sm:$0xff] }
 0x428   :  { %v1815_v20 = vpop.f32.mrf.mxu1  ;;  %2216 = vmatpush.msra.mxu3 %v1945_v27  ;;  %v2031_v27 = vld [vmem:[#allocation4 + $0x2b0] sm:$0xff] }
 0x429   :  { %v1816_v53 = vadd.f32 %v4602_v29, %v1815_v20  ;;  %v2190_v20 = vld [vmem:[#allocation4 + $0x7a8] sm:$0xff] }
 0x42a   :  { %2301 = vmatpush.msra.mxu0 %v2190_v20  ;;  %v2013_v20 = vld [vmem:[#allocation4 + $0x220] sm:$0xff] }
 0x42b   :  { %v4678_v61 = vadd.f32 %v1880_v31, %v1816_v53  ;;  %v2186_v31 = vld [vmem:[#allocation4 + $0x788] sm:$0xff]  ;;  %v2191_v53 = vld [vmem:[#allocation4 + $0x7b0] sm:$0xff] }
 0x42c   :  { %2221 = vmatpush.msrb.mxu3 %v2186_v31  ;;  %2321 = vmatpush.msra.mxu1 %v2191_v53  ;;  %v2011_v31 = vld [vmem:[#allocation4 + $0x210] sm:$0xff] }
 0x42d   :  { %1918 = vxpose.xlu0.b32.cont [6/16] (narrow) %v4678_v61, 8  ;;  %v1711_v0 = vld [vmem:[#allocation3 + $0xf0] sm:$0xff] }
 0x42e   :  { %1844 = vmatmul.f32.gmra.mxu1 %v1711_v0  ;;  %v2170_v0 = vld [vmem:[#allocation4 + $0x708] sm:$0xff]  ;;  %v1995_v53 = vld [vmem:[#allocation4 + $0x190] sm:$0xff] }
 0x42f   :  { %2222 = vmatpush.msrb.mxu3 %v2170_v0  ;;  %v1979_v0 = vld [vmem:[#allocation4 + $0x110] sm:$0xff] }
 0x430   :  { %v1818_v41 = vpop.f32.mrf.mxu1 }
 0x431   :  { %v1819_v23 = vadd.f32 %v4602_v29, %v1818_v41  ;;  %v2154_v41 = vld [vmem:[#allocation4 + $0x688] sm:$0xff] }
 0x432   :  { %2223 = vmatpush.msrb.mxu3 %v2154_v41  ;;  %v2014_v41 = vld [vmem:[#allocation4 + $0x228] sm:$0xff] }
 0x433   :  { %v4682_v33 = vadd.f32 %v1883_v30, %v1819_v23  ;;  %v2173_v30 = vld [vmem:[#allocation4 + $0x720] sm:$0xff]  ;;  %v2138_v23 = vld [vmem:[#allocation4 + $0x608] sm:$0xff] }
 0x434   :  { %2282 = vmatpush.msra.mxu2 %v2173_v30  ;;  %2224 = vmatpush.msrb.mxu3 %v2138_v23  ;;  %v1963_v30 = vld [vmem:[#allocation4 + $0x90] sm:$0xff] }
 0x435   :  { %1919 = vxpose.xlu0.b32.cont [7/16] (narrow) %v4682_v33, 8  ;;  %v2015_v23 = vld [vmem:[#allocation4 + $0x230] sm:$0xff] }
 0x43d   :  { %v1821_v13 = vpop.f32.mrf.mxu1 }
 0x43e   :  { %v1822_v5 = vadd.f32 %v4602_v29, %v1821_v13  ;;  %v2174_v13 = vld [vmem:[#allocation4 + $0x728] sm:$0xff] }
 0x43f   :  { %2302 = vmatpush.msra.mxu0 %v2174_v13  ;;  %v1997_v13 = vld [vmem:[#allocation4 + $0x1a0] sm:$0xff] }
 0x440   :  { %v4686_v43 = vadd.f32 %v1886_v12, %v1822_v5  ;;  %v2122_v12 = vld [vmem:[#allocation4 + $0x588] sm:$0xff]  ;;  %v2175_v5 = vld [vmem:[#allocation4 + $0x730] sm:$0xff] }
 0x441   :  { %2225 = vmatpush.msrb.mxu3 %v2122_v12  ;;  %2322 = vmatpush.msra.mxu1 %v2175_v5  ;;  %v1947_v12 = vld [vmem:[#allocation4 + $0x10] sm:$0xff]  ;;  %v2188_v5 = vld [vmem:[#allocation4 + $0x798] sm:$0xff] }
 0x442   :  { %1920 = vxpose.xlu0.b32.cont [8/16] (narrow) %v4686_v43, 8 }
 0x445   :  { %v1824_v37 = vpop.f32.mrf.mxu1 }
 0x446   :  { %v1825_v36 = vadd.f32 %v4602_v29, %v1824_v37  ;;  %v2157_v37 = vld [vmem:[#allocation4 + $0x6a0] sm:$0xff] }
 0x447   :  { %2283 = vmatpush.msra.mxu2 %v2157_v37  ;;  %v2156_v37 = vld [vmem:[#allocation4 + $0x698] sm:$0xff] }
 0x448   :  { %v4690_v58 = vadd.f32 %v1889_v44, %v1825_v36  ;;  %v2106_v44 = vld [vmem:[#allocation4 + $0x508] sm:$0xff] }
 0x449   :  { %v2090_v36 = vld [vmem:[#allocation4 + $0x488] sm:$0xff]  ;;  %2226 = vmatpush.msrb.mxu3 %v2106_v44  ;;  %v2172_v44 = vld [vmem:[#allocation4 + $0x718] sm:$0xff] }
 0x44a   :  { %1921 = vxpose.xlu0.b32.cont [9/16] (narrow) %v4690_v58, 8 }
 0x44b   :  { %2227 = vmatpush.msrb.mxu3 %v2090_v36  ;;  %v1998_v36 = vld [vmem:[#allocation4 + $0x1a8] sm:$0xff] }
 0x44d   :  { %v1827_v50 = vpop.f32.mrf.mxu1 }
 0x44e   :  { %v1828_v6 = vadd.f32 %v4602_v29, %v1827_v50  ;;  %v1910_v50 = vpop.f32.mrf.mxu2 }
 0x450   :  { %v4694_v10 = vadd.f32 %v1892_v47, %v1828_v6  ;;  %v2074_v6 = vld [vmem:[#allocation4 + $0x408] sm:$0xff] }
 0x451   :  { %2228 = vmatpush.msrb.mxu3 %v2074_v6  ;;  %v1981_v6 = vld [vmem:[#allocation4 + $0x120] sm:$0xff] }
 0x452   :  { %1922 = vxpose.xlu0.b32.cont [10/16] (narrow) %v4694_v10, 8 }
 0x455   :  { %v1830_v28 = vpop.f32.mrf.mxu1 }
 0x456   :  { %v1831_v8 = vadd.f32 %v4602_v29, %v1830_v28 }
 0x458   :  { %v4698_v51 = vadd.f32 %v1895_v38, %v1831_v8  ;;  %v2058_v38 = vld [vmem:[#allocation4 + $0x388] sm:$0xff] }
 0x459   :  { %2229 = vmatpush.msrb.mxu3 %v2058_v38  ;;  %v2092_v38 = vld [vmem:[#allocation4 + $0x498] sm:$0xff] }
 0x45a   :  { %1923 = vxpose.xlu0.b32.cont [11/16] (narrow) %v4698_v51, 8 }
 0x463   :  { %v1833_v9 = vpop.f32.mrf.mxu1 }
 0x464   :  { %v1834_v54 = vadd.f32 %v4602_v29, %v1833_v9  ;;  %v2158_v9 = vld [vmem:[#allocation4 + $0x6a8] sm:$0xff] }
 0x466   :  { %v4702_v35 = vadd.f32 %v1898_v59, %v1834_v54  ;;  %v2042_v54 = vld [vmem:[#allocation4 + $0x308] sm:$0xff] }
 0x467   :  { %2230 = vmatpush.msrb.mxu3 %v2042_v54  ;;  %v2026_v59 = vld [vmem:[#allocation4 + $0x288] sm:$0xff]  ;;  %v1983_v54 = vld [vmem:[#allocation4 + $0x130] sm:$0xff] }
 0x468   :  { %1924 = vxpose.xlu0.b32.cont [12/16] (narrow) %v4702_v35, 8 }
 0x469   :  { %2231 = vmatpush.msrb.mxu3 %v2026_v59  ;;  %v1965_v59 = vld [vmem:[#allocation4 + $0xa0] sm:$0xff] }
 0x478   :  { %v1836_v14 = vpop.f32.mrf.mxu1 }
 0x479   :  { %v1837_v19 = vadd.f32 %v4602_v29, %v1836_v14  ;;  %v2010_v14 = vld [vmem:[#allocation4 + $0x208] sm:$0xff] }
 0x47a   :  { %2232 = vmatpush.msrb.mxu3 %v2010_v14  ;;  %v2060_v14 = vld [vmem:[#allocation4 + $0x398] sm:$0xff] }
 0x47b   :  { %v4706_v57 = vadd.f32 %v1901_v4, %v1837_v19  ;;  %v1994_v19 = vld [vmem:[#allocation4 + $0x188] sm:$0xff]  ;;  %v2159_v4 = vld [vmem:[#allocation4 + $0x6b0] sm:$0xff] }
 0x47c   :  { %2233 = vmatpush.msrb.mxu3 %v1994_v19  ;;  %v2044_v19 = vld [vmem:[#allocation4 + $0x318] sm:$0xff] }
 0x47d   :  { %1925 = vxpose.xlu0.b32.cont [13/16] (narrow) %v4706_v57, 8 }
 0x489   :  { %v1839_v24 = vpop.f32.mrf.mxu1 }
 0x48a   :  { %v1840_v3 = vadd.f32 %v4602_v29, %v1839_v24 }
 0x48c   :  { %v4710_v49 = vadd.f32 %v1904_v60, %v1840_v3  ;;  %v2171_v3 = vld [vmem:[#allocation4 + $0x710] sm:$0xff] }
 0x48d   :  { %v2155_v60 = vld [vmem:[#allocation4 + $0x690] sm:$0xff] }
 0x48e   :  { %1926 = vxpose.xlu0.b32.cont [14/16] (narrow) %v4710_v49, 8 }
 0x499   :  { %v1842_v7 = vpop.f32.mrf.mxu1 }
 0x49a   :  { %v1843_v2 = vadd.f32 %v4602_v29, %v1842_v7  ;;  %v2047_v7 = vld [vmem:[#allocation4 + $0x330] sm:$0xff] }
 0x49c   :  { %v1908_v25 = vadd.f32 %v1907_v34, %v1843_v2  ;;  %v2059_v2 = vld [vmem:[#allocation4 + $0x390] sm:$0xff] }
 0x49d   :  { %v2043_v34 = vld [vmem:[#allocation4 + $0x310] sm:$0xff] }
 0x49e   :  { %1927 = vxpose.xlu0.b32.cont [15/16] (narrow) %v1908_v25, 8 }
 0x4ab   :  { %v1845_v47 = vpop.f32.mrf.mxu1 }
 0x4ac   :  { %v1846_v28 = vadd.f32 %v4602_v29, %v1845_v47  ;;  %v2141_v29 = vld [vmem:[#allocation4 + $0x620] sm:$0xff]  ;;  %v1999_v47 = vld [vmem:[#allocation4 + $0x1b0] sm:$0xff] }
 0x4ae   :  { %v1911_v8 = vadd.f32 %v1910_v50, %v1846_v28  ;;  %v2140_v50 = vld [vmem:[#allocation4 + $0x618] sm:$0xff] }
 0x4af   :  { %v2124_v28 = vld [vmem:[#allocation4 + $0x598] sm:$0xff] }
 0x4b0   :  { %2654 = vmatpush.lsf.msrb.mxu2 %v1911_v8  ;;  %2596 = vmatpush.lsf.msrb.mxu0 %v1911_v8 }
 0x4b1   :  { %2625 = vmatpush.lsf.msrb.mxu1 %v1911_v8  ;;  %1928 = vxpose.xlu0.b32.end [16/16] (narrow) %v1911_v8, 8  ;;  %v2108_v8 = vld [vmem:[#allocation4 + $0x518] sm:$0xff] }
 0x4b2   :  { %2655 = vmatpush.lsf.msrb.mxu2 %v1908_v25  ;;  %2597 = vmatpush.lsf.msrb.mxu0 %v1908_v25 }
 0x4b3   :  { %2626 = vmatpush.lsf.msrb.mxu1 %v1908_v25  ;;  %v2030_v25 = vld [vmem:[#allocation4 + $0x2a8] sm:$0xff] }
 0x4b4   :  { %2656 = vmatpush.lsf.msrb.mxu2 %v4710_v49  ;;  %2598 = vmatpush.lsf.msrb.mxu0 %v4710_v49 }
 0x4b5   :  { %2627 = vmatpush.lsf.msrb.mxu1 %v4710_v49  ;;  %v2062_v49 = vld [vmem:[#allocation4 + $0x3a8] sm:$0xff] }
 0x4b6   :  { %2303 = vmatpush.msra.mxu0 %v2158_v9  ;;  %2657 = vmatpush.lsf.msrb.mxu2 %v4706_v57  ;;  %v1982_v9 = vld [vmem:[#allocation4 + $0x128] sm:$0xff] }
 0x4b7   :  { %2628 = vmatpush.lsf.msrb.mxu1 %v4706_v57 }
 0x4b8   :  { %2599 = vmatpush.lsf.msrb.mxu0 %v4706_v57  ;;  %2658 = vmatpush.lsf.msrb.mxu2 %v4702_v35  ;;  %v2093_v57 = vld [vmem:[#allocation4 + $0x4a0] sm:$0xff] }
 0x4b9   :  { %2629 = vmatpush.lsf.msrb.mxu1 %v4702_v35 }
 0x4ba   :  { %2600 = vmatpush.lsf.msrb.mxu0 %v4702_v35  ;;  %2284 = vmatpush.msra.mxu2 %v2141_v29  ;;  %v2142_v35 = vld [vmem:[#allocation4 + $0x628] sm:$0xff]  ;;  %v2076_v29 = vld [vmem:[#allocation4 + $0x418] sm:$0xff] }
 0x4bb   :  { %2630 = vmatpush.lsf.msrb.mxu1 %v4698_v51 }
 0x4bc   :  { %2659 = vmatpush.lsf.msrb.mxu2 %v4698_v51  ;;  %2601 = vmatpush.lsf.msrb.mxu0 %v4698_v51  ;;  %v1978_v51 = vld [vmem:[#allocation4 + $0x108] sm:$0xff] }
 0x4bd   :  { %2631 = vmatpush.lsf.msrb.mxu1 %v4694_v10  ;;  %2234 = vmatpush.msrb.mxu3 %v1978_v51  ;;  %v1966_v51 = vld [vmem:[#allocation4 + $0xa8] sm:$0xff] }
 0x4be   :  { %2660 = vmatpush.lsf.msrb.mxu2 %v4694_v10  ;;  %2602 = vmatpush.lsf.msrb.mxu0 %v4694_v10  ;;  %v2125_v10 = vld [vmem:[#allocation4 + $0x5a0] sm:$0xff] }
 0x4bf   :  { %2632 = vmatpush.lsf.msrb.mxu1 %v4690_v58 }
 0x4c0   :  { %2661 = vmatpush.lsf.msrb.mxu2 %v4690_v58  ;;  %2603 = vmatpush.lsf.msrb.mxu0 %v4690_v58  ;;  %v1962_v58 = vld [vmem:[#allocation4 + $0x88] sm:$0xff] }
 0x4c1   :  { %2633 = vmatpush.lsf.msrb.mxu1 %v4686_v43  ;;  %2235 = vmatpush.msrb.mxu3 %v1962_v58  ;;  %v2012_v58 = vld [vmem:[#allocation4 + $0x218] sm:$0xff] }
 0x4c2   :  { %2662 = vmatpush.lsf.msrb.mxu2 %v4686_v43  ;;  %2604 = vmatpush.lsf.msrb.mxu0 %v4686_v43  ;;  %v1946_v43 = vld [vmem:[#allocation4 + $0x8] sm:$0xff] }
 0x4c3   :  { %2634 = vmatpush.lsf.msrb.mxu1 %v4682_v33  ;;  %2236 = vmatpush.msrb.mxu3 %v1946_v43  ;;  %v1949_v43 = vld [vmem:[#allocation4 + $0x20] sm:$0xff] }
 0x4c4   :  { %2304 = vmatpush.msra.mxu0 %v2142_v35  ;;  %2663 = vmatpush.lsf.msrb.mxu2 %v4682_v33  ;;  %v2028_v35 = vld [vmem:[#allocation4 + $0x298] sm:$0xff] }
 0x4c5   :  { %2635 = vmatpush.lsf.msrb.mxu1 %v4678_v61 }
 0x4c6   :  { %2605 = vmatpush.lsf.msrb.mxu0 %v4682_v33  ;;  %2664 = vmatpush.lsf.msrb.mxu2 %v4678_v61  ;;  %v2126_v33 = vld [vmem:[#allocation4 + $0x5a8] sm:$0xff] }
 0x4c7   :  { %2636 = vmatpush.lsf.msrb.mxu1 %v4667_v26 }
 0x4c8   :  { %2606 = vmatpush.lsf.msrb.mxu0 %v4678_v61  ;;  %2285 = vmatpush.msra.mxu2 %v2125_v10  ;;  %v2109_v61 = vld [vmem:[#allocation4 + $0x520] sm:$0xff]  ;;  %v1967_v10 = vld [vmem:[#allocation4 + $0xb0] sm:$0xff] }
 0x4c9   :  { %2637 = vmatpush.lsf.msrb.mxu1 %v4648_v56 }
 0x4ca   :  { %2665 = vmatpush.lsf.msrb.mxu2 %v4667_v26  ;;  %2607 = vmatpush.lsf.msrb.mxu0 %v4667_v26  ;;  %v2110_v26 = vld [vmem:[#allocation4 + $0x528] sm:$0xff] }
 0x4cb   :  { %2638 = vmatpush.lsf.msrb.mxu1 %v4637_v17 }
 0x4cc   :  { %2666 = vmatpush.lsf.msrb.mxu2 %v4648_v56  ;;  %2608 = vmatpush.lsf.msrb.mxu0 %v4648_v56  ;;  %v2143_v56 = vld [vmem:[#allocation4 + $0x630] sm:$0xff] }
 0x4cd   :  { %2639 = vmatpush.lsf.msrb.mxu1 %v4628_v11 }
 0x4ce   :  { %2667 = vmatpush.lsf.msrb.mxu2 %v4637_v17  ;;  %2609 = vmatpush.lsf.msrb.mxu0 %v4637_v17  ;;  %v2127_v17 = vld [vmem:[#allocation4 + $0x5b0] sm:$0xff] }
 0x4cf   :  { %2640 = vmatpush.lsf.msrb.mxu1 %v4609_v18 }
 0x4d0   :  { %2305 = vmatpush.msra.mxu0 %v2126_v33  ;;  %2668 = vmatpush.lsf.msrb.mxu2 %v4628_v11  ;;  %v1996_v33 = vld [vmem:[#allocation4 + $0x198] sm:$0xff] }
 0x4d1   :  { %2323 = vmatpush.msra.mxu1 %v2159_v4  ;;  %v1950_v4 = vld [vmem:[#allocation4 + $0x28] sm:$0xff] }
 0x4d2   :  { %2610 = vmatpush.lsf.msrb.mxu0 %v4628_v11  ;;  %2286 = vmatpush.msra.mxu2 %v2109_v61  ;;  %v2111_v11 = vld [vmem:[#allocation4 + $0x530] sm:$0xff]  ;;  %v1980_v61 = vld [vmem:[#allocation4 + $0x118] sm:$0xff] }
 0x4d3   :  { %2324 = vmatpush.msra.mxu1 %v2143_v56  ;;  %v1948_v56 = vld [vmem:[#allocation4 + $0x18] sm:$0xff] }
 0x4d4   :  { %2669 = vmatpush.lsf.msrb.mxu2 %v4609_v18  ;;  %2611 = vmatpush.lsf.msrb.mxu0 %v4609_v18  ;;  %v2079_v18 = vld [vmem:[#allocation4 + $0x430] sm:$0xff] }
 0x4d5   :  { %2670 = vllmr.1.mxu2  ;;  %2612 = vllmr.1.mxu0 }
 0x4d6   :  { %2306 = vmatpush.msra.mxu0 %v2110_v26  ;;  %2287 = vmatpush.msra.mxu2 %v2093_v57  ;;  %v1964_v26 = vld [vmem:[#allocation4 + $0x98] sm:$0xff]  ;;  %v1951_v57 = vld [vmem:[#allocation4 + $0x30] sm:$0xff] }
 0x4d7   :  { %2641 = vllmr.1.mxu1 }
 0x4d8   :  { %2307 = vmatpush.msra.mxu0 %v2094_v39  ;;  %2325 = vmatpush.msra.mxu1 %v2127_v17  ;;  %v2192_v17 = vld [vmem:[#allocation4 + $0x7b8] sm:$0xff]  ;;  %v2193_v39 = vld [vmem:[#allocation4 + $0x7c0] sm:$0xff] }
 0x4d9   :  { %2288 = vmatpush.msra.mxu2 %v2077_v40  ;;  %v2177_v40 = vld [vmem:[#allocation4 + $0x740] sm:$0xff] }
 0x4da   :  { %2326 = vmatpush.msra.mxu1 %v2111_v11  ;;  %2308 = vmatpush.msra.mxu0 %v2078_v45  ;;  %v2176_v11 = vld [vmem:[#allocation4 + $0x738] sm:$0xff]  ;;  %v2161_v45 = vld [vmem:[#allocation4 + $0x6c0] sm:$0xff] }
 0x4db   :  { %2289 = vmatpush.msra.mxu2 %v2061_v55  ;;  %v2145_v55 = vld [vmem:[#allocation4 + $0x640] sm:$0xff] }
 0x4dc   :  { %2327 = vmatpush.msra.mxu1 %v2095_v62  ;;  %2309 = vmatpush.msra.mxu0 %v2062_v49  ;;  %v2160_v62 = vld [vmem:[#allocation4 + $0x6b8] sm:$0xff]  ;;  %v2129_v49 = vld [vmem:[#allocation4 + $0x5c0] sm:$0xff] }
 0x4dd   :  { %v4757_v24 = vpop.trf.xlu0  ;;  %2290 = vmatpush.msra.mxu2 %v2045_v1  ;;  %v2112_v1 = vld [vmem:[#allocation4 + $0x538] sm:$0xff] }
 0x4de   :  { %2328 = vmatpush.msra.mxu1 %v2079_v18  ;;  %2217 = vmatmul.f32.vlgmr.msra.gmra.mxu3 %v4757_v24  ;;  %v2144_v18 = vld [vmem:[#allocation4 + $0x638] sm:$0xff] }
 0x4df   :  { %2241 = vmatpush.msra.mxu3 %v2187_v22  ;;  %2310 = vmatpush.msra.mxu0 %v2046_v52  ;;  %v2194_v22 = vld [vmem:[#allocation4 + $0x7c8] sm:$0xff]  ;;  %v2096_v52 = vld [vmem:[#allocation4 + $0x4b8] sm:$0xff] }
 0x4e0   :  { %2329 = vmatpush.msra.mxu1 %v2063_v15  ;;  %2291 = vmatpush.msra.mxu2 %v2029_v63  ;;  %v2178_v15 = vld [vmem:[#allocation4 + $0x748] sm:$0xff]  ;;  %v2147_v63 = vld [vmem:[#allocation4 + $0x650] sm:$0xff] }
 0x4e1   :  { %2242 = vmatpush.msra.mxu3 %v2171_v3  ;;  %2311 = vmatpush.msra.mxu0 %v2030_v25  ;;  %v2195_v3 = vld [vmem:[#allocation4 + $0x7d0] sm:$0xff] }
 0x4e2   :  { %2330 = vmatpush.msra.mxu1 %v2047_v7  ;;  %2292 = vmatpush.msra.mxu2 %v2013_v20  ;;  %v2097_v7 = vld [vmem:[#allocation4 + $0x4c0] sm:$0xff]  ;;  %v2131_v25 = vld [vmem:[#allocation4 + $0x5d0] sm:$0xff]  ;;  %v2114_v20 = vld [vmem:[#allocation4 + $0x548] sm:$0xff] }
 0x4e3   :  { %2243 = vmatpush.msra.mxu3 %v2155_v60  ;;  %2312 = vmatpush.msra.mxu0 %v2014_v41  ;;  %v2128_v60 = vld [vmem:[#allocation4 + $0x5b8] sm:$0xff]  ;;  %v2098_v41 = vld [vmem:[#allocation4 + $0x4c8] sm:$0xff] }
 0x4e4   :  { %2331 = vmatpush.msra.mxu1 %v2031_v27  ;;  %2293 = vmatpush.msra.mxu2 %v1997_v13  ;;  %v2064_v27 = vld [vmem:[#allocation4 + $0x3b8] sm:$0xff]  ;;  %v2033_v13 = vld [vmem:[#allocation4 + $0x2c0] sm:$0xff] }
 0x4e5   :  { %2244 = vmatpush.msra.mxu3 %v2139_v32  ;;  %2313 = vmatpush.msra.mxu0 %v1998_v36  ;;  %v2179_v32 = vld [vmem:[#allocation4 + $0x750] sm:$0xff]  ;;  %v2017_v36 = vld [vmem:[#allocation4 + $0x240] sm:$0xff] }
 0x4e6   :  { %2237 = vmatmul.f32.vlgmr.msrb.gmra.mxu3 %v4757_v24  ;;  %2332 = vmatpush.msra.mxu1 %v2015_v23  ;;  %v2099_v23 = vld [vmem:[#allocation4 + $0x4d0] sm:$0xff] }
 0x4e7   :  { %2245 = vmatpush.msra.mxu3 %v2123_v42  ;;  %2294 = vmatpush.msra.mxu2 %v1981_v6  ;;  %v2113_v42 = vld [vmem:[#allocation4 + $0x540] sm:$0xff]  ;;  %v2000_v6 = vld [vmem:[#allocation4 + $0x1b8] sm:$0xff] }
 0x4e8   :  { %2333 = vmatpush.msra.mxu1 %v1999_v47  ;;  %2314 = vmatpush.msra.mxu0 %v1982_v9  ;;  %v2066_v47 = vld [vmem:[#allocation4 + $0x3c8] sm:$0xff]  ;;  %v1984_v9 = vld [vmem:[#allocation4 + $0x138] sm:$0xff] }
 0x4e9   :  { %2246 = vmatpush.msra.mxu3 %v2107_v48  ;;  %2295 = vmatpush.msra.mxu2 %v1965_v59  ;;  %v2162_v48 = vld [vmem:[#allocation4 + $0x6c8] sm:$0xff]  ;;  %v2035_v59 = vld [vmem:[#allocation4 + $0x2d0] sm:$0xff] }
 0x4ea   :  { %2334 = vmatpush.msra.mxu1 %v1983_v54  ;;  %2315 = vmatpush.msra.mxu0 %v1966_v51  ;;  %v1985_v54 = vld [vmem:[#allocation4 + $0x140] sm:$0xff]  ;;  %v2019_v51 = vld [vmem:[#allocation4 + $0x250] sm:$0xff] }
 0x4eb   :  { %2247 = vmatpush.msra.mxu3 %v2091_v16  ;;  %2296 = vmatpush.msra.mxu2 %v1949_v43  ;;  %v2163_v16 = vld [vmem:[#allocation4 + $0x6d0] sm:$0xff]  ;;  %v2002_v43 = vld [vmem:[#allocation4 + $0x1c8] sm:$0xff] }
 0x4ec   :  { %2335 = vmatpush.msra.mxu1 %v1967_v10  ;;  %2316 = vmatpush.msra.mxu0 %v1950_v4  ;;  %v1952_v10 = vld [vmem:[#allocation4 + $0x38] sm:$0xff]  ;;  %v1987_v4 = vld [vmem:[#allocation4 + $0x150] sm:$0xff] }
 0x4ed   :  { %2248 = vmatpush.msra.mxu3 %v2075_v21  ;;  %v2146_v21 = vld [vmem:[#allocation4 + $0x648] sm:$0xff] }
 0x4ee   :  { %2336 = vmatpush.msra.mxu1 %v1951_v57  ;;  %v2180_v57 = vld [vmem:[#allocation4 + $0x758] sm:$0xff] }
 0x4ef   :  { %2249 = vmatpush.msra.mxu3 %v2059_v2  ;;  %v2080_v2 = vld [vmem:[#allocation4 + $0x438] sm:$0xff] }
 0x4f1   :  { %2250 = vmatpush.msra.mxu3 %v2043_v34  ;;  %v2081_v34 = vld [vmem:[#allocation4 + $0x440] sm:$0xff] }
 0x4f3   :  { %2251 = vmatpush.msra.mxu3 %v2027_v46  ;;  %v2130_v46 = vld [vmem:[#allocation4 + $0x5c8] sm:$0xff] }
 0x4f5   :  { %2252 = vmatpush.msra.mxu3 %v2011_v31  ;;  %v2065_v31 = vld [vmem:[#allocation4 + $0x3c0] sm:$0xff] }
 0x4f6   :  { %2671 = vmatmul.lmr.bf16.vlgmr.msra.gmra.1.mxu2  ;;  %2613 = vmatmul.lmr.bf16.vlgmr.msra.gmra.1.mxu0 }
 0x4f7   :  { %2253 = vmatpush.msra.mxu3 %v1995_v53  ;;  %2361 = vmatpush.msra.mxu2 %v2193_v39  ;;  %v2115_v53 = vld [vmem:[#allocation4 + $0x550] sm:$0xff] }
 0x4f8   :  { %2642 = vmatmul.lmr.bf16.vlgmr.msra.gmra.1.mxu1  ;;  %2381 = vmatpush.msra.mxu0 %v2194_v22  ;;  %v1971_v39 = vld [vmem:[#allocation4 + $0xd0] sm:$0xff]  ;;  %v2149_v22 = vld [vmem:[#allocation4 + $0x660] sm:$0xff] }
 0x4f9   :  { %2254 = vmatpush.msra.mxu3 %v1979_v0  ;;  %2362 = vmatpush.msra.mxu2 %v2177_v40  ;;  %v2048_v0 = vld [vmem:[#allocation4 + $0x338] sm:$0xff] }
 0x4fa   :  { %2401 = vmatpush.msra.mxu1 %v2195_v3  ;;  %2382 = vmatpush.msra.mxu0 %v2178_v15  ;;  %v2164_v40 = vld [vmem:[#allocation4 + $0x6d8] sm:$0xff]  ;;  %v2133_v15 = vld [vmem:[#allocation4 + $0x5e0] sm:$0xff] }
 0x4fb   :  { %2255 = vmatpush.msra.mxu3 %v1963_v30  ;;  %2363 = vmatpush.msra.mxu2 %v2161_v45  ;;  %v2049_v30 = vld [vmem:[#allocation4 + $0x340] sm:$0xff]  ;;  %v1955_v45 = vld [vmem:[#allocation4 + $0x50] sm:$0xff]  ;;  %v2132_v3 = vld [vmem:[#allocation4 + $0x5d8] sm:$0xff] }
 0x4fc   :  { %2402 = vmatpush.msra.mxu1 %v2179_v32  ;;  %2383 = vmatpush.msra.mxu0 %v2162_v48  ;;  %v2116_v32 = vld [vmem:[#allocation4 + $0x558] sm:$0xff]  ;;  %v2117_v48 = vld [vmem:[#allocation4 + $0x560] sm:$0xff] }
 0x4fd   :  { %2256 = vmatpush.msra.mxu3 %v1947_v12  ;;  %2364 = vmatpush.msra.mxu2 %v2145_v55  ;;  %v2032_v12 = vld [vmem:[#allocation4 + $0x2b8] sm:$0xff] }
 0x4fe   :  { %2257 = vmatmul.f32.vlgmr.msra.gmra.mxu3 %v4757_v24  ;;  %2403 = vmatpush.msra.mxu1 %v2163_v16  ;;  %v2148_v55 = vld [vmem:[#allocation4 + $0x658] sm:$0xff] }
 0x4ff   :  { %2261 = vmatpush.msrb.mxu3 %v2188_v5  ;;  %2365 = vmatpush.msra.mxu2 %v2129_v49  ;;  %v2082_v5 = vld [vmem:[#allocation4 + $0x448] sm:$0xff]  ;;  %v2199_v49 = vld [vmem:[#allocation4 + $0x7f0] sm:$0xff]  ;;  %v2100_v16 = vld [vmem:[#allocation4 + $0x4d8] sm:$0xff] }
 0x500   :  { %2384 = vmatpush.msra.mxu0 %v2146_v21  ;;  %2404 = vmatpush.msra.mxu1 %v2147_v63  ;;  %v2101_v21 = vld [vmem:[#allocation4 + $0x4e0] sm:$0xff]  ;;  %v2084_v63 = vld [vmem:[#allocation4 + $0x458] sm:$0xff] }
 0x501   :  { %2262 = vmatpush.msrb.mxu3 %v2172_v44  ;;  %2366 = vmatpush.msra.mxu2 %v2113_v42  ;;  %v2083_v44 = vld [vmem:[#allocation4 + $0x450] sm:$0xff] }
 0x502   :  { %2385 = vmatpush.msra.mxu0 %v2130_v46  ;;  %2405 = vmatpush.msra.mxu1 %v2131_v25  ;;  %v2183_v42 = vld [vmem:[#allocation4 + $0x770] sm:$0xff]  ;;  %v2085_v46 = vld [vmem:[#allocation4 + $0x460] sm:$0xff]  ;;  %v2068_v25 = vld [vmem:[#allocation4 + $0x3d8] sm:$0xff] }
 0x503   :  { %2263 = vmatpush.msrb.mxu3 %v2156_v37  ;;  %2367 = vmatpush.msra.mxu2 %v2097_v7  ;;  %v2016_v37 = vld [vmem:[#allocation4 + $0x238] sm:$0xff]  ;;  %v2167_v7 = vld [vmem:[#allocation4 + $0x6f0] sm:$0xff] }
 0x504   :  { %2386 = vmatpush.msra.mxu0 %v2114_v20  ;;  %2406 = vmatpush.msra.mxu1 %v2115_v53  ;;  %v2069_v20 = vld [vmem:[#allocation4 + $0x3e0] sm:$0xff]  ;;  %v2052_v53 = vld [vmem:[#allocation4 + $0x358] sm:$0xff] }
 0x505   :  { %2264 = vmatpush.msrb.mxu3 %v2140_v50  ;;  %2368 = vmatpush.msra.mxu2 %v2081_v34  ;;  %v2067_v50 = vld [vmem:[#allocation4 + $0x3d0] sm:$0xff] }
 0x506   :  { %2387 = vmatpush.msra.mxu0 %v2098_v41  ;;  %2407 = vmatpush.msra.mxu1 %v2099_v23  ;;  %v2151_v34 = vld [vmem:[#allocation4 + $0x670] sm:$0xff]  ;;  %v2053_v41 = vld [vmem:[#allocation4 + $0x360] sm:$0xff]  ;;  %v2036_v23 = vld [vmem:[#allocation4 + $0x2d8] sm:$0xff] }
 0x507   :  { %2265 = vmatpush.msrb.mxu3 %v2124_v28  ;;  %2369 = vmatpush.msra.mxu2 %v2065_v31  ;;  %v2001_v28 = vld [vmem:[#allocation4 + $0x1c0] sm:$0xff]  ;;  %v2135_v31 = vld [vmem:[#allocation4 + $0x5f0] sm:$0xff] }
 0x508   :  { %2388 = vmatpush.msra.mxu0 %v2082_v5  ;;  %2408 = vmatpush.msra.mxu1 %v2083_v44  ;;  %v2037_v5 = vld [vmem:[#allocation4 + $0x2e0] sm:$0xff]  ;;  %v2020_v44 = vld [vmem:[#allocation4 + $0x258] sm:$0xff] }
 0x509   :  { %2266 = vmatpush.msrb.mxu3 %v2108_v8  ;;  %2370 = vmatpush.msra.mxu2 %v2049_v30  ;;  %v2050_v8 = vld [vmem:[#allocation4 + $0x348] sm:$0xff]  ;;  %v2119_v30 = vld [vmem:[#allocation4 + $0x570] sm:$0xff] }
 0x50a   :  { %2389 = vmatpush.msra.mxu0 %v2066_v47  ;;  %2409 = vmatpush.msra.mxu1 %v2067_v50  ;;  %v2021_v47 = vld [vmem:[#allocation4 + $0x260] sm:$0xff]  ;;  %v2004_v50 = vld [vmem:[#allocation4 + $0x1d8] sm:$0xff] }
 0x50b   :  { %2267 = vmatpush.msrb.mxu3 %v2092_v38  ;;  %2371 = vmatpush.msra.mxu2 %v2033_v13  ;;  %v2051_v38 = vld [vmem:[#allocation4 + $0x350] sm:$0xff] }
 0x50c   :  { %2390 = vmatpush.msra.mxu0 %v2050_v8  ;;  %2410 = vmatpush.msra.mxu1 %v2051_v38  ;;  %v2103_v13 = vld [vmem:[#allocation4 + $0x4f0] sm:$0xff]  ;;  %v2005_v8 = vld [vmem:[#allocation4 + $0x1e0] sm:$0xff]  ;;  %v1988_v38 = vld [vmem:[#allocation4 + $0x158] sm:$0xff] }
 0x50d   :  { %2268 = vmatpush.msrb.mxu3 %v2076_v29  ;;  %2372 = vmatpush.msra.mxu2 %v2017_v36  ;;  %v2034_v29 = vld [vmem:[#allocation4 + $0x2c8] sm:$0xff]  ;;  %v2087_v36 = vld [vmem:[#allocation4 + $0x470] sm:$0xff] }
 0x50e   :  { %2391 = vmatpush.msra.mxu0 %v2034_v29  ;;  %2411 = vmatpush.msra.mxu1 %v2035_v59  ;;  %v1989_v29 = vld [vmem:[#allocation4 + $0x160] sm:$0xff]  ;;  %v1972_v59 = vld [vmem:[#allocation4 + $0xd8] sm:$0xff] }
 0x50f   :  { %2269 = vmatpush.msrb.mxu3 %v2060_v14  ;;  %2373 = vmatpush.msra.mxu2 %v2001_v28  ;;  %v1968_v14 = vld [vmem:[#allocation4 + $0xb8] sm:$0xff]  ;;  %v2071_v28 = vld [vmem:[#allocation4 + $0x3f0] sm:$0xff] }
 0x510   :  { %2412 = vmatpush.msra.mxu1 %v2019_v51  ;;  %v1956_v51 = vld [vmem:[#allocation4 + $0x58] sm:$0xff] }
 0x511   :  { %2270 = vmatpush.msrb.mxu3 %v2044_v19  ;;  %2374 = vmatpush.msra.mxu2 %v1985_v54  ;;  %v1969_v19 = vld [vmem:[#allocation4 + $0xc0] sm:$0xff]  ;;  %v2055_v54 = vld [vmem:[#allocation4 + $0x370] sm:$0xff] }
 0x513   :  { %2271 = vmatpush.msrb.mxu3 %v2028_v35  ;;  %v2018_v35 = vld [vmem:[#allocation4 + $0x248] sm:$0xff]  ;;  %2375 = vmatpush.msra.mxu2 %v1969_v19  ;;  %v2039_v19 = vld [vmem:[#allocation4 + $0x2f0] sm:$0xff] }
 0x514   :  { %2392 = vmatpush.msra.mxu0 %v2018_v35  ;;  %v1973_v35 = vld [vmem:[#allocation4 + $0xe0] sm:$0xff] }
 0x515   :  { %2272 = vmatpush.msrb.mxu3 %v2012_v58  ;;  %v1953_v58 = vld [vmem:[#allocation4 + $0x40] sm:$0xff] }
 0x516   :  { %2376 = vmatpush.msra.mxu2 %v1953_v58  ;;  %2393 = vmatpush.msra.mxu0 %v2002_v43  ;;  %v2023_v58 = vld [vmem:[#allocation4 + $0x270] sm:$0xff]  ;;  %v2200_v43 = vld [vmem:[#allocation4 + $0x7f8] sm:$0xff] }
 0x517   :  { %2273 = vmatpush.msrb.mxu3 %v1996_v33  ;;  %v2003_v33 = vld [vmem:[#allocation4 + $0x1d0] sm:$0xff]  ;;  %2672 = vmatmul.lmr.bf16.vlgmr.msra.gmra.1.mxu2 }
 0x518   :  { %2413 = vmatpush.msra.mxu1 %v2003_v33  ;;  %v1957_v33 = vld [vmem:[#allocation4 + $0x60] sm:$0xff] }
 0x519   :  { %2274 = vmatpush.msrb.mxu3 %v1980_v61  ;;  %v2196_v61 = vld [vmem:[#allocation4 + $0x7d8] sm:$0xff] }
 0x51a   :  { %2414 = vmatpush.msra.mxu1 %v1987_v4  ;;  %v2184_v4 = vld [vmem:[#allocation4 + $0x778] sm:$0xff] }
 0x51b   :  { %2275 = vmatpush.msrb.mxu3 %v1964_v26  ;;  %v1986_v26 = vld [vmem:[#allocation4 + $0x148] sm:$0xff] }
 0x51c   :  { %2394 = vmatpush.msra.mxu0 %v1986_v26  ;;  %2415 = vmatpush.msra.mxu1 %v1971_v39  ;;  %v2007_v26 = vld [vmem:[#allocation4 + $0x1f0] sm:$0xff] }
 0x51d   :  { %2276 = vmatpush.msrb.mxu3 %v1948_v56  ;;  %v2197_v56 = vld [vmem:[#allocation4 + $0x7e0] sm:$0xff] }
 0x51e   :  { %2277 = vmatmul.f32.vlgmr.msrb.gmra.mxu3 %v4757_v24  ;;  %2441 = vmatpush.msra.mxu2 %v2197_v56  ;;  %v1991_v56 = vld [vmem:[#allocation4 + $0x170] sm:$0xff] }
 0x51f   :  { %2341 = vmatpush.msra.mxu3 %v2192_v17  ;;  %v1970_v17 = vld [vmem:[#allocation4 + $0xc8] sm:$0xff]  ;;  %2416 = vmatpush.msra.mxu1 %v1955_v45 }
 0x520   :  { %2395 = vmatpush.msra.mxu0 %v1970_v17  ;;  %2643 = vmatmul.lmr.bf16.vlgmr.msra.gmra.1.mxu1  ;;  %v2168_v17 = vld [vmem:[#allocation4 + $0x6f8] sm:$0xff]  ;;  %v1958_v45 = vld [vmem:[#allocation4 + $0x68] sm:$0xff] }
 0x521   :  { %2342 = vmatpush.msra.mxu3 %v2176_v11  ;;  %v2181_v11 = vld [vmem:[#allocation4 + $0x760] sm:$0xff]  ;;  %2481 = vmatpush.msra.mxu1 %v2199_v49  ;;  %v2088_v49 = vld [vmem:[#allocation4 + $0x478] sm:$0xff] }
 0x522   :  { %2442 = vmatpush.msra.mxu2 %v2181_v11  ;;  %v1974_v11 = vld [vmem:[#allocation4 + $0xe8] sm:$0xff] }
 0x523   :  { %2343 = vmatpush.msra.mxu3 %v2160_v62  ;;  %v1954_v62 = vld [vmem:[#allocation4 + $0x48] sm:$0xff]  ;;  %2482 = vmatpush.msra.mxu1 %v2183_v42  ;;  %v2024_v42 = vld [vmem:[#allocation4 + $0x278] sm:$0xff] }
 0x524   :  { %2396 = vmatpush.msra.mxu0 %v1954_v62  ;;  %v2152_v62 = vld [vmem:[#allocation4 + $0x678] sm:$0xff] }
 0x525   :  { %2344 = vmatpush.msra.mxu3 %v2144_v18  ;;  %v2165_v18 = vld [vmem:[#allocation4 + $0x6e0] sm:$0xff]  ;;  %2614 = vmatmul.lmr.bf16.vlgmr.msra.gmra.1.mxu0 }
 0x526   :  { %2443 = vmatpush.msra.mxu2 %v2165_v18  ;;  %2483 = vmatpush.msra.mxu1 %v2167_v7  ;;  %v1959_v18 = vld [vmem:[#allocation4 + $0x70] sm:$0xff]  ;;  %v1960_v7 = vld [vmem:[#allocation4 + $0x78] sm:$0xff] }
 0x527   :  { %2345 = vmatpush.msra.mxu3 %v2128_v60  ;;  %v2198_v60 = vld [vmem:[#allocation4 + $0x7e8] sm:$0xff] }
 0x528   :  { %2444 = vmatpush.msra.mxu2 %v2149_v22  ;;  %2461 = vmatpush.msra.mxu0 %v2198_v60  ;;  %v2120_v22 = vld [vmem:[#allocation4 + $0x578] sm:$0xff] }
 0x529   :  { %2346 = vmatpush.msra.mxu3 %v2112_v1  ;;  %v2182_v1 = vld [vmem:[#allocation4 + $0x768] sm:$0xff]  ;;  %2484 = vmatpush.msra.mxu1 %v2151_v34 }
 0x52a   :  { %2445 = vmatpush.msra.mxu2 %v2133_v15  ;;  %2462 = vmatpush.msra.mxu0 %v2182_v1  ;;  %v2072_v15 = vld [vmem:[#allocation4 + $0x3f8] sm:$0xff] }
 0x52b   :  { %2347 = vmatpush.msra.mxu3 %v2096_v52  ;;  %v2166_v52 = vld [vmem:[#allocation4 + $0x6e8] sm:$0xff]  ;;  %2485 = vmatpush.msra.mxu1 %v2135_v31  ;;  %v2040_v1 = vld [vmem:[#allocation4 + $0x2f8] sm:$0xff] }
 0x52c   :  { %2446 = vmatpush.msra.mxu2 %v2117_v48  ;;  %2463 = vmatpush.msra.mxu0 %v2166_v52  ;;  %v2008_v48 = vld [vmem:[#allocation4 + $0x1f8] sm:$0xff] }
 0x52d   :  { %2348 = vmatpush.msra.mxu3 %v2080_v2  ;;  %v2150_v2 = vld [vmem:[#allocation4 + $0x668] sm:$0xff]  ;;  %2486 = vmatpush.msra.mxu1 %v2119_v30  ;;  %v1976_v52 = vld [vmem:[#allocation4 + $0xf8] sm:$0xff] }
 0x52e   :  { %2447 = vmatpush.msra.mxu2 %v2101_v21  ;;  %2464 = vmatpush.msra.mxu0 %v2150_v2 }
 0x52f   :  { %2349 = vmatpush.msra.mxu3 %v2064_v27  ;;  %v2134_v27 = vld [vmem:[#allocation4 + $0x5e8] sm:$0xff]  ;;  %2487 = vmatpush.msra.mxu1 %v2103_v13 }
 0x530   :  { %2448 = vmatpush.msra.mxu2 %v2085_v46  ;;  %2465 = vmatpush.msra.mxu0 %v2134_v27 }
 0x531   :  { %2350 = vmatpush.msra.mxu3 %v2048_v0  ;;  %v2118_v0 = vld [vmem:[#allocation4 + $0x568] sm:$0xff]  ;;  %2488 = vmatpush.msra.mxu1 %v2087_v36 }
 0x532   :  { %2449 = vmatpush.msra.mxu2 %v2069_v20  ;;  %2466 = vmatpush.msra.mxu0 %v2118_v0 }
 0x533   :  { %2351 = vmatpush.msra.mxu3 %v2032_v12  ;;  %v2102_v12 = vld [vmem:[#allocation4 + $0x4e8] sm:$0xff]  ;;  %2489 = vmatpush.msra.mxu1 %v2071_v28 }
 0x534   :  { %2450 = vmatpush.msra.mxu2 %v2053_v41  ;;  %2467 = vmatpush.msra.mxu0 %v2102_v12 }
 0x535   :  { %2352 = vmatpush.msra.mxu3 %v2016_v37  ;;  %v2086_v37 = vld [vmem:[#allocation4 + $0x468] sm:$0xff]  ;;  %2490 = vmatpush.msra.mxu1 %v2055_v54 }
 0x536   :  { %2451 = vmatpush.msra.mxu2 %v2037_v5  ;;  %2468 = vmatpush.msra.mxu0 %v2086_v37 }
 0x537   :  { %2353 = vmatpush.msra.mxu3 %v2000_v6  ;;  %v2070_v6 = vld [vmem:[#allocation4 + $0x3e8] sm:$0xff]  ;;  %2491 = vmatpush.msra.mxu1 %v2039_v19 }
 0x538   :  { %2452 = vmatpush.msra.mxu2 %v2021_v47  ;;  %2469 = vmatpush.msra.mxu0 %v2070_v6 }
 0x539   :  { %2354 = vmatpush.msra.mxu3 %v1984_v9  ;;  %v2054_v9 = vld [vmem:[#allocation4 + $0x368] sm:$0xff]  ;;  %2492 = vmatpush.msra.mxu1 %v2023_v58 }
 0x53a   :  { %2453 = vmatpush.msra.mxu2 %v2005_v8  ;;  %2470 = vmatpush.msra.mxu0 %v2054_v9 }
 0x53b   :  { %2355 = vmatpush.msra.mxu3 %v1968_v14  ;;  %v2038_v14 = vld [vmem:[#allocation4 + $0x2e8] sm:$0xff]  ;;  %2493 = vmatpush.msra.mxu1 %v2007_v26 }
 0x53c   :  { %2454 = vmatpush.msra.mxu2 %v1989_v29  ;;  %2471 = vmatpush.msra.mxu0 %v2038_v14 }
 0x53d   :  { %2356 = vmatpush.msra.mxu3 %v1952_v10  ;;  %v2022_v10 = vld [vmem:[#allocation4 + $0x268] sm:$0xff]  ;;  %2494 = vmatpush.msra.mxu1 %v1991_v56 }
 0x53e   :  { %2357 = vmatmul.f32.vlgmr.msra.gmra.mxu3 %v4757_v24  ;;  %2455 = vmatpush.msra.mxu2 %v1973_v35 }
 0x53f   :  { %2421 = vmatpush.msrb.mxu3 %v2196_v61  ;;  %2472 = vmatpush.msra.mxu0 %v2022_v10  ;;  %v2006_v61 = vld [vmem:[#allocation4 + $0x1e8] sm:$0xff] }
 0x540   :  { %2456 = vmatpush.msra.mxu2 %v1957_v33 }
 0x541   :  { %2422 = vmatpush.msrb.mxu3 %v2180_v57  ;;  %v1990_v57 = vld [vmem:[#allocation4 + $0x168] sm:$0xff]  ;;  %2473 = vmatpush.msra.mxu0 %v2006_v61 }
 0x542   :  { %2673 = vmatmul.lmr.bf16.vlgmr.msra.gmra.1.mxu2 }
 0x543   :  { %2423 = vmatpush.msrb.mxu3 %v2164_v40  ;;  %v1975_v40 = vld [vmem:[#allocation4 + $0xf0] sm:$0xff]  ;;  %2474 = vmatpush.msra.mxu0 %v1990_v57 }
 0x544   :  { %2495 = vmatpush.msra.mxu1 %v1975_v40 }
 0x545   :  { %2424 = vmatpush.msrb.mxu3 %v2148_v55  ;;  %v2136_v55 = vld [vmem:[#allocation4 + $0x5f8] sm:$0xff]  ;;  %2475 = vmatpush.msra.mxu0 %v1974_v11 }
 0x546   :  { %2496 = vmatpush.msra.mxu1 %v1959_v18 }
 0x547   :  { %2425 = vmatpush.msrb.mxu3 %v2132_v3  ;;  %2476 = vmatpush.msra.mxu0 %v1958_v45  ;;  %v2104_v3 = vld [vmem:[#allocation4 + $0x4f8] sm:$0xff] }
 0x548   :  { %2615 = vmatmul.lmr.bf16.vlgmr.msra.gmra.1.mxu0  ;;  %2644 = vmatmul.lmr.bf16.vlgmr.msra.gmra.1.mxu1 }
 0x549   :  { %2426 = vmatpush.msrb.mxu3 %v2116_v32  ;;  %v2056_v32 = vld [vmem:[#allocation4 + $0x378] sm:$0xff] }
 0x54b   :  { %2427 = vmatpush.msrb.mxu3 %v2100_v16  ;;  %v1992_v16 = vld [vmem:[#allocation4 + $0x178] sm:$0xff] }
 0x54d   :  { %2428 = vmatpush.msrb.mxu3 %v2084_v63 }
 0x54f   :  { %2429 = vmatpush.msrb.mxu3 %v2068_v25 }
 0x551   :  { %2430 = vmatpush.msrb.mxu3 %v2052_v53 }
 0x553   :  { %2431 = vmatpush.msrb.mxu3 %v2036_v23 }
 0x555   :  { %2432 = vmatpush.msrb.mxu3 %v2020_v44 }
 0x557   :  { %2433 = vmatpush.msrb.mxu3 %v2004_v50 }
 0x559   :  { %2434 = vmatpush.msrb.mxu3 %v1988_v38 }
 0x55b   :  { %2435 = vmatpush.msrb.mxu3 %v1972_v59 }
 0x55d   :  { %2436 = vmatpush.msrb.mxu3 %v1956_v51 }
 0x55e   :  { %2437 = vmatmul.f32.vlgmr.msrb.gmra.mxu3 %v4757_v24 }
 0x55f   :  { %2501 = vmatpush.msra.mxu3 %v2200_v43 }
 0x561   :  { %2502 = vmatpush.msra.mxu3 %v2184_v4  ;;  %v2218_v39 = vpop.f32.mrf.mxu3 }
 0x562   :  { %2521 = vst [vmem:[#allocation7] sm:$0xff] %v2218_v39 }
 0x563   :  { %2503 = vmatpush.msra.mxu3 %v2168_v17 }
 0x565   :  { %2504 = vmatpush.msra.mxu3 %v2152_v62 }
 0x567   :  { %2505 = vmatpush.msra.mxu3 %v2136_v55 }
 0x569   :  { %2506 = vmatpush.msra.mxu3 %v2120_v22  ;;  %v2238_v60 = vpop.f32.mrf.mxu3 }
 0x56a   :  { %2522 = vst [vmem:[#allocation7 + $0x8] sm:$0xff] %v2238_v60 }
 0x56b   :  { %2507 = vmatpush.msra.mxu3 %v2104_v3 }
 0x56d   :  { %2508 = vmatpush.msra.mxu3 %v2088_v49 }
 0x56f   :  { %2509 = vmatpush.msra.mxu3 %v2072_v15 }
 0x571   :  { %2510 = vmatpush.msra.mxu3 %v2056_v32 }
 0x573   :  { %2511 = vmatpush.msra.mxu3 %v2040_v1  ;;  %v2318_v2 = vpop.f32.mrf.mxu0 }
 0x574   :  { %2526 = vst [vmem:[#allocation7 + $0x28] sm:$0xff] %v2318_v2 }
 0x575   :  { %2512 = vmatpush.msra.mxu3 %v2024_v42  ;;  %v2338_v34 = vpop.f32.mrf.mxu1 }
 0x576   :  { %2527 = vst [vmem:[#allocation7 + $0x30] sm:$0xff] %v2338_v34 }
 0x577   :  { %2513 = vmatpush.msra.mxu3 %v2008_v48 }
 0x579   :  { %2514 = vmatpush.msra.mxu3 %v1992_v16  ;;  %v2298_v63 = vpop.f32.mrf.mxu2 }
 0x57a   :  { %2525 = vst [vmem:[#allocation7 + $0x20] sm:$0xff] %v2298_v63 }
 0x57b   :  { %2515 = vmatpush.msra.mxu3 %v1976_v52 }
 0x57d   :  { %2516 = vmatpush.msra.mxu3 %v1960_v7 }
 0x57e   :  { %2517 = vmatmul.f32.vlgmr.msra.gmra.mxu3 %v4757_v24 }
 0x581   :  { %v2258_v21 = vpop.f32.mrf.mxu3 }
 0x582   :  { %2523 = vst [vmem:[#allocation7 + $0x10] sm:$0xff] %v2258_v21 }
 0x59a   :  { %v2378_v27 = vpop.f32.mrf.mxu2 }
 0x59b   :  { %2529 = vst [vmem:[#allocation7 + $0x40] sm:$0xff] %v2378_v27 }
 0x59d   :  { %v2418_v20 = vpop.f32.mrf.mxu1 }
 0x59e   :  { %2531 = vst [vmem:[#allocation7 + $0x50] sm:$0xff] %v2418_v20 }
 0x5a1   :  { %v2278_v46 = vpop.f32.mrf.mxu3 }
 0x5a2   :  { %2524 = vst [vmem:[#allocation7 + $0x18] sm:$0xff] %v2278_v46  ;;  %v2398_v31 = vpop.f32.mrf.mxu0 }
 0x5a3   :  { %2530 = vst [vmem:[#allocation7 + $0x48] sm:$0xff] %v2398_v31 }
 0x5c1   :  { %v2358_v25 = vpop.f32.mrf.mxu3 }
 0x5c2   :  { %2528 = vst [vmem:[#allocation7 + $0x38] sm:$0xff] %v2358_v25 }
 0x5c5   :  { %v2458_v24 = vpop.f32.mrf.mxu2  ;;  %v2478_v0 = vpop.f32.mrf.mxu0 }
 0x5c6   :  { %2533 = vst [vmem:[#allocation7 + $0x60] sm:$0xff] %v2458_v24  ;;  %v2498_v30 = vpop.f32.mrf.mxu1 }
 0x5c7   :  { %2534 = vst [vmem:[#allocation7 + $0x68] sm:$0xff] %v2478_v0 }
 0x5c8   :  { %2535 = vst [vmem:[#allocation7 + $0x70] sm:$0xff] %v2498_v30 }
 0x5e1   :  { %v2438_v53 = vpop.f32.mrf.mxu3 }
 0x5e2   :  { %2532 = vst [vmem:[#allocation7 + $0x58] sm:$0xff] %v2438_v53 }
 0x601   :  { %v2518_v41 = vpop.f32.mrf.mxu3 }
 0x602   :  { %2536 = vst [vmem:[#allocation7 + $0x78] sm:$0xff] %v2518_v41 }
 0x603   :  { %2547 = dma.vmem_to_hbm [thread:$0]  %s2543_s20, 2048, %s2545_s9, [#allocation6]  }
 0x604   :  { %2754 = dma.done.wait [#allocation6], 2048  }
 0x605   :  { %2755 = vsyncadd [#allocation6], 4294965248 }
 0x606   :  { %2552 = vsyncpa [#allocation5], 1 }
 0x607   :  { %2553 = vsyncpa [#allocation6], 1 }

</bundles_post_ra>
